<compile_context>
chip_gen: v5e
topology: v5e:2x2
jax: 0.10.0
libtpu: 0.0.40
codegen_flags: <defaults>
</compile_context>

<pallas_src>
import jax
import jax.numpy as jnp
import numpy as np
from jax import lax
from jax.experimental import pallas as pl
from jax.experimental.pallas import tpu as pltpu

# ---------------- synthetic "args" ----------------
VOCAB_SIZE = 100
EMBED_DIM = 32
HIDDEN_DIM = 32           # bidirectional GRU -> per-direction hidden = 16
NUM_CLASS = 2
Z_DIM = 2
BATCH = 2
SEQ_LEN = 8
LN_EPS = 1e-5

HD = HIDDEN_DIM // 2      # 16
H = HIDDEN_DIM            # 32
GB = 128                  # lanes per gate block (r | z | n), 128-aligned
GW = 3 * GB               # 384 = per-GRU gate width
LB = SEQ_LEN * BATCH
NEG_BIG = -1000000.0

# parameter-slab row offsets (one slab for BOTH GRUs + LN + both FC heads)
_R_WI = 0                     # rows [ 0,32): [Wi_gen | Wi_cls]        (E, 2*GW)
_R_WH = EMBED_DIM             # rows [32,64): [Wh_gen | Wh_cls]        (2HD, 2*GW)
_R_WFC = _R_WH + 2 * HD       # rows [64,96): [gen decision (rep) | cls_fc | 0]
_R_BX = _R_WFC + H            # row 96: [bx_gen | bx_cls]
_R_MISC = _R_BX + 1           # row 97: [bhn_gen | bhn_cls | gamma | beta | cls_b | 0]
_R_BD = _R_MISC + 1           # row 98: [gen_fc (b1-b0) replicated | 0]
SLAB_ROWS = _R_BD + 1         # 99
SLAB_COLS = 2 * GW            # 768


# ---------------- fused bidirectional GRU step (trace-time helper) ----------------
def _gru_gate_step(xs, h, wh, bhn):
    """One biGRU step on 128-lane-padded gate blocks (PyTorch order r, z, n).

    xs  : (B, GW) combined input-gate activations (fwd lanes [0,HD), bwd [HD,2HD))
    h   : (B, GB) hidden state, fwd lanes [0,HD), bwd [HD,2HD), rest exactly 0
    wh  : (2*HD, GW) hidden->gate weights (block structure inside each gate block)
    bhn : (B, GB) n-gate hidden bias (pre-broadcast, padding lanes 0)
    """
    hg = jnp.dot(h[:, 0:2 * HD], wh, preferred_element_type=jnp.float32)   # (B, GW)
    r = jax.nn.sigmoid(xs[:, 0:GB] + hg[:, 0:GB])
    z = jax.nn.sigmoid(xs[:, GB:2 * GB] + hg[:, GB:2 * GB])
    n = jnp.tanh(xs[:, 2 * GB:3 * GB] + r * (hg[:, 2 * GB:3 * GB] + bhn))
    return (1.0 - z) * n + z * h


# ---------------- the single fused Pallas kernel ----------------
def fused_rnp_kernel(x_ref, mg_ref, slab_ref, out_ref):
    """Generator + classifier stages fused; everything stays in VMEM/vregs.

    x_ref   : (LB, E)   masked embedding, time-major rows (row = t*B + b)
    mg_ref  : (LB, 2)   lane 0 = sequence mask, lane 1 = gumbel delta (g1 - g0)
    slab_ref: (99, 768) packed parameter slab (single DMA)
    out_ref : (LB+B,128) rows [0,LB): z one-hot in lanes 0:2;
                         rows [LB,LB+B): cls logits in lanes 0:NUM_CLASS
    """
    f32 = jnp.float32
    B, L = BATCH, SEQ_LEN

    x = x_ref[...]                                   # (LB, E)
    mg = mg_ref[...]
    m_col, gd_col = mg[:, 0:1], mg[:, 1:2]           # (LB, 1) each

    # lane-index masks (hoisted constants; avoid integer mod for lowering safety)
    lane_b = lax.broadcasted_iota(jnp.int32, (B, GB), 1)
    lane_lb = lax.broadcasted_iota(jnp.int32, (LB, GB), 1)
    lane_gw = lax.broadcasted_iota(jnp.int32, (B, GW), 1)
    fwd_half_b = lane_b < HD                         # (B, GB)
    fwd_mask = ((lane_gw < HD)
                | ((lane_gw >= GB) & (lane_gw < GB + HD))
                | ((lane_gw >= 2 * GB) & (lane_gw < 2 * GB + HD)))   # (B, GW)

    # Hoisted input->gate projections for BOTH GRUs: one MXU matmul, biases for
    # the gen GRU folded in (cls biases are added after the z1 scaling).
    xg_both = jnp.dot(x, slab_ref[_R_WI:_R_WI + EMBED_DIM, :],
                      preferred_element_type=f32)                     # (LB, 2*GW)
    xg_gen = xg_both[:, 0:GW] + slab_ref[_R_BX:_R_BX + 1, 0:GW]
    xg_cls_raw = xg_both[:, GW:2 * GW]

    # ---------------- generator biGRU (fully unrolled) ----------------
    wh_gen = slab_ref[_R_WH:_R_WH + 2 * HD, 0:GW]
    bhn_gen = jnp.broadcast_to(slab_ref[_R_MISC:_R_MISC + 1, 0:GB], (B, GB))
    h = jnp.zeros((B, GB), f32)
    hs = []
    for s in range(L):
        # fwd direction consumes time s, bwd direction time L-1-s; this select
        # depends only on xg (not h) so the scheduler can hoist it off the
        # serial recurrence chain.
        xs = jnp.where(fwd_mask,
                       xg_gen[s * B:(s + 1) * B],
                       xg_gen[(L - 1 - s) * B:(L - s) * B])
        h = _gru_gate_step(xs, h, wh_gen, bhn_gen)
        hs.append(h)                                  # kept in vregs, no VMEM scratch

    # re-assemble per-time outputs: row-block t = [fwd_t | bwd_t | 0 ...]
    hcat = jnp.concatenate(hs, axis=0)                # step-major
    hrev = jnp.concatenate(hs[::-1], axis=0)
    hseq = jnp.where(lane_lb < HD, hcat, hrev)        # (LB, GB), pad lanes exactly 0

    # LayerNorm over the 2*HD real lanes (padding is exactly zero -> sum trick)
    mu = jnp.sum(hseq, axis=-1, keepdims=True) * (1.0 / H)
    var = jnp.sum(hseq * hseq, axis=-1, keepdims=True) * (1.0 / H) - mu * mu
    hn = (hseq - mu) * lax.rsqrt(var + LN_EPS)
    hn = (hn * slab_ref[_R_MISC:_R_MISC + 1, 2 * GB:3 * GB]
          + slab_ref[_R_MISC:_R_MISC + 1, 3 * GB:4 * GB])            # gamma, beta

    # gen_fc as decision column (w1 - w0) replicated across all GW lanes, so the
    # hard straight-through sample z1 is already lane-replicated.  (dropout = id)
    d = jnp.dot(hn[:, 0:2 * HD], slab_ref[_R_WFC:_R_WFC + H, 0:GW],
                preferred_element_type=f32)
    d = d + slab_ref[_R_BD:_R_BD + 1, 0:GW] + gd_col
    z1_rep = (d > 0.0).astype(f32)                    # (LB, GW), ties -> class 0

    # z one-hot -> lane-dense 128-wide output rows [0, LB)
    z1 = z1_rep[:, 0:GB]
    out_ref[0:LB, :] = jnp.where(lane_lb == 0, 1.0 - z1,
                                 jnp.where(lane_lb == 1, z1, 0.0))

    # ---------------- classifier biGRU ----------------
    # (x * z1) @ Wi_cls == z1 * (x @ Wi_cls): reuse the hoisted projection.
    xg_cls = xg_cls_raw * z1_rep + slab_ref[_R_BX:_R_BX + 1, GW:2 * GW]
    wh_cls = slab_ref[_R_WH:_R_WH + 2 * HD, GW:2 * GW]
    bhn_cls = jnp.broadcast_to(slab_ref[_R_MISC:_R_MISC + 1, GB:2 * GB], (B, GB))
    h = jnp.zeros((B, GB), f32)
    pool = jnp.full((B, GB), NEG_BIG, f32)
    for s in range(L):
        xs = jnp.where(fwd_mask,
                       xg_cls[s * B:(s + 1) * B],
                       xg_cls[(L - 1 - s) * B:(L - s) * B])
        h = _gru_gate_step(xs, h, wh_cls, bhn_cls)
        # masked running max over time: fwd lanes use m[s], bwd lanes m[L-1-s]
        m_s = jnp.where(fwd_half_b,
                        m_col[s * B:(s + 1) * B],
                        m_col[(L - 1 - s) * B:(L - s) * B])
        pool = jnp.maximum(pool, h * m_s + (1.0 - m_s) * NEG_BIG)

    # cls_fc: real weights in lanes 0:NUM_CLASS, rest 0 -> lane-dense output rows
    cls = (jnp.dot(pool[:, 0:2 * HD], slab_ref[_R_WFC:_R_WFC + H, GW:GW + GB],
                   preferred_element_type=f32)
           + slab_ref[_R_MISC:_R_MISC + 1, 4 * GB:5 * GB])
    out_ref[LB:LB + B, :] = cls


# ---------------- pallas_call wrapper ----------------
def _full2d(shape):
    return pl.BlockSpec(shape, lambda i: (0, 0))


def rnp_fused_call(x_flat, mg, slab):
    # TODO(synk): at production sizes add a leading "parallel" batch grid axis
    # (v7x has 2 TensorCores), a time-blocked BlockSpec pipeline with explicit
    # vmem_limit_bytes, and optionally bf16 Wi/x for the hoisted projection on
    # v6e/v7x; at B=2/L=8 one VMEM-resident grid step is optimal.
    return pl.pallas_call(
        fused_rnp_kernel,
        out_shape=jax.ShapeDtypeStruct((LB + BATCH, 128), jnp.float32),
        grid=(1,),
        in_specs=[_full2d(x_flat.shape), _full2d(mg.shape), _full2d(slab.shape)],
        out_specs=_full2d((LB + BATCH, 128)),
        compiler_params=pltpu.CompilerParams(dimension_semantics=("arbitrary",)),
    )(x_flat, mg, slab)


# ---------------- full forward (mirrors Sp_norm_rnp.forward, eval mode) ----------------
def sp_norm_rnp_forward(params, inputs, masks, gumbel_key):
    B, L = inputs.shape
    emb = jnp.take(params["embedding"], inputs, axis=0)               # (B, L, E)
    x = masks[:, :, None] * emb                                        # masked embedding
    x_flat = jnp.transpose(x, (1, 0, 2)).reshape(L * B, EMBED_DIM)     # time-major rows
    g = jax.random.gumbel(gumbel_key, (L * B, Z_DIM), dtype=jnp.float32)
    gd = g[:, 1] - g[:, 0]                 # only the noise delta decides the hard argmax
    m_flat = jnp.transpose(masks, (1, 0)).reshape(L * B)
    mg = jnp.stack([m_flat, gd], axis=-1)                              # (LB, 2)

    out = rnp_fused_call(x_flat, mg, params["slab"])
    z = out[0:L * B, 0:Z_DIM].reshape(L, B, Z_DIM).transpose(1, 0, 2)  # (B, L, 2)
    cls_logits = out[L * B:L * B + B, 0:NUM_CLASS]                     # (B, C)
    return z, cls_logits


# ---------------- parameter init + packing ----------------
def _uniform(key, shape, bound):
    return jax.random.uniform(key, shape, jnp.float32, -bound, bound)


def pack_param_slab(p):
    """Pack every (tiny) weight into ONE lane-aligned f32 slab => a single DMA."""
    slab = np.zeros((SLAB_ROWS, SLAB_COLS), np.float32)

    def pack_gru(col0, fwd, bwd):
        for g in range(3):                     # gate order r, z, n (PyTorch)
            for off, d in ((0, fwd), (HD, bwd)):
                wi = np.asarray(d["wi"][:, g * HD:(g + 1) * HD])
                wh = np.asarray(d["wh"][:, g * HD:(g + 1) * HD])
                bi = np.asarray(d["bi"][g * HD:(g + 1) * HD])
                bh = np.asarray(d["bh"][g * HD:(g + 1) * HD])
                c = col0 + g * GB + off
                slab[_R_WI:_R_WI + EMBED_DIM, c:c + HD] = wi
                slab[_R_WH + off:_R_WH + off + HD, c:c + HD] = wh
                # fold b_hh into the input bias for r/z; the n-gate hidden bias
                # must stay inside r*(Wh h + b_hn)
                slab[_R_BX, c:c + HD] = bi + (bh if g < 2 else 0.0)
        mcol = 0 if col0 == 0 else GB
        slab[_R_MISC, mcol:mcol + HD] = np.asarray(fwd["bh"][2 * HD:3 * HD])
        slab[_R_MISC, mcol + HD:mcol + 2 * HD] = np.asarray(bwd["bh"][2 * HD:3 * HD])

    pack_gru(0, *p["gen_gru"])
    pack_gru(GW, *p["cls_gru"])

    # gen_fc as a decision column (w1 - w0) replicated across all GW lanes
    wd = np.asarray(p["gen_fc_w"][:, 1] - p["gen_fc_w"][:, 0])        # (H,)
    slab[_R_WFC:_R_WFC + H, 0:GW] = wd[:, None]
    slab[_R_BD, 0:GW] = float(p["gen_fc_b"][1] - p["gen_fc_b"][0])
    # cls_fc padded to a full 128-lane tile (logits land in lanes 0:NUM_CLASS)
    slab[_R_WFC:_R_WFC + H, GW:GW + NUM_CLASS] = np.asarray(p["cls_fc_w"])
    slab[_R_MISC, 4 * GB:4 * GB + NUM_CLASS] = np.asarray(p["cls_fc_b"])
    # LayerNorm affine (zero padding keeps garbage lanes at exactly 0)
    slab[_R_MISC, 2 * GB:2 * GB + H] = np.asarray(p["ln_gamma"])
    slab[_R_MISC, 3 * GB:3 * GB + H] = np.asarray(p["ln_beta"])
    return jnp.asarray(slab)


def init_params(key):
    # TODO(synk): num_layers > 1 (stacked biGRU) not implemented.
    p = {}
    key, kemb = jax.random.split(key)
    p["embedding"] = jax.random.normal(kemb, (VOCAB_SIZE, EMBED_DIM), jnp.float32)

    def gru_dir(key):
        b = float(HD) ** -0.5
        key, k1, k2, k3, k4 = jax.random.split(key, 5)
        return key, dict(wi=_uniform(k1, (EMBED_DIM, 3 * HD), b),
                         wh=_uniform(k2, (HD, 3 * HD), b),
                         bi=_uniform(k3, (3 * HD,), b),
                         bh=_uniform(k4, (3 * HD,), b))

    for name in ("gen", "cls"):
        key, fwd = gru_dir(key)
        key, bwd = gru_dir(key)
        p[name + "_gru"] = (fwd, bwd)
    p["ln_gamma"] = jnp.ones((H,), jnp.float32)
    p["ln_beta"] = jnp.zeros((H,), jnp.float32)
    b = float(H) ** -0.5
    key, k1, k2, k3, k4 = jax.random.split(key, 5)
    p["gen_fc_w"] = _uniform(k1, (H, Z_DIM), b)
    p["gen_fc_b"] = _uniform(k2, (Z_DIM,), b)
    p["cls_fc_w"] = _uniform(k3, (H, NUM_CLASS), b)
    p["cls_fc_b"] = _uniform(k4, (NUM_CLASS,), b)
    p["slab"] = pack_param_slab(p)
    return p


# ---------------- pure-JAX reference (for a correctness self-check) ----------------
def _gru_dir_ref(x, d, reverse):
    xs = x[::-1] if reverse else x

    def step(h, xt):
        gi = xt @ d["wi"] + d["bi"]
        gh = h @ d["wh"] + d["bh"]
        r = jax.nn.sigmoid(gi[:, :HD] + gh[:, :HD])
        z = jax.nn.sigmoid(gi[:, HD:2 * HD] + gh[:, HD:2 * HD])
        n = jnp.tanh(gi[:, 2 * HD:] + r * gh[:, 2 * HD:])
        h = (1.0 - z) * n + z * h
        return h, h

    _, hs = lax.scan(step, jnp.zeros((x.shape[1], HD), jnp.float32), xs)
    return hs[::-1] if reverse else hs


def _bigru_ref(x, params):
    fwd, bwd = params
    return jnp.concatenate([_gru_dir_ref(x, fwd, False),
                            _gru_dir_ref(x, bwd, True)], axis=-1)


def reference_forward(p, inputs, masks, gumbel_key):
    B, L = inputs.shape
    emb = jnp.take(p["embedding"], inputs, axis=0)
    x = masks[:, :, None] * emb
    x_t = jnp.transpose(x, (1, 0, 2))                      # (L, B, E)
    hseq = _bigru_ref(x_t, p["gen_gru"])                   # (L, B, H)
    mu = jnp.mean(hseq, -1, keepdims=True)
    var = jnp.mean((hseq - mu) ** 2, -1, keepdims=True)
    hn = (hseq - mu) / jnp.sqrt(var + LN_EPS) * p["ln_gamma"] + p["ln_beta"]
    logits = hn @ p["gen_fc_w"] + p["gen_fc_b"]
    g = jax.random.gumbel(gumbel_key, (L * B, Z_DIM), dtype=jnp.float32)
    y = logits + g.reshape(L, B, Z_DIM)
    ddiff = y[..., 1] - y[..., 0]
    z1 = (ddiff > 0.0).astype(jnp.float32)
    z = jnp.stack([1.0 - z1, z1], axis=-1)                 # (L, B, 2)
    hc = _bigru_ref(x_t * z1[..., None], p["cls_gru"])
    m_t = jnp.transpose(masks, (1, 0))[..., None]
    pooled = jnp.max(hc * m_t + (1.0 - m_t) * NEG_BIG, axis=0)
    cls = pooled @ p["cls_fc_w"] + p["cls_fc_b"]
    return jnp.transpose(z, (1, 0, 2)), cls, jnp.transpose(ddiff, (1, 0))


if __name__ == "__main__":
    root = jax.random.PRNGKey(0)
    kparams, kin, kgumbel = jax.random.split(root, 3)

    params = init_params(kparams)
    inputs = jax.random.randint(kin, (BATCH, SEQ_LEN), 0, VOCAB_SIZE, dtype=jnp.int32)
    lengths = jnp.array([SEQ_LEN, SEQ_LEN - 3], dtype=jnp.int32)
    masks = (jnp.arange(SEQ_LEN)[None, :] < lengths[:, None]).astype(jnp.float32)

    fwd = jax.jit(sp_norm_rnp_forward)
    z, cls_logits = fwd(params, inputs, masks, kgumbel)
    jax.block_until_ready((z, cls_logits))
    assert z.shape == (BATCH, SEQ_LEN, Z_DIM)
    assert cls_logits.shape == (BATCH, NUM_CLASS)
    assert np.all(np.isfinite(np.asarray(cls_logits)))

    # pure-JAX reference check (skip tokens whose Gumbel decision is a near-tie)
    z_r, cls_r, ddiff = jax.jit(reference_forward)(params, inputs, masks, kgumbel)
    safe = np.abs(np.asarray(ddiff)) > 1e-3
    assert np.all((np.asarray(z) == np.asarray(z_r)) | ~safe[..., None]), "z mismatch"
    if safe.all():
        assert np.allclose(np.asarray(cls_logits), np.asarray(cls_r),
                           atol=2e-3, rtol=2e-3), "cls logits mismatch"

    print("KERNEL_OK")
</pallas_src>

<mosaic_0001>
module attributes {stable_mosaic.version = 11 : i64} {
  func.func @fused_rnp_kernel(%arg0: i32, %arg1: memref<16x32xf32, #tpu.memory_space<vmem>>, %arg2: memref<16x2xf32, #tpu.memory_space<vmem>>, %arg3: memref<99x768xf32, #tpu.memory_space<vmem>>, %arg4: memref<18x128xf32, #tpu.memory_space<vmem>>) attributes {dimension_semantics = [#tpu.dimension_semantics<arbitrary>], iteration_bounds = array<i64: 1>, scalar_prefetch = 0 : i64, scratch_operands = 0 : i64, tpu.core_type = #tpu.core_type<tc>, window_params = [{pipeline_mode = #tpu.pipeline_mode<synchronous>, transform_indices = @transform_0, window_bounds = array<i64: 16, 32>}, {pipeline_mode = #tpu.pipeline_mode<synchronous>, transform_indices = @transform_1, window_bounds = array<i64: 16, 2>}, {pipeline_mode = #tpu.pipeline_mode<synchronous>, transform_indices = @transform_2, window_bounds = array<i64: 99, 768>}, {pipeline_mode = #tpu.pipeline_mode<synchronous>, transform_indices = @transform_3, window_bounds = array<i64: 18, 128>}]} {
    %c0 = arith.constant 0 : index
    %c0_0 = arith.constant 0 : index
    %0 = vector.load %arg1[%c0, %c0_0] : memref<16x32xf32, #tpu.memory_space<vmem>>, vector<16x32xf32>
    %c0_1 = arith.constant 0 : index
    %c0_2 = arith.constant 0 : index
    %1 = vector.load %arg2[%c0_1, %c0_2] : memref<16x2xf32, #tpu.memory_space<vmem>>, vector<16x2xf32>
    %2 = vector.extract_strided_slice %1 {offsets = [0, 0], sizes = [16, 1], strides = [1, 1]} : vector<16x2xf32> to vector<16x1xf32>
    %3 = vector.extract_strided_slice %1 {offsets = [0, 1], sizes = [16, 1], strides = [1, 1]} : vector<16x2xf32> to vector<16x1xf32>
    %4 = tpu.iota {dimensions = array<i32: 1>} : vector<2x128xi32>
    %5 = tpu.iota {dimensions = array<i32: 1>} : vector<16x128xi32>
    %6 = tpu.iota {dimensions = array<i32: 1>} : vector<2x384xi32>
    %c16_i32 = arith.constant 16 : i32
    %7 = vector.broadcast %c16_i32 : i32 to vector<2x128xi32>
    %8 = arith.cmpi slt, %4, %7 : vector<2x128xi32>
    %c16_i32_3 = arith.constant 16 : i32
    %9 = vector.broadcast %c16_i32_3 : i32 to vector<2x384xi32>
    %10 = arith.cmpi slt, %6, %9 : vector<2x384xi32>
    %c128_i32 = arith.constant 128 : i32
    %11 = vector.broadcast %c128_i32 : i32 to vector<2x384xi32>
    %12 = arith.cmpi sge, %6, %11 : vector<2x384xi32>
    %c144_i32 = arith.constant 144 : i32
    %13 = vector.broadcast %c144_i32 : i32 to vector<2x384xi32>
    %14 = arith.cmpi slt, %6, %13 : vector<2x384xi32>
    %15 = arith.andi %12, %14 : vector<2x384xi1>
    %16 = arith.ori %10, %15 : vector<2x384xi1>
    %c256_i32 = arith.constant 256 : i32
    %17 = vector.broadcast %c256_i32 : i32 to vector<2x384xi32>
    %18 = arith.cmpi sge, %6, %17 : vector<2x384xi32>
    %c272_i32 = arith.constant 272 : i32
    %19 = vector.broadcast %c272_i32 : i32 to vector<2x384xi32>
    %20 = arith.cmpi slt, %6, %19 : vector<2x384xi32>
    %21 = arith.andi %18, %20 : vector<2x384xi1>
    %22 = arith.ori %16, %21 : vector<2x384xi1>
    %c0_4 = arith.constant 0 : index
    %c0_5 = arith.constant 0 : index
    %23 = vector.load %arg3[%c0_4, %c0_5] : memref<99x768xf32, #tpu.memory_space<vmem>>, vector<32x768xf32>
    %cst = arith.constant dense<0.000000e+00> : vector<16x768xf32>
    %24 = tpu.matmul %0, %23, %cst {dimension_numbers = #tpu.dot_dimension_numbers<[1], [0], [0], [1], [0, 0, 1, 1], [], []>} : vector<16x32xf32>, vector<32x768xf32>, vector<16x768xf32> -> vector<16x768xf32>
    %25 = vector.extract_strided_slice %24 {offsets = [0, 0], sizes = [16, 384], strides = [1, 1]} : vector<16x768xf32> to vector<16x384xf32>
    %c96 = arith.constant 96 : index
    %c0_6 = arith.constant 0 : index
    %26 = vector.load %arg3[%c96, %c0_6] : memref<99x768xf32, #tpu.memory_space<vmem>>, vector<1x384xf32>
    %27 = vector.broadcast %26 : vector<1x384xf32> to vector<16x384xf32>
    %28 = arith.addf %25, %27 : vector<16x384xf32>
    %29 = vector.extract_strided_slice %24 {offsets = [0, 384], sizes = [16, 384], strides = [1, 1]} : vector<16x768xf32> to vector<16x384xf32>
    %c32 = arith.constant 32 : index
    %c0_7 = arith.constant 0 : index
    %30 = vector.load %arg3[%c32, %c0_7] : memref<99x768xf32, #tpu.memory_space<vmem>>, vector<32x384xf32>
    %c97 = arith.constant 97 : index
    %c0_8 = arith.constant 0 : index
    %31 = vector.load %arg3[%c97, %c0_8] : memref<99x768xf32, #tpu.memory_space<vmem>>, vector<1x128xf32>
    %32 = vector.shape_cast %31 : vector<1x128xf32> to vector<1x128xf32>
    %33 = vector.broadcast %32 : vector<1x128xf32> to vector<2x128xf32>
    %cst_9 = arith.constant 0.000000e+00 : f32
    %34 = vector.broadcast %cst_9 : f32 to vector<2x128xf32>
    %35 = vector.extract_strided_slice %28 {offsets = [0, 0], sizes = [2, 384], strides = [1, 1]} : vector<16x384xf32> to vector<2x384xf32>
    %36 = vector.extract_strided_slice %28 {offsets = [14, 0], sizes = [2, 384], strides = [1, 1]} : vector<16x384xf32> to vector<2x384xf32>
    %37 = arith.select %22, %35, %36 : vector<2x384xi1>, vector<2x384xf32>
    %38 = vector.extract_strided_slice %34 {offsets = [0, 0], sizes = [2, 32], strides = [1, 1]} : vector<2x128xf32> to vector<2x32xf32>
    %cst_10 = arith.constant dense<0.000000e+00> : vector<2x384xf32>
    %39 = tpu.matmul %38, %30, %cst_10 {dimension_numbers = #tpu.dot_dimension_numbers<[1], [0], [0], [1], [0, 0, 1, 1], [], []>} : vector<2x32xf32>, vector<32x384xf32>, vector<2x384xf32> -> vector<2x384xf32>
    %40 = vector.extract_strided_slice %37 {offsets = [0, 0], sizes = [2, 128], strides = [1, 1]} : vector<2x384xf32> to vector<2x128xf32>
    %41 = vector.extract_strided_slice %39 {offsets = [0, 0], sizes = [2, 128], strides = [1, 1]} : vector<2x384xf32> to vector<2x128xf32>
    %42 = arith.addf %40, %41 : vector<2x128xf32>
    %43 = arith.negf %42 : vector<2x128xf32>
    %44 = math.exp %43 : vector<2x128xf32>
    %cst_11 = arith.constant 1.000000e+00 : f32
    %45 = vector.broadcast %cst_11 : f32 to vector<2x128xf32>
    %46 = arith.addf %45, %44 : vector<2x128xf32>
    %47 = arith.divf %45, %46 : vector<2x128xf32>
    %48 = vector.extract_strided_slice %37 {offsets = [0, 128], sizes = [2, 128], strides = [1, 1]} : vector<2x384xf32> to vector<2x128xf32>
    %49 = vector.extract_strided_slice %39 {offsets = [0, 128], sizes = [2, 128], strides = [1, 1]} : vector<2x384xf32> to vector<2x128xf32>
    %50 = arith.addf %48, %49 : vector<2x128xf32>
    %51 = arith.negf %50 : vector<2x128xf32>
    %52 = math.exp %51 : vector<2x128xf32>
    %cst_12 = arith.constant 1.000000e+00 : f32
    %53 = vector.broadcast %cst_12 : f32 to vector<2x128xf32>
    %54 = arith.addf %53, %52 : vector<2x128xf32>
    %55 = arith.divf %53, %54 : vector<2x128xf32>
    %56 = vector.extract_strided_slice %37 {offsets = [0, 256], sizes = [2, 128], strides = [1, 1]} : vector<2x384xf32> to vector<2x128xf32>
    %57 = vector.extract_strided_slice %39 {offsets = [0, 256], sizes = [2, 128], strides = [1, 1]} : vector<2x384xf32> to vector<2x128xf32>
    %58 = arith.addf %57, %33 : vector<2x128xf32>
    %59 = arith.mulf %47, %58 : vector<2x128xf32>
    %60 = arith.addf %56, %59 : vector<2x128xf32>
    %61 = math.tanh %60 : vector<2x128xf32>
    %cst_13 = arith.constant 1.000000e+00 : f32
    %62 = vector.broadcast %cst_13 : f32 to vector<2x128xf32>
    %63 = arith.subf %62, %55 : vector<2x128xf32>
    %64 = arith.mulf %63, %61 : vector<2x128xf32>
    %65 = arith.mulf %55, %34 : vector<2x128xf32>
    %66 = arith.addf %64, %65 : vector<2x128xf32>
    %67 = vector.extract_strided_slice %28 {offsets = [2, 0], sizes = [2, 384], strides = [1, 1]} : vector<16x384xf32> to vector<2x384xf32>
    %68 = vector.extract_strided_slice %28 {offsets = [12, 0], sizes = [2, 384], strides = [1, 1]} : vector<16x384xf32> to vector<2x384xf32>
    %69 = arith.select %22, %67, %68 : vector<2x384xi1>, vector<2x384xf32>
    %70 = vector.extract_strided_slice %66 {offsets = [0, 0], sizes = [2, 32], strides = [1, 1]} : vector<2x128xf32> to vector<2x32xf32>
    %cst_14 = arith.constant dense<0.000000e+00> : vector<2x384xf32>
    %71 = tpu.matmul %70, %30, %cst_14 {dimension_numbers = #tpu.dot_dimension_numbers<[1], [0], [0], [1], [0, 0, 1, 1], [], []>} : vector<2x32xf32>, vector<32x384xf32>, vector<2x384xf32> -> vector<2x384xf32>
    %72 = vector.extract_strided_slice %69 {offsets = [0, 0], sizes = [2, 128], strides = [1, 1]} : vector<2x384xf32> to vector<2x128xf32>
    %73 = vector.extract_strided_slice %71 {offsets = [0, 0], sizes = [2, 128], strides = [1, 1]} : vector<2x384xf32> to vector<2x128xf32>
    %74 = arith.addf %72, %73 : vector<2x128xf32>
    %75 = arith.negf %74 : vector<2x128xf32>
    %76 = math.exp %75 : vector<2x128xf32>
    %cst_15 = arith.constant 1.000000e+00 : f32
    %77 = vector.broadcast %cst_15 : f32 to vector<2x128xf32>
    %78 = arith.addf %77, %76 : vector<2x128xf32>
    %79 = arith.divf %77, %78 : vector<2x128xf32>
    %80 = vector.extract_strided_slice %69 {offsets = [0, 128], sizes = [2, 128], strides = [1, 1]} : vector<2x384xf32> to vector<2x128xf32>
    %81 = vector.extract_strided_slice %71 {offsets = [0, 128], sizes = [2, 128], strides = [1, 1]} : vector<2x384xf32> to vector<2x128xf32>
    %82 = arith.addf %80, %81 : vector<2x128xf32>
    %83 = arith.negf %82 : vector<2x128xf32>
    %84 = math.exp %83 : vector<2x128xf32>
    %cst_16 = arith.constant 1.000000e+00 : f32
    %85 = vector.broadcast %cst_16 : f32 to vector<2x128xf32>
    %86 = arith.addf %85, %84 : vector<2x128xf32>
    %87 = arith.divf %85, %86 : vector<2x128xf32>
    %88 = vector.extract_strided_slice %69 {offsets = [0, 256], sizes = [2, 128], strides = [1, 1]} : vector<2x384xf32> to vector<2x128xf32>
    %89 = vector.extract_strided_slice %71 {offsets = [0, 256], sizes = [2, 128], strides = [1, 1]} : vector<2x384xf32> to vector<2x128xf32>
    %90 = arith.addf %89, %33 : vector<2x128xf32>
    %91 = arith.mulf %79, %90 : vector<2x128xf32>
    %92 = arith.addf %88, %91 : vector<2x128xf32>
    %93 = math.tanh %92 : vector<2x128xf32>
    %cst_17 = arith.constant 1.000000e+00 : f32
    %94 = vector.broadcast %cst_17 : f32 to vector<2x128xf32>
    %95 = arith.subf %94, %87 : vector<2x128xf32>
    %96 = arith.mulf %95, %93 : vector<2x128xf32>
    %97 = arith.mulf %87, %66 : vector<2x128xf32>
    %98 = arith.addf %96, %97 : vector<2x128xf32>
    %99 = vector.extract_strided_slice %28 {offsets = [4, 0], sizes = [2, 384], strides = [1, 1]} : vector<16x384xf32> to vector<2x384xf32>
    %100 = vector.extract_strided_slice %28 {offsets = [10, 0], sizes = [2, 384], strides = [1, 1]} : vector<16x384xf32> to vector<2x384xf32>
    %101 = arith.select %22, %99, %100 : vector<2x384xi1>, vector<2x384xf32>
    %102 = vector.extract_strided_slice %98 {offsets = [0, 0], sizes = [2, 32], strides = [1, 1]} : vector<2x128xf32> to vector<2x32xf32>
    %cst_18 = arith.constant dense<0.000000e+00> : vector<2x384xf32>
    %103 = tpu.matmul %102, %30, %cst_18 {dimension_numbers = #tpu.dot_dimension_numbers<[1], [0], [0], [1], [0, 0, 1, 1], [], []>} : vector<2x32xf32>, vector<32x384xf32>, vector<2x384xf32> -> vector<2x384xf32>
    %104 = vector.extract_strided_slice %101 {offsets = [0, 0], sizes = [2, 128], strides = [1, 1]} : vector<2x384xf32> to vector<2x128xf32>
    %105 = vector.extract_strided_slice %103 {offsets = [0, 0], sizes = [2, 128], strides = [1, 1]} : vector<2x384xf32> to vector<2x128xf32>
    %106 = arith.addf %104, %105 : vector<2x128xf32>
    %107 = arith.negf %106 : vector<2x128xf32>
    %108 = math.exp %107 : vector<2x128xf32>
    %cst_19 = arith.constant 1.000000e+00 : f32
    %109 = vector.broadcast %cst_19 : f32 to vector<2x128xf32>
    %110 = arith.addf %109, %108 : vector<2x128xf32>
    %111 = arith.divf %109, %110 : vector<2x128xf32>
    %112 = vector.extract_strided_slice %101 {offsets = [0, 128], sizes = [2, 128], strides = [1, 1]} : vector<2x384xf32> to vector<2x128xf32>
    %113 = vector.extract_strided_slice %103 {offsets = [0, 128], sizes = [2, 128], strides = [1, 1]} : vector<2x384xf32> to vector<2x128xf32>
    %114 = arith.addf %112, %113 : vector<2x128xf32>
    %115 = arith.negf %114 : vector<2x128xf32>
    %116 = math.exp %115 : vector<2x128xf32>
    %cst_20 = arith.constant 1.000000e+00 : f32
    %117 = vector.broadcast %cst_20 : f32 to vector<2x128xf32>
    %118 = arith.addf %117, %116 : vector<2x128xf32>
    %119 = arith.divf %117, %118 : vector<2x128xf32>
    %120 = vector.extract_strided_slice %101 {offsets = [0, 256], sizes = [2, 128], strides = [1, 1]} : vector<2x384xf32> to vector<2x128xf32>
    %121 = vector.extract_strided_slice %103 {offsets = [0, 256], sizes = [2, 128], strides = [1, 1]} : vector<2x384xf32> to vector<2x128xf32>
    %122 = arith.addf %121, %33 : vector<2x128xf32>
    %123 = arith.mulf %111, %122 : vector<2x128xf32>
    %124 = arith.addf %120, %123 : vector<2x128xf32>
    %125 = math.tanh %124 : vector<2x128xf32>
    %cst_21 = arith.constant 1.000000e+00 : f32
    %126 = vector.broadcast %cst_21 : f32 to vector<2x128xf32>
    %127 = arith.subf %126, %119 : vector<2x128xf32>
    %128 = arith.mulf %127, %125 : vector<2x128xf32>
    %129 = arith.mulf %119, %98 : vector<2x128xf32>
    %130 = arith.addf %128, %129 : vector<2x128xf32>
    %131 = vector.extract_strided_slice %28 {offsets = [6, 0], sizes = [2, 384], strides = [1, 1]} : vector<16x384xf32> to vector<2x384xf32>
    %132 = vector.extract_strided_slice %28 {offsets = [8, 0], sizes = [2, 384], strides = [1, 1]} : vector<16x384xf32> to vector<2x384xf32>
    %133 = arith.select %22, %131, %132 : vector<2x384xi1>, vector<2x384xf32>
    %134 = vector.extract_strided_slice %130 {offsets = [0, 0], sizes = [2, 32], strides = [1, 1]} : vector<2x128xf32> to vector<2x32xf32>
    %cst_22 = arith.constant dense<0.000000e+00> : vector<2x384xf32>
    %135 = tpu.matmul %134, %30, %cst_22 {dimension_numbers = #tpu.dot_dimension_numbers<[1], [0], [0], [1], [0, 0, 1, 1], [], []>} : vector<2x32xf32>, vector<32x384xf32>, vector<2x384xf32> -> vector<2x384xf32>
    %136 = vector.extract_strided_slice %133 {offsets = [0, 0], sizes = [2, 128], strides = [1, 1]} : vector<2x384xf32> to vector<2x128xf32>
    %137 = vector.extract_strided_slice %135 {offsets = [0, 0], sizes = [2, 128], strides = [1, 1]} : vector<2x384xf32> to vector<2x128xf32>
    %138 = arith.addf %136, %137 : vector<2x128xf32>
    %139 = arith.negf %138 : vector<2x128xf32>
    %140 = math.exp %139 : vector<2x128xf32>
    %cst_23 = arith.constant 1.000000e+00 : f32
    %141 = vector.broadcast %cst_23 : f32 to vector<2x128xf32>
    %142 = arith.addf %141, %140 : vector<2x128xf32>
    %143 = arith.divf %141, %142 : vector<2x128xf32>
    %144 = vector.extract_strided_slice %133 {offsets = [0, 128], sizes = [2, 128], strides = [1, 1]} : vector<2x384xf32> to vector<2x128xf32>
    %145 = vector.extract_strided_slice %135 {offsets = [0, 128], sizes = [2, 128], strides = [1, 1]} : vector<2x384xf32> to vector<2x128xf32>
    %146 = arith.addf %144, %145 : vector<2x128xf32>
    %147 = arith.negf %146 : vector<2x128xf32>
    %148 = math.exp %147 : vector<2x128xf32>
    %cst_24 = arith.constant 1.000000e+00 : f32
    %149 = vector.broadcast %cst_24 : f32 to vector<2x128xf32>
    %150 = arith.addf %149, %148 : vector<2x128xf32>
    %151 = arith.divf %149, %150 : vector<2x128xf32>
    %152 = vector.extract_strided_slice %133 {offsets = [0, 256], sizes = [2, 128], strides = [1, 1]} : vector<2x384xf32> to vector<2x128xf32>
    %153 = vector.extract_strided_slice %135 {offsets = [0, 256], sizes = [2, 128], strides = [1, 1]} : vector<2x384xf32> to vector<2x128xf32>
    %154 = arith.addf %153, %33 : vector<2x128xf32>
    %155 = arith.mulf %143, %154 : vector<2x128xf32>
    %156 = arith.addf %152, %155 : vector<2x128xf32>
    %157 = math.tanh %156 : vector<2x128xf32>
    %cst_25 = arith.constant 1.000000e+00 : f32
    %158 = vector.broadcast %cst_25 : f32 to vector<2x128xf32>
    %159 = arith.subf %158, %151 : vector<2x128xf32>
    %160 = arith.mulf %159, %157 : vector<2x128xf32>
    %161 = arith.mulf %151, %130 : vector<2x128xf32>
    %162 = arith.addf %160, %161 : vector<2x128xf32>
    %163 = vector.extract_strided_slice %28 {offsets = [8, 0], sizes = [2, 384], strides = [1, 1]} : vector<16x384xf32> to vector<2x384xf32>
    %164 = vector.extract_strided_slice %28 {offsets = [6, 0], sizes = [2, 384], strides = [1, 1]} : vector<16x384xf32> to vector<2x384xf32>
    %165 = arith.select %22, %163, %164 : vector<2x384xi1>, vector<2x384xf32>
    %166 = vector.extract_strided_slice %162 {offsets = [0, 0], sizes = [2, 32], strides = [1, 1]} : vector<2x128xf32> to vector<2x32xf32>
    %cst_26 = arith.constant dense<0.000000e+00> : vector<2x384xf32>
    %167 = tpu.matmul %166, %30, %cst_26 {dimension_numbers = #tpu.dot_dimension_numbers<[1], [0], [0], [1], [0, 0, 1, 1], [], []>} : vector<2x32xf32>, vector<32x384xf32>, vector<2x384xf32> -> vector<2x384xf32>
    %168 = vector.extract_strided_slice %165 {offsets = [0, 0], sizes = [2, 128], strides = [1, 1]} : vector<2x384xf32> to vector<2x128xf32>
    %169 = vector.extract_strided_slice %167 {offsets = [0, 0], sizes = [2, 128], strides = [1, 1]} : vector<2x384xf32> to vector<2x128xf32>
    %170 = arith.addf %168, %169 : vector<2x128xf32>
    %171 = arith.negf %170 : vector<2x128xf32>
    %172 = math.exp %171 : vector<2x128xf32>
    %cst_27 = arith.constant 1.000000e+00 : f32
    %173 = vector.broadcast %cst_27 : f32 to vector<2x128xf32>
    %174 = arith.addf %173, %172 : vector<2x128xf32>
    %175 = arith.divf %173, %174 : vector<2x128xf32>
    %176 = vector.extract_strided_slice %165 {offsets = [0, 128], sizes = [2, 128], strides = [1, 1]} : vector<2x384xf32> to vector<2x128xf32>
    %177 = vector.extract_strided_slice %167 {offsets = [0, 128], sizes = [2, 128], strides = [1, 1]} : vector<2x384xf32> to vector<2x128xf32>
    %178 = arith.addf %176, %177 : vector<2x128xf32>
    %179 = arith.negf %178 : vector<2x128xf32>
    %180 = math.exp %179 : vector<2x128xf32>
    %cst_28 = arith.constant 1.000000e+00 : f32
    %181 = vector.broadcast %cst_28 : f32 to vector<2x128xf32>
    %182 = arith.addf %181, %180 : vector<2x128xf32>
    %183 = arith.divf %181, %182 : vector<2x128xf32>
    %184 = vector.extract_strided_slice %165 {offsets = [0, 256], sizes = [2, 128], strides = [1, 1]} : vector<2x384xf32> to vector<2x128xf32>
    %185 = vector.extract_strided_slice %167 {offsets = [0, 256], sizes = [2, 128], strides = [1, 1]} : vector<2x384xf32> to vector<2x128xf32>
    %186 = arith.addf %185, %33 : vector<2x128xf32>
    %187 = arith.mulf %175, %186 : vector<2x128xf32>
    %188 = arith.addf %184, %187 : vector<2x128xf32>
    %189 = math.tanh %188 : vector<2x128xf32>
    %cst_29 = arith.constant 1.000000e+00 : f32
    %190 = vector.broadcast %cst_29 : f32 to vector<2x128xf32>
    %191 = arith.subf %190, %183 : vector<2x128xf32>
    %192 = arith.mulf %191, %189 : vector<2x128xf32>
    %193 = arith.mulf %183, %162 : vector<2x128xf32>
    %194 = arith.addf %192, %193 : vector<2x128xf32>
    %195 = vector.extract_strided_slice %28 {offsets = [10, 0], sizes = [2, 384], strides = [1, 1]} : vector<16x384xf32> to vector<2x384xf32>
    %196 = vector.extract_strided_slice %28 {offsets = [4, 0], sizes = [2, 384], strides = [1, 1]} : vector<16x384xf32> to vector<2x384xf32>
    %197 = arith.select %22, %195, %196 : vector<2x384xi1>, vector<2x384xf32>
    %198 = vector.extract_strided_slice %194 {offsets = [0, 0], sizes = [2, 32], strides = [1, 1]} : vector<2x128xf32> to vector<2x32xf32>
    %cst_30 = arith.constant dense<0.000000e+00> : vector<2x384xf32>
    %199 = tpu.matmul %198, %30, %cst_30 {dimension_numbers = #tpu.dot_dimension_numbers<[1], [0], [0], [1], [0, 0, 1, 1], [], []>} : vector<2x32xf32>, vector<32x384xf32>, vector<2x384xf32> -> vector<2x384xf32>
    %200 = vector.extract_strided_slice %197 {offsets = [0, 0], sizes = [2, 128], strides = [1, 1]} : vector<2x384xf32> to vector<2x128xf32>
    %201 = vector.extract_strided_slice %199 {offsets = [0, 0], sizes = [2, 128], strides = [1, 1]} : vector<2x384xf32> to vector<2x128xf32>
    %202 = arith.addf %200, %201 : vector<2x128xf32>
    %203 = arith.negf %202 : vector<2x128xf32>
    %204 = math.exp %203 : vector<2x128xf32>
    %cst_31 = arith.constant 1.000000e+00 : f32
    %205 = vector.broadcast %cst_31 : f32 to vector<2x128xf32>
    %206 = arith.addf %205, %204 : vector<2x128xf32>
    %207 = arith.divf %205, %206 : vector<2x128xf32>
    %208 = vector.extract_strided_slice %197 {offsets = [0, 128], sizes = [2, 128], strides = [1, 1]} : vector<2x384xf32> to vector<2x128xf32>
    %209 = vector.extract_strided_slice %199 {offsets = [0, 128], sizes = [2, 128], strides = [1, 1]} : vector<2x384xf32> to vector<2x128xf32>
    %210 = arith.addf %208, %209 : vector<2x128xf32>
    %211 = arith.negf %210 : vector<2x128xf32>
    %212 = math.exp %211 : vector<2x128xf32>
    %cst_32 = arith.constant 1.000000e+00 : f32
    %213 = vector.broadcast %cst_32 : f32 to vector<2x128xf32>
    %214 = arith.addf %213, %212 : vector<2x128xf32>
    %215 = arith.divf %213, %214 : vector<2x128xf32>
    %216 = vector.extract_strided_slice %197 {offsets = [0, 256], sizes = [2, 128], strides = [1, 1]} : vector<2x384xf32> to vector<2x128xf32>
    %217 = vector.extract_strided_slice %199 {offsets = [0, 256], sizes = [2, 128], strides = [1, 1]} : vector<2x384xf32> to vector<2x128xf32>
    %218 = arith.addf %217, %33 : vector<2x128xf32>
    %219 = arith.mulf %207, %218 : vector<2x128xf32>
    %220 = arith.addf %216, %219 : vector<2x128xf32>
    %221 = math.tanh %220 : vector<2x128xf32>
    %cst_33 = arith.constant 1.000000e+00 : f32
    %222 = vector.broadcast %cst_33 : f32 to vector<2x128xf32>
    %223 = arith.subf %222, %215 : vector<2x128xf32>
    %224 = arith.mulf %223, %221 : vector<2x128xf32>
    %225 = arith.mulf %215, %194 : vector<2x128xf32>
    %226 = arith.addf %224, %225 : vector<2x128xf32>
    %227 = vector.extract_strided_slice %28 {offsets = [12, 0], sizes = [2, 384], strides = [1, 1]} : vector<16x384xf32> to vector<2x384xf32>
    %228 = vector.extract_strided_slice %28 {offsets = [2, 0], sizes = [2, 384], strides = [1, 1]} : vector<16x384xf32> to vector<2x384xf32>
    %229 = arith.select %22, %227, %228 : vector<2x384xi1>, vector<2x384xf32>
    %230 = vector.extract_strided_slice %226 {offsets = [0, 0], sizes = [2, 32], strides = [1, 1]} : vector<2x128xf32> to vector<2x32xf32>
    %cst_34 = arith.constant dense<0.000000e+00> : vector<2x384xf32>
    %231 = tpu.matmul %230, %30, %cst_34 {dimension_numbers = #tpu.dot_dimension_numbers<[1], [0], [0], [1], [0, 0, 1, 1], [], []>} : vector<2x32xf32>, vector<32x384xf32>, vector<2x384xf32> -> vector<2x384xf32>
    %232 = vector.extract_strided_slice %229 {offsets = [0, 0], sizes = [2, 128], strides = [1, 1]} : vector<2x384xf32> to vector<2x128xf32>
    %233 = vector.extract_strided_slice %231 {offsets = [0, 0], sizes = [2, 128], strides = [1, 1]} : vector<2x384xf32> to vector<2x128xf32>
    %234 = arith.addf %232, %233 : vector<2x128xf32>
    %235 = arith.negf %234 : vector<2x128xf32>
    %236 = math.exp %235 : vector<2x128xf32>
    %cst_35 = arith.constant 1.000000e+00 : f32
    %237 = vector.broadcast %cst_35 : f32 to vector<2x128xf32>
    %238 = arith.addf %237, %236 : vector<2x128xf32>
    %239 = arith.divf %237, %238 : vector<2x128xf32>
    %240 = vector.extract_strided_slice %229 {offsets = [0, 128], sizes = [2, 128], strides = [1, 1]} : vector<2x384xf32> to vector<2x128xf32>
    %241 = vector.extract_strided_slice %231 {offsets = [0, 128], sizes = [2, 128], strides = [1, 1]} : vector<2x384xf32> to vector<2x128xf32>
    %242 = arith.addf %240, %241 : vector<2x128xf32>
    %243 = arith.negf %242 : vector<2x128xf32>
    %244 = math.exp %243 : vector<2x128xf32>
    %cst_36 = arith.constant 1.000000e+00 : f32
    %245 = vector.broadcast %cst_36 : f32 to vector<2x128xf32>
    %246 = arith.addf %245, %244 : vector<2x128xf32>
    %247 = arith.divf %245, %246 : vector<2x128xf32>
    %248 = vector.extract_strided_slice %229 {offsets = [0, 256], sizes = [2, 128], strides = [1, 1]} : vector<2x384xf32> to vector<2x128xf32>
    %249 = vector.extract_strided_slice %231 {offsets = [0, 256], sizes = [2, 128], strides = [1, 1]} : vector<2x384xf32> to vector<2x128xf32>
    %250 = arith.addf %249, %33 : vector<2x128xf32>
    %251 = arith.mulf %239, %250 : vector<2x128xf32>
    %252 = arith.addf %248, %251 : vector<2x128xf32>
    %253 = math.tanh %252 : vector<2x128xf32>
    %cst_37 = arith.constant 1.000000e+00 : f32
    %254 = vector.broadcast %cst_37 : f32 to vector<2x128xf32>
    %255 = arith.subf %254, %247 : vector<2x128xf32>
    %256 = arith.mulf %255, %253 : vector<2x128xf32>
    %257 = arith.mulf %247, %226 : vector<2x128xf32>
    %258 = arith.addf %256, %257 : vector<2x128xf32>
    %259 = vector.extract_strided_slice %28 {offsets = [14, 0], sizes = [2, 384], strides = [1, 1]} : vector<16x384xf32> to vector<2x384xf32>
    %260 = vector.extract_strided_slice %28 {offsets = [0, 0], sizes = [2, 384], strides = [1, 1]} : vector<16x384xf32> to vector<2x384xf32>
    %261 = arith.select %22, %259, %260 : vector<2x384xi1>, vector<2x384xf32>
    %262 = vector.extract_strided_slice %258 {offsets = [0, 0], sizes = [2, 32], strides = [1, 1]} : vector<2x128xf32> to vector<2x32xf32>
    %cst_38 = arith.constant dense<0.000000e+00> : vector<2x384xf32>
    %263 = tpu.matmul %262, %30, %cst_38 {dimension_numbers = #tpu.dot_dimension_numbers<[1], [0], [0], [1], [0, 0, 1, 1], [], []>} : vector<2x32xf32>, vector<32x384xf32>, vector<2x384xf32> -> vector<2x384xf32>
    %264 = vector.extract_strided_slice %261 {offsets = [0, 0], sizes = [2, 128], strides = [1, 1]} : vector<2x384xf32> to vector<2x128xf32>
    %265 = vector.extract_strided_slice %263 {offsets = [0, 0], sizes = [2, 128], strides = [1, 1]} : vector<2x384xf32> to vector<2x128xf32>
    %266 = arith.addf %264, %265 : vector<2x128xf32>
    %267 = arith.negf %266 : vector<2x128xf32>
    %268 = math.exp %267 : vector<2x128xf32>
    %cst_39 = arith.constant 1.000000e+00 : f32
    %269 = vector.broadcast %cst_39 : f32 to vector<2x128xf32>
    %270 = arith.addf %269, %268 : vector<2x128xf32>
    %271 = arith.divf %269, %270 : vector<2x128xf32>
    %272 = vector.extract_strided_slice %261 {offsets = [0, 128], sizes = [2, 128], strides = [1, 1]} : vector<2x384xf32> to vector<2x128xf32>
    %273 = vector.extract_strided_slice %263 {offsets = [0, 128], sizes = [2, 128], strides = [1, 1]} : vector<2x384xf32> to vector<2x128xf32>
    %274 = arith.addf %272, %273 : vector<2x128xf32>
    %275 = arith.negf %274 : vector<2x128xf32>
    %276 = math.exp %275 : vector<2x128xf32>
    %cst_40 = arith.constant 1.000000e+00 : f32
    %277 = vector.broadcast %cst_40 : f32 to vector<2x128xf32>
    %278 = arith.addf %277, %276 : vector<2x128xf32>
    %279 = arith.divf %277, %278 : vector<2x128xf32>
    %280 = vector.extract_strided_slice %261 {offsets = [0, 256], sizes = [2, 128], strides = [1, 1]} : vector<2x384xf32> to vector<2x128xf32>
    %281 = vector.extract_strided_slice %263 {offsets = [0, 256], sizes = [2, 128], strides = [1, 1]} : vector<2x384xf32> to vector<2x128xf32>
    %282 = arith.addf %281, %33 : vector<2x128xf32>
    %283 = arith.mulf %271, %282 : vector<2x128xf32>
    %284 = arith.addf %280, %283 : vector<2x128xf32>
    %285 = math.tanh %284 : vector<2x128xf32>
    %cst_41 = arith.constant 1.000000e+00 : f32
    %286 = vector.broadcast %cst_41 : f32 to vector<2x128xf32>
    %287 = arith.subf %286, %279 : vector<2x128xf32>
    %288 = arith.mulf %287, %285 : vector<2x128xf32>
    %289 = arith.mulf %279, %258 : vector<2x128xf32>
    %290 = arith.addf %288, %289 : vector<2x128xf32>
    %291 = tpu.concatenate %66, %98, %130, %162, %194, %226, %258, %290 in 0 : vector<2x128xf32>, vector<2x128xf32>, vector<2x128xf32>, vector<2x128xf32>, vector<2x128xf32>, vector<2x128xf32>, vector<2x128xf32>, vector<2x128xf32> -> vector<16x128xf32>
    %292 = tpu.concatenate %290, %258, %226, %194, %162, %130, %98, %66 in 0 : vector<2x128xf32>, vector<2x128xf32>, vector<2x128xf32>, vector<2x128xf32>, vector<2x128xf32>, vector<2x128xf32>, vector<2x128xf32>, vector<2x128xf32> -> vector<16x128xf32>
    %c16_i32_42 = arith.constant 16 : i32
    %293 = vector.broadcast %c16_i32_42 : i32 to vector<16x128xi32>
    %294 = arith.cmpi slt, %5, %293 : vector<16x128xi32>
    %295 = arith.select %294, %291, %292 : vector<16x128xi1>, vector<16x128xf32>
    %cst_43 = arith.constant dense<0.000000e+00> : vector<16xf32>
    %296 = vector.multi_reduction <add>, %295, %cst_43 [1] : vector<16x128xf32> to vector<16xf32>
    %297 = vector.shape_cast %296 : vector<16xf32> to vector<16x1xf32>
    %cst_44 = arith.constant 3.125000e-02 : f32
    %298 = vector.broadcast %cst_44 : f32 to vector<16x1xf32>
    %299 = arith.mulf %297, %298 : vector<16x1xf32>
    %300 = arith.mulf %295, %295 : vector<16x128xf32>
    %cst_45 = arith.constant dense<0.000000e+00> : vector<16xf32>
    %301 = vector.multi_reduction <add>, %300, %cst_45 [1] : vector<16x128xf32> to vector<16xf32>
    %302 = vector.shape_cast %301 : vector<16xf32> to vector<16x1xf32>
    %cst_46 = arith.constant 3.125000e-02 : f32
    %303 = vector.broadcast %cst_46 : f32 to vector<16x1xf32>
    %304 = arith.mulf %302, %303 : vector<16x1xf32>
    %305 = arith.mulf %299, %299 : vector<16x1xf32>
    %306 = arith.subf %304, %305 : vector<16x1xf32>
    %307 = vector.broadcast %299 : vector<16x1xf32> to vector<16x128xf32>
    %308 = arith.subf %295, %307 : vector<16x128xf32>
    %cst_47 = arith.constant 9.99999974E-6 : f32
    %309 = vector.broadcast %cst_47 : f32 to vector<16x1xf32>
    %310 = arith.addf %306, %309 : vector<16x1xf32>
    %311 = math.rsqrt %310 : vector<16x1xf32>
    %312 = vector.broadcast %311 : vector<16x1xf32> to vector<16x128xf32>
    %313 = arith.mulf %308, %312 : vector<16x128xf32>
    %c97_48 = arith.constant 97 : index
    %c256 = arith.constant 256 : index
    %314 = vector.load %arg3[%c97_48, %c256] : memref<99x768xf32, #tpu.memory_space<vmem>>, vector<1x128xf32>
    %315 = vector.broadcast %314 : vector<1x128xf32> to vector<16x128xf32>
    %316 = arith.mulf %313, %315 : vector<16x128xf32>
    %c97_49 = arith.constant 97 : index
    %c384 = arith.constant 384 : index
    %317 = vector.load %arg3[%c97_49, %c384] : memref<99x768xf32, #tpu.memory_space<vmem>>, vector<1x128xf32>
    %318 = vector.broadcast %317 : vector<1x128xf32> to vector<16x128xf32>
    %319 = arith.addf %316, %318 : vector<16x128xf32>
    %320 = vector.extract_strided_slice %319 {offsets = [0, 0], sizes = [16, 32], strides = [1, 1]} : vector<16x128xf32> to vector<16x32xf32>
    %c64 = arith.constant 64 : index
    %c0_50 = arith.constant 0 : index
    %321 = vector.load %arg3[%c64, %c0_50] : memref<99x768xf32, #tpu.memory_space<vmem>>, vector<32x384xf32>
    %cst_51 = arith.constant dense<0.000000e+00> : vector<16x384xf32>
    %322 = tpu.matmul %320, %321, %cst_51 {dimension_numbers = #tpu.dot_dimension_numbers<[1], [0], [0], [1], [0, 0, 1, 1], [], []>} : vector<16x32xf32>, vector<32x384xf32>, vector<16x384xf32> -> vector<16x384xf32>
    %c98 = arith.constant 98 : index
    %c0_52 = arith.constant 0 : index
    %323 = vector.load %arg3[%c98, %c0_52] : memref<99x768xf32, #tpu.memory_space<vmem>>, vector<1x384xf32>
    %324 = vector.broadcast %323 : vector<1x384xf32> to vector<16x384xf32>
    %325 = arith.addf %322, %324 : vector<16x384xf32>
    %326 = vector.broadcast %3 : vector<16x1xf32> to vector<16x384xf32>
    %327 = arith.addf %325, %326 : vector<16x384xf32>
    %cst_53 = arith.constant 0.000000e+00 : f32
    %328 = vector.broadcast %cst_53 : f32 to vector<16x384xf32>
    %329 = arith.cmpf ogt, %327, %328 : vector<16x384xf32>
    %330 = arith.extui %329 : vector<16x384xi1> to vector<16x384xi32>
    %331 = arith.sitofp %330 : vector<16x384xi32> to vector<16x384xf32>
    %332 = vector.extract_strided_slice %331 {offsets = [0, 0], sizes = [16, 128], strides = [1, 1]} : vector<16x384xf32> to vector<16x128xf32>
    %c0_i32 = arith.constant 0 : i32
    %333 = vector.broadcast %c0_i32 : i32 to vector<16x128xi32>
    %334 = arith.cmpi eq, %5, %333 : vector<16x128xi32>
    %cst_54 = arith.constant 1.000000e+00 : f32
    %335 = vector.broadcast %cst_54 : f32 to vector<16x128xf32>
    %336 = arith.subf %335, %332 : vector<16x128xf32>
    %c1_i32 = arith.constant 1 : i32
    %337 = vector.broadcast %c1_i32 : i32 to vector<16x128xi32>
    %338 = arith.cmpi eq, %5, %337 : vector<16x128xi32>
    %cst_55 = arith.constant 0.000000e+00 : f32
    %339 = vector.broadcast %cst_55 : f32 to vector<16x128xf32>
    %340 = arith.select %338, %332, %339 : vector<16x128xi1>, vector<16x128xf32>
    %341 = arith.select %334, %336, %340 : vector<16x128xi1>, vector<16x128xf32>
    %c0_56 = arith.constant 0 : index
    %c0_57 = arith.constant 0 : index
    %342 = vector.load %arg4[%c0_56, %c0_57] : memref<18x128xf32, #tpu.memory_space<vmem>>, vector<16x128xf32>
    tpu.vector_store %arg4[%c0_56, %c0_57], %341 {strides = array<i32>} : memref<18x128xf32, #tpu.memory_space<vmem>>, vector<16x128xf32>,
    %343 = arith.mulf %29, %331 : vector<16x384xf32>
    %c96_58 = arith.constant 96 : index
    %c384_59 = arith.constant 384 : index
    %344 = vector.load %arg3[%c96_58, %c384_59] : memref<99x768xf32, #tpu.memory_space<vmem>>, vector<1x384xf32>
    %345 = vector.broadcast %344 : vector<1x384xf32> to vector<16x384xf32>
    %346 = arith.addf %343, %345 : vector<16x384xf32>
    %c32_60 = arith.constant 32 : index
    %c384_61 = arith.constant 384 : index
    %347 = vector.load %arg3[%c32_60, %c384_61] : memref<99x768xf32, #tpu.memory_space<vmem>>, vector<32x384xf32>
    %c97_62 = arith.constant 97 : index
    %c128 = arith.constant 128 : index
    %348 = vector.load %arg3[%c97_62, %c128] : memref<99x768xf32, #tpu.memory_space<vmem>>, vector<1x128xf32>
    %349 = vector.shape_cast %348 : vector<1x128xf32> to vector<1x128xf32>
    %350 = vector.broadcast %349 : vector<1x128xf32> to vector<2x128xf32>
    %cst_63 = arith.constant 0.000000e+00 : f32
    %351 = vector.broadcast %cst_63 : f32 to vector<2x128xf32>
    %cst_64 = arith.constant -1.000000e+06 : f32
    %352 = vector.broadcast %cst_64 : f32 to vector<2x128xf32>
    %353 = vector.extract_strided_slice %346 {offsets = [0, 0], sizes = [2, 384], strides = [1, 1]} : vector<16x384xf32> to vector<2x384xf32>
    %354 = vector.extract_strided_slice %346 {offsets = [14, 0], sizes = [2, 384], strides = [1, 1]} : vector<16x384xf32> to vector<2x384xf32>
    %355 = arith.select %22, %353, %354 : vector<2x384xi1>, vector<2x384xf32>
    %356 = vector.extract_strided_slice %351 {offsets = [0, 0], sizes = [2, 32], strides = [1, 1]} : vector<2x128xf32> to vector<2x32xf32>
    %cst_65 = arith.constant dense<0.000000e+00> : vector<2x384xf32>
    %357 = tpu.matmul %356, %347, %cst_65 {dimension_numbers = #tpu.dot_dimension_numbers<[1], [0], [0], [1], [0, 0, 1, 1], [], []>} : vector<2x32xf32>, vector<32x384xf32>, vector<2x384xf32> -> vector<2x384xf32>
    %358 = vector.extract_strided_slice %355 {offsets = [0, 0], sizes = [2, 128], strides = [1, 1]} : vector<2x384xf32> to vector<2x128xf32>
    %359 = vector.extract_strided_slice %357 {offsets = [0, 0], sizes = [2, 128], strides = [1, 1]} : vector<2x384xf32> to vector<2x128xf32>
    %360 = arith.addf %358, %359 : vector<2x128xf32>
    %361 = arith.negf %360 : vector<2x128xf32>
    %362 = math.exp %361 : vector<2x128xf32>
    %cst_66 = arith.constant 1.000000e+00 : f32
    %363 = vector.broadcast %cst_66 : f32 to vector<2x128xf32>
    %364 = arith.addf %363, %362 : vector<2x128xf32>
    %365 = arith.divf %363, %364 : vector<2x128xf32>
    %366 = vector.extract_strided_slice %355 {offsets = [0, 128], sizes = [2, 128], strides = [1, 1]} : vector<2x384xf32> to vector<2x128xf32>
    %367 = vector.extract_strided_slice %357 {offsets = [0, 128], sizes = [2, 128], strides = [1, 1]} : vector<2x384xf32> to vector<2x128xf32>
    %368 = arith.addf %366, %367 : vector<2x128xf32>
    %369 = arith.negf %368 : vector<2x128xf32>
    %370 = math.exp %369 : vector<2x128xf32>
    %cst_67 = arith.constant 1.000000e+00 : f32
    %371 = vector.broadcast %cst_67 : f32 to vector<2x128xf32>
    %372 = arith.addf %371, %370 : vector<2x128xf32>
    %373 = arith.divf %371, %372 : vector<2x128xf32>
    %374 = vector.extract_strided_slice %355 {offsets = [0, 256], sizes = [2, 128], strides = [1, 1]} : vector<2x384xf32> to vector<2x128xf32>
    %375 = vector.extract_strided_slice %357 {offsets = [0, 256], sizes = [2, 128], strides = [1, 1]} : vector<2x384xf32> to vector<2x128xf32>
    %376 = arith.addf %375, %350 : vector<2x128xf32>
    %377 = arith.mulf %365, %376 : vector<2x128xf32>
    %378 = arith.addf %374, %377 : vector<2x128xf32>
    %379 = math.tanh %378 : vector<2x128xf32>
    %cst_68 = arith.constant 1.000000e+00 : f32
    %380 = vector.broadcast %cst_68 : f32 to vector<2x128xf32>
    %381 = arith.subf %380, %373 : vector<2x128xf32>
    %382 = arith.mulf %381, %379 : vector<2x128xf32>
    %383 = arith.mulf %373, %351 : vector<2x128xf32>
    %384 = arith.addf %382, %383 : vector<2x128xf32>
    %385 = vector.extract_strided_slice %2 {offsets = [0, 0], sizes = [2, 1], strides = [1, 1]} : vector<16x1xf32> to vector<2x1xf32>
    %386 = vector.extract_strided_slice %2 {offsets = [14, 0], sizes = [2, 1], strides = [1, 1]} : vector<16x1xf32> to vector<2x1xf32>
    %387 = vector.shape_cast %385 : vector<2x1xf32> to vector<2x1xf32>
    %388 = vector.broadcast %387 : vector<2x1xf32> to vector<2x128xf32>
    %389 = vector.shape_cast %386 : vector<2x1xf32> to vector<2x1xf32>
    %390 = vector.broadcast %389 : vector<2x1xf32> to vector<2x128xf32>
    %391 = arith.select %8, %388, %390 : vector<2x128xi1>, vector<2x128xf32>
    %392 = arith.mulf %384, %391 : vector<2x128xf32>
    %cst_69 = arith.constant 1.000000e+00 : f32
    %393 = vector.broadcast %cst_69 : f32 to vector<2x128xf32>
    %394 = arith.subf %393, %391 : vector<2x128xf32>
    %cst_70 = arith.constant -1.000000e+06 : f32
    %395 = vector.broadcast %cst_70 : f32 to vector<2x128xf32>
    %396 = arith.mulf %394, %395 : vector<2x128xf32>
    %397 = arith.addf %392, %396 : vector<2x128xf32>
    %398 = arith.maximumf %352, %397 : vector<2x128xf32>
    %399 = vector.extract_strided_slice %346 {offsets = [2, 0], sizes = [2, 384], strides = [1, 1]} : vector<16x384xf32> to vector<2x384xf32>
    %400 = vector.extract_strided_slice %346 {offsets = [12, 0], sizes = [2, 384], strides = [1, 1]} : vector<16x384xf32> to vector<2x384xf32>
    %401 = arith.select %22, %399, %400 : vector<2x384xi1>, vector<2x384xf32>
    %402 = vector.extract_strided_slice %384 {offsets = [0, 0], sizes = [2, 32], strides = [1, 1]} : vector<2x128xf32> to vector<2x32xf32>
    %cst_71 = arith.constant dense<0.000000e+00> : vector<2x384xf32>
    %403 = tpu.matmul %402, %347, %cst_71 {dimension_numbers = #tpu.dot_dimension_numbers<[1], [0], [0], [1], [0, 0, 1, 1], [], []>} : vector<2x32xf32>, vector<32x384xf32>, vector<2x384xf32> -> vector<2x384xf32>
    %404 = vector.extract_strided_slice %401 {offsets = [0, 0], sizes = [2, 128], strides = [1, 1]} : vector<2x384xf32> to vector<2x128xf32>
    %405 = vector.extract_strided_slice %403 {offsets = [0, 0], sizes = [2, 128], strides = [1, 1]} : vector<2x384xf32> to vector<2x128xf32>
    %406 = arith.addf %404, %405 : vector<2x128xf32>
    %407 = arith.negf %406 : vector<2x128xf32>
    %408 = math.exp %407 : vector<2x128xf32>
    %cst_72 = arith.constant 1.000000e+00 : f32
    %409 = vector.broadcast %cst_72 : f32 to vector<2x128xf32>
    %410 = arith.addf %409, %408 : vector<2x128xf32>
    %411 = arith.divf %409, %410 : vector<2x128xf32>
    %412 = vector.extract_strided_slice %401 {offsets = [0, 128], sizes = [2, 128], strides = [1, 1]} : vector<2x384xf32> to vector<2x128xf32>
    %413 = vector.extract_strided_slice %403 {offsets = [0, 128], sizes = [2, 128], strides = [1, 1]} : vector<2x384xf32> to vector<2x128xf32>
    %414 = arith.addf %412, %413 : vector<2x128xf32>
    %415 = arith.negf %414 : vector<2x128xf32>
    %416 = math.exp %415 : vector<2x128xf32>
    %cst_73 = arith.constant 1.000000e+00 : f32
    %417 = vector.broadcast %cst_73 : f32 to vector<2x128xf32>
    %418 = arith.addf %417, %416 : vector<2x128xf32>
    %419 = arith.divf %417, %418 : vector<2x128xf32>
    %420 = vector.extract_strided_slice %401 {offsets = [0, 256], sizes = [2, 128], strides = [1, 1]} : vector<2x384xf32> to vector<2x128xf32>
    %421 = vector.extract_strided_slice %403 {offsets = [0, 256], sizes = [2, 128], strides = [1, 1]} : vector<2x384xf32> to vector<2x128xf32>
    %422 = arith.addf %421, %350 : vector<2x128xf32>
    %423 = arith.mulf %411, %422 : vector<2x128xf32>
    %424 = arith.addf %420, %423 : vector<2x128xf32>
    %425 = math.tanh %424 : vector<2x128xf32>
    %cst_74 = arith.constant 1.000000e+00 : f32
    %426 = vector.broadcast %cst_74 : f32 to vector<2x128xf32>
    %427 = arith.subf %426, %419 : vector<2x128xf32>
    %428 = arith.mulf %427, %425 : vector<2x128xf32>
    %429 = arith.mulf %419, %384 : vector<2x128xf32>
    %430 = arith.addf %428, %429 : vector<2x128xf32>
    %431 = vector.extract_strided_slice %2 {offsets = [2, 0], sizes = [2, 1], strides = [1, 1]} : vector<16x1xf32> to vector<2x1xf32>
    %432 = vector.extract_strided_slice %2 {offsets = [12, 0], sizes = [2, 1], strides = [1, 1]} : vector<16x1xf32> to vector<2x1xf32>
    %433 = vector.shape_cast %431 : vector<2x1xf32> to vector<2x1xf32>
    %434 = vector.broadcast %433 : vector<2x1xf32> to vector<2x128xf32>
    %435 = vector.shape_cast %432 : vector<2x1xf32> to vector<2x1xf32>
    %436 = vector.broadcast %435 : vector<2x1xf32> to vector<2x128xf32>
    %437 = arith.select %8, %434, %436 : vector<2x128xi1>, vector<2x128xf32>
    %438 = arith.mulf %430, %437 : vector<2x128xf32>
    %cst_75 = arith.constant 1.000000e+00 : f32
    %439 = vector.broadcast %cst_75 : f32 to vector<2x128xf32>
    %440 = arith.subf %439, %437 : vector<2x128xf32>
    %cst_76 = arith.constant -1.000000e+06 : f32
    %441 = vector.broadcast %cst_76 : f32 to vector<2x128xf32>
    %442 = arith.mulf %440, %441 : vector<2x128xf32>
    %443 = arith.addf %438, %442 : vector<2x128xf32>
    %444 = arith.maximumf %398, %443 : vector<2x128xf32>
    %445 = vector.extract_strided_slice %346 {offsets = [4, 0], sizes = [2, 384], strides = [1, 1]} : vector<16x384xf32> to vector<2x384xf32>
    %446 = vector.extract_strided_slice %346 {offsets = [10, 0], sizes = [2, 384], strides = [1, 1]} : vector<16x384xf32> to vector<2x384xf32>
    %447 = arith.select %22, %445, %446 : vector<2x384xi1>, vector<2x384xf32>
    %448 = vector.extract_strided_slice %430 {offsets = [0, 0], sizes = [2, 32], strides = [1, 1]} : vector<2x128xf32> to vector<2x32xf32>
    %cst_77 = arith.constant dense<0.000000e+00> : vector<2x384xf32>
    %449 = tpu.matmul %448, %347, %cst_77 {dimension_numbers = #tpu.dot_dimension_numbers<[1], [0], [0], [1], [0, 0, 1, 1], [], []>} : vector<2x32xf32>, vector<32x384xf32>, vector<2x384xf32> -> vector<2x384xf32>
    %450 = vector.extract_strided_slice %447 {offsets = [0, 0], sizes = [2, 128], strides = [1, 1]} : vector<2x384xf32> to vector<2x128xf32>
    %451 = vector.extract_strided_slice %449 {offsets = [0, 0], sizes = [2, 128], strides = [1, 1]} : vector<2x384xf32> to vector<2x128xf32>
    %452 = arith.addf %450, %451 : vector<2x128xf32>
    %453 = arith.negf %452 : vector<2x128xf32>
    %454 = math.exp %453 : vector<2x128xf32>
    %cst_78 = arith.constant 1.000000e+00 : f32
    %455 = vector.broadcast %cst_78 : f32 to vector<2x128xf32>
    %456 = arith.addf %455, %454 : vector<2x128xf32>
    %457 = arith.divf %455, %456 : vector<2x128xf32>
    %458 = vector.extract_strided_slice %447 {offsets = [0, 128], sizes = [2, 128], strides = [1, 1]} : vector<2x384xf32> to vector<2x128xf32>
    %459 = vector.extract_strided_slice %449 {offsets = [0, 128], sizes = [2, 128], strides = [1, 1]} : vector<2x384xf32> to vector<2x128xf32>
    %460 = arith.addf %458, %459 : vector<2x128xf32>
    %461 = arith.negf %460 : vector<2x128xf32>
    %462 = math.exp %461 : vector<2x128xf32>
    %cst_79 = arith.constant 1.000000e+00 : f32
    %463 = vector.broadcast %cst_79 : f32 to vector<2x128xf32>
    %464 = arith.addf %463, %462 : vector<2x128xf32>
    %465 = arith.divf %463, %464 : vector<2x128xf32>
    %466 = vector.extract_strided_slice %447 {offsets = [0, 256], sizes = [2, 128], strides = [1, 1]} : vector<2x384xf32> to vector<2x128xf32>
    %467 = vector.extract_strided_slice %449 {offsets = [0, 256], sizes = [2, 128], strides = [1, 1]} : vector<2x384xf32> to vector<2x128xf32>
    %468 = arith.addf %467, %350 : vector<2x128xf32>
    %469 = arith.mulf %457, %468 : vector<2x128xf32>
    %470 = arith.addf %466, %469 : vector<2x128xf32>
    %471 = math.tanh %470 : vector<2x128xf32>
    %cst_80 = arith.constant 1.000000e+00 : f32
    %472 = vector.broadcast %cst_80 : f32 to vector<2x128xf32>
    %473 = arith.subf %472, %465 : vector<2x128xf32>
    %474 = arith.mulf %473, %471 : vector<2x128xf32>
    %475 = arith.mulf %465, %430 : vector<2x128xf32>
    %476 = arith.addf %474, %475 : vector<2x128xf32>
    %477 = vector.extract_strided_slice %2 {offsets = [4, 0], sizes = [2, 1], strides = [1, 1]} : vector<16x1xf32> to vector<2x1xf32>
    %478 = vector.extract_strided_slice %2 {offsets = [10, 0], sizes = [2, 1], strides = [1, 1]} : vector<16x1xf32> to vector<2x1xf32>
    %479 = vector.shape_cast %477 : vector<2x1xf32> to vector<2x1xf32>
    %480 = vector.broadcast %479 : vector<2x1xf32> to vector<2x128xf32>
    %481 = vector.shape_cast %478 : vector<2x1xf32> to vector<2x1xf32>
    %482 = vector.broadcast %481 : vector<2x1xf32> to vector<2x128xf32>
    %483 = arith.select %8, %480, %482 : vector<2x128xi1>, vector<2x128xf32>
    %484 = arith.mulf %476, %483 : vector<2x128xf32>
    %cst_81 = arith.constant 1.000000e+00 : f32
    %485 = vector.broadcast %cst_81 : f32 to vector<2x128xf32>
    %486 = arith.subf %485, %483 : vector<2x128xf32>
    %cst_82 = arith.constant -1.000000e+06 : f32
    %487 = vector.broadcast %cst_82 : f32 to vector<2x128xf32>
    %488 = arith.mulf %486, %487 : vector<2x128xf32>
    %489 = arith.addf %484, %488 : vector<2x128xf32>
    %490 = arith.maximumf %444, %489 : vector<2x128xf32>
    %491 = vector.extract_strided_slice %346 {offsets = [6, 0], sizes = [2, 384], strides = [1, 1]} : vector<16x384xf32> to vector<2x384xf32>
    %492 = vector.extract_strided_slice %346 {offsets = [8, 0], sizes = [2, 384], strides = [1, 1]} : vector<16x384xf32> to vector<2x384xf32>
    %493 = arith.select %22, %491, %492 : vector<2x384xi1>, vector<2x384xf32>
    %494 = vector.extract_strided_slice %476 {offsets = [0, 0], sizes = [2, 32], strides = [1, 1]} : vector<2x128xf32> to vector<2x32xf32>
    %cst_83 = arith.constant dense<0.000000e+00> : vector<2x384xf32>
    %495 = tpu.matmul %494, %347, %cst_83 {dimension_numbers = #tpu.dot_dimension_numbers<[1], [0], [0], [1], [0, 0, 1, 1], [], []>} : vector<2x32xf32>, vector<32x384xf32>, vector<2x384xf32> -> vector<2x384xf32>
    %496 = vector.extract_strided_slice %493 {offsets = [0, 0], sizes = [2, 128], strides = [1, 1]} : vector<2x384xf32> to vector<2x128xf32>
    %497 = vector.extract_strided_slice %495 {offsets = [0, 0], sizes = [2, 128], strides = [1, 1]} : vector<2x384xf32> to vector<2x128xf32>
    %498 = arith.addf %496, %497 : vector<2x128xf32>
    %499 = arith.negf %498 : vector<2x128xf32>
    %500 = math.exp %499 : vector<2x128xf32>
    %cst_84 = arith.constant 1.000000e+00 : f32
    %501 = vector.broadcast %cst_84 : f32 to vector<2x128xf32>
    %502 = arith.addf %501, %500 : vector<2x128xf32>
    %503 = arith.divf %501, %502 : vector<2x128xf32>
    %504 = vector.extract_strided_slice %493 {offsets = [0, 128], sizes = [2, 128], strides = [1, 1]} : vector<2x384xf32> to vector<2x128xf32>
    %505 = vector.extract_strided_slice %495 {offsets = [0, 128], sizes = [2, 128], strides = [1, 1]} : vector<2x384xf32> to vector<2x128xf32>
    %506 = arith.addf %504, %505 : vector<2x128xf32>
    %507 = arith.negf %506 : vector<2x128xf32>
    %508 = math.exp %507 : vector<2x128xf32>
    %cst_85 = arith.constant 1.000000e+00 : f32
    %509 = vector.broadcast %cst_85 : f32 to vector<2x128xf32>
    %510 = arith.addf %509, %508 : vector<2x128xf32>
    %511 = arith.divf %509, %510 : vector<2x128xf32>
    %512 = vector.extract_strided_slice %493 {offsets = [0, 256], sizes = [2, 128], strides = [1, 1]} : vector<2x384xf32> to vector<2x128xf32>
    %513 = vector.extract_strided_slice %495 {offsets = [0, 256], sizes = [2, 128], strides = [1, 1]} : vector<2x384xf32> to vector<2x128xf32>
    %514 = arith.addf %513, %350 : vector<2x128xf32>
    %515 = arith.mulf %503, %514 : vector<2x128xf32>
    %516 = arith.addf %512, %515 : vector<2x128xf32>
    %517 = math.tanh %516 : vector<2x128xf32>
    %cst_86 = arith.constant 1.000000e+00 : f32
    %518 = vector.broadcast %cst_86 : f32 to vector<2x128xf32>
    %519 = arith.subf %518, %511 : vector<2x128xf32>
    %520 = arith.mulf %519, %517 : vector<2x128xf32>
    %521 = arith.mulf %511, %476 : vector<2x128xf32>
    %522 = arith.addf %520, %521 : vector<2x128xf32>
    %523 = vector.extract_strided_slice %2 {offsets = [6, 0], sizes = [2, 1], strides = [1, 1]} : vector<16x1xf32> to vector<2x1xf32>
    %524 = vector.extract_strided_slice %2 {offsets = [8, 0], sizes = [2, 1], strides = [1, 1]} : vector<16x1xf32> to vector<2x1xf32>
    %525 = vector.shape_cast %523 : vector<2x1xf32> to vector<2x1xf32>
    %526 = vector.broadcast %525 : vector<2x1xf32> to vector<2x128xf32>
    %527 = vector.shape_cast %524 : vector<2x1xf32> to vector<2x1xf32>
    %528 = vector.broadcast %527 : vector<2x1xf32> to vector<2x128xf32>
    %529 = arith.select %8, %526, %528 : vector<2x128xi1>, vector<2x128xf32>
    %530 = arith.mulf %522, %529 : vector<2x128xf32>
    %cst_87 = arith.constant 1.000000e+00 : f32
    %531 = vector.broadcast %cst_87 : f32 to vector<2x128xf32>
    %532 = arith.subf %531, %529 : vector<2x128xf32>
    %cst_88 = arith.constant -1.000000e+06 : f32
    %533 = vector.broadcast %cst_88 : f32 to vector<2x128xf32>
    %534 = arith.mulf %532, %533 : vector<2x128xf32>
    %535 = arith.addf %530, %534 : vector<2x128xf32>
    %536 = arith.maximumf %490, %535 : vector<2x128xf32>
    %537 = vector.extract_strided_slice %346 {offsets = [8, 0], sizes = [2, 384], strides = [1, 1]} : vector<16x384xf32> to vector<2x384xf32>
    %538 = vector.extract_strided_slice %346 {offsets = [6, 0], sizes = [2, 384], strides = [1, 1]} : vector<16x384xf32> to vector<2x384xf32>
    %539 = arith.select %22, %537, %538 : vector<2x384xi1>, vector<2x384xf32>
    %540 = vector.extract_strided_slice %522 {offsets = [0, 0], sizes = [2, 32], strides = [1, 1]} : vector<2x128xf32> to vector<2x32xf32>
    %cst_89 = arith.constant dense<0.000000e+00> : vector<2x384xf32>
    %541 = tpu.matmul %540, %347, %cst_89 {dimension_numbers = #tpu.dot_dimension_numbers<[1], [0], [0], [1], [0, 0, 1, 1], [], []>} : vector<2x32xf32>, vector<32x384xf32>, vector<2x384xf32> -> vector<2x384xf32>
    %542 = vector.extract_strided_slice %539 {offsets = [0, 0], sizes = [2, 128], strides = [1, 1]} : vector<2x384xf32> to vector<2x128xf32>
    %543 = vector.extract_strided_slice %541 {offsets = [0, 0], sizes = [2, 128], strides = [1, 1]} : vector<2x384xf32> to vector<2x128xf32>
    %544 = arith.addf %542, %543 : vector<2x128xf32>
    %545 = arith.negf %544 : vector<2x128xf32>
    %546 = math.exp %545 : vector<2x128xf32>
    %cst_90 = arith.constant 1.000000e+00 : f32
    %547 = vector.broadcast %cst_90 : f32 to vector<2x128xf32>
    %548 = arith.addf %547, %546 : vector<2x128xf32>
    %549 = arith.divf %547, %548 : vector<2x128xf32>
    %550 = vector.extract_strided_slice %539 {offsets = [0, 128], sizes = [2, 128], strides = [1, 1]} : vector<2x384xf32> to vector<2x128xf32>
    %551 = vector.extract_strided_slice %541 {offsets = [0, 128], sizes = [2, 128], strides = [1, 1]} : vector<2x384xf32> to vector<2x128xf32>
    %552 = arith.addf %550, %551 : vector<2x128xf32>
    %553 = arith.negf %552 : vector<2x128xf32>
    %554 = math.exp %553 : vector<2x128xf32>
    %cst_91 = arith.constant 1.000000e+00 : f32
    %555 = vector.broadcast %cst_91 : f32 to vector<2x128xf32>
    %556 = arith.addf %555, %554 : vector<2x128xf32>
    %557 = arith.divf %555, %556 : vector<2x128xf32>
    %558 = vector.extract_strided_slice %539 {offsets = [0, 256], sizes = [2, 128], strides = [1, 1]} : vector<2x384xf32> to vector<2x128xf32>
    %559 = vector.extract_strided_slice %541 {offsets = [0, 256], sizes = [2, 128], strides = [1, 1]} : vector<2x384xf32> to vector<2x128xf32>
    %560 = arith.addf %559, %350 : vector<2x128xf32>
    %561 = arith.mulf %549, %560 : vector<2x128xf32>
    %562 = arith.addf %558, %561 : vector<2x128xf32>
    %563 = math.tanh %562 : vector<2x128xf32>
    %cst_92 = arith.constant 1.000000e+00 : f32
    %564 = vector.broadcast %cst_92 : f32 to vector<2x128xf32>
    %565 = arith.subf %564, %557 : vector<2x128xf32>
    %566 = arith.mulf %565, %563 : vector<2x128xf32>
    %567 = arith.mulf %557, %522 : vector<2x128xf32>
    %568 = arith.addf %566, %567 : vector<2x128xf32>
    %569 = vector.extract_strided_slice %2 {offsets = [8, 0], sizes = [2, 1], strides = [1, 1]} : vector<16x1xf32> to vector<2x1xf32>
    %570 = vector.extract_strided_slice %2 {offsets = [6, 0], sizes = [2, 1], strides = [1, 1]} : vector<16x1xf32> to vector<2x1xf32>
    %571 = vector.shape_cast %569 : vector<2x1xf32> to vector<2x1xf32>
    %572 = vector.broadcast %571 : vector<2x1xf32> to vector<2x128xf32>
    %573 = vector.shape_cast %570 : vector<2x1xf32> to vector<2x1xf32>
    %574 = vector.broadcast %573 : vector<2x1xf32> to vector<2x128xf32>
    %575 = arith.select %8, %572, %574 : vector<2x128xi1>, vector<2x128xf32>
    %576 = arith.mulf %568, %575 : vector<2x128xf32>
    %cst_93 = arith.constant 1.000000e+00 : f32
    %577 = vector.broadcast %cst_93 : f32 to vector<2x128xf32>
    %578 = arith.subf %577, %575 : vector<2x128xf32>
    %cst_94 = arith.constant -1.000000e+06 : f32
    %579 = vector.broadcast %cst_94 : f32 to vector<2x128xf32>
    %580 = arith.mulf %578, %579 : vector<2x128xf32>
    %581 = arith.addf %576, %580 : vector<2x128xf32>
    %582 = arith.maximumf %536, %581 : vector<2x128xf32>
    %583 = vector.extract_strided_slice %346 {offsets = [10, 0], sizes = [2, 384], strides = [1, 1]} : vector<16x384xf32> to vector<2x384xf32>
    %584 = vector.extract_strided_slice %346 {offsets = [4, 0], sizes = [2, 384], strides = [1, 1]} : vector<16x384xf32> to vector<2x384xf32>
    %585 = arith.select %22, %583, %584 : vector<2x384xi1>, vector<2x384xf32>
    %586 = vector.extract_strided_slice %568 {offsets = [0, 0], sizes = [2, 32], strides = [1, 1]} : vector<2x128xf32> to vector<2x32xf32>
    %cst_95 = arith.constant dense<0.000000e+00> : vector<2x384xf32>
    %587 = tpu.matmul %586, %347, %cst_95 {dimension_numbers = #tpu.dot_dimension_numbers<[1], [0], [0], [1], [0, 0, 1, 1], [], []>} : vector<2x32xf32>, vector<32x384xf32>, vector<2x384xf32> -> vector<2x384xf32>
    %588 = vector.extract_strided_slice %585 {offsets = [0, 0], sizes = [2, 128], strides = [1, 1]} : vector<2x384xf32> to vector<2x128xf32>
    %589 = vector.extract_strided_slice %587 {offsets = [0, 0], sizes = [2, 128], strides = [1, 1]} : vector<2x384xf32> to vector<2x128xf32>
    %590 = arith.addf %588, %589 : vector<2x128xf32>
    %591 = arith.negf %590 : vector<2x128xf32>
    %592 = math.exp %591 : vector<2x128xf32>
    %cst_96 = arith.constant 1.000000e+00 : f32
    %593 = vector.broadcast %cst_96 : f32 to vector<2x128xf32>
    %594 = arith.addf %593, %592 : vector<2x128xf32>
    %595 = arith.divf %593, %594 : vector<2x128xf32>
    %596 = vector.extract_strided_slice %585 {offsets = [0, 128], sizes = [2, 128], strides = [1, 1]} : vector<2x384xf32> to vector<2x128xf32>
    %597 = vector.extract_strided_slice %587 {offsets = [0, 128], sizes = [2, 128], strides = [1, 1]} : vector<2x384xf32> to vector<2x128xf32>
    %598 = arith.addf %596, %597 : vector<2x128xf32>
    %599 = arith.negf %598 : vector<2x128xf32>
    %600 = math.exp %599 : vector<2x128xf32>
    %cst_97 = arith.constant 1.000000e+00 : f32
    %601 = vector.broadcast %cst_97 : f32 to vector<2x128xf32>
    %602 = arith.addf %601, %600 : vector<2x128xf32>
    %603 = arith.divf %601, %602 : vector<2x128xf32>
    %604 = vector.extract_strided_slice %585 {offsets = [0, 256], sizes = [2, 128], strides = [1, 1]} : vector<2x384xf32> to vector<2x128xf32>
    %605 = vector.extract_strided_slice %587 {offsets = [0, 256], sizes = [2, 128], strides = [1, 1]} : vector<2x384xf32> to vector<2x128xf32>
    %606 = arith.addf %605, %350 : vector<2x128xf32>
    %607 = arith.mulf %595, %606 : vector<2x128xf32>
    %608 = arith.addf %604, %607 : vector<2x128xf32>
    %609 = math.tanh %608 : vector<2x128xf32>
    %cst_98 = arith.constant 1.000000e+00 : f32
    %610 = vector.broadcast %cst_98 : f32 to vector<2x128xf32>
    %611 = arith.subf %610, %603 : vector<2x128xf32>
    %612 = arith.mulf %611, %609 : vector<2x128xf32>
    %613 = arith.mulf %603, %568 : vector<2x128xf32>
    %614 = arith.addf %612, %613 : vector<2x128xf32>
    %615 = vector.extract_strided_slice %2 {offsets = [10, 0], sizes = [2, 1], strides = [1, 1]} : vector<16x1xf32> to vector<2x1xf32>
    %616 = vector.extract_strided_slice %2 {offsets = [4, 0], sizes = [2, 1], strides = [1, 1]} : vector<16x1xf32> to vector<2x1xf32>
    %617 = vector.shape_cast %615 : vector<2x1xf32> to vector<2x1xf32>
    %618 = vector.broadcast %617 : vector<2x1xf32> to vector<2x128xf32>
    %619 = vector.shape_cast %616 : vector<2x1xf32> to vector<2x1xf32>
    %620 = vector.broadcast %619 : vector<2x1xf32> to vector<2x128xf32>
    %621 = arith.select %8, %618, %620 : vector<2x128xi1>, vector<2x128xf32>
    %622 = arith.mulf %614, %621 : vector<2x128xf32>
    %cst_99 = arith.constant 1.000000e+00 : f32
    %623 = vector.broadcast %cst_99 : f32 to vector<2x128xf32>
    %624 = arith.subf %623, %621 : vector<2x128xf32>
    %cst_100 = arith.constant -1.000000e+06 : f32
    %625 = vector.broadcast %cst_100 : f32 to vector<2x128xf32>
    %626 = arith.mulf %624, %625 : vector<2x128xf32>
    %627 = arith.addf %622, %626 : vector<2x128xf32>
    %628 = arith.maximumf %582, %627 : vector<2x128xf32>
    %629 = vector.extract_strided_slice %346 {offsets = [12, 0], sizes = [2, 384], strides = [1, 1]} : vector<16x384xf32> to vector<2x384xf32>
    %630 = vector.extract_strided_slice %346 {offsets = [2, 0], sizes = [2, 384], strides = [1, 1]} : vector<16x384xf32> to vector<2x384xf32>
    %631 = arith.select %22, %629, %630 : vector<2x384xi1>, vector<2x384xf32>
    %632 = vector.extract_strided_slice %614 {offsets = [0, 0], sizes = [2, 32], strides = [1, 1]} : vector<2x128xf32> to vector<2x32xf32>
    %cst_101 = arith.constant dense<0.000000e+00> : vector<2x384xf32>
    %633 = tpu.matmul %632, %347, %cst_101 {dimension_numbers = #tpu.dot_dimension_numbers<[1], [0], [0], [1], [0, 0, 1, 1], [], []>} : vector<2x32xf32>, vector<32x384xf32>, vector<2x384xf32> -> vector<2x384xf32>
    %634 = vector.extract_strided_slice %631 {offsets = [0, 0], sizes = [2, 128], strides = [1, 1]} : vector<2x384xf32> to vector<2x128xf32>
    %635 = vector.extract_strided_slice %633 {offsets = [0, 0], sizes = [2, 128], strides = [1, 1]} : vector<2x384xf32> to vector<2x128xf32>
    %636 = arith.addf %634, %635 : vector<2x128xf32>
    %637 = arith.negf %636 : vector<2x128xf32>
    %638 = math.exp %637 : vector<2x128xf32>
    %cst_102 = arith.constant 1.000000e+00 : f32
    %639 = vector.broadcast %cst_102 : f32 to vector<2x128xf32>
    %640 = arith.addf %639, %638 : vector<2x128xf32>
    %641 = arith.divf %639, %640 : vector<2x128xf32>
    %642 = vector.extract_strided_slice %631 {offsets = [0, 128], sizes = [2, 128], strides = [1, 1]} : vector<2x384xf32> to vector<2x128xf32>
    %643 = vector.extract_strided_slice %633 {offsets = [0, 128], sizes = [2, 128], strides = [1, 1]} : vector<2x384xf32> to vector<2x128xf32>
    %644 = arith.addf %642, %643 : vector<2x128xf32>
    %645 = arith.negf %644 : vector<2x128xf32>
    %646 = math.exp %645 : vector<2x128xf32>
    %cst_103 = arith.constant 1.000000e+00 : f32
    %647 = vector.broadcast %cst_103 : f32 to vector<2x128xf32>
    %648 = arith.addf %647, %646 : vector<2x128xf32>
    %649 = arith.divf %647, %648 : vector<2x128xf32>
    %650 = vector.extract_strided_slice %631 {offsets = [0, 256], sizes = [2, 128], strides = [1, 1]} : vector<2x384xf32> to vector<2x128xf32>
    %651 = vector.extract_strided_slice %633 {offsets = [0, 256], sizes = [2, 128], strides = [1, 1]} : vector<2x384xf32> to vector<2x128xf32>
    %652 = arith.addf %651, %350 : vector<2x128xf32>
    %653 = arith.mulf %641, %652 : vector<2x128xf32>
    %654 = arith.addf %650, %653 : vector<2x128xf32>
    %655 = math.tanh %654 : vector<2x128xf32>
    %cst_104 = arith.constant 1.000000e+00 : f32
    %656 = vector.broadcast %cst_104 : f32 to vector<2x128xf32>
    %657 = arith.subf %656, %649 : vector<2x128xf32>
    %658 = arith.mulf %657, %655 : vector<2x128xf32>
    %659 = arith.mulf %649, %614 : vector<2x128xf32>
    %660 = arith.addf %658, %659 : vector<2x128xf32>
    %661 = vector.extract_strided_slice %2 {offsets = [12, 0], sizes = [2, 1], strides = [1, 1]} : vector<16x1xf32> to vector<2x1xf32>
    %662 = vector.extract_strided_slice %2 {offsets = [2, 0], sizes = [2, 1], strides = [1, 1]} : vector<16x1xf32> to vector<2x1xf32>
    %663 = vector.shape_cast %661 : vector<2x1xf32> to vector<2x1xf32>
    %664 = vector.broadcast %663 : vector<2x1xf32> to vector<2x128xf32>
    %665 = vector.shape_cast %662 : vector<2x1xf32> to vector<2x1xf32>
    %666 = vector.broadcast %665 : vector<2x1xf32> to vector<2x128xf32>
    %667 = arith.select %8, %664, %666 : vector<2x128xi1>, vector<2x128xf32>
    %668 = arith.mulf %660, %667 : vector<2x128xf32>
    %cst_105 = arith.constant 1.000000e+00 : f32
    %669 = vector.broadcast %cst_105 : f32 to vector<2x128xf32>
    %670 = arith.subf %669, %667 : vector<2x128xf32>
    %cst_106 = arith.constant -1.000000e+06 : f32
    %671 = vector.broadcast %cst_106 : f32 to vector<2x128xf32>
    %672 = arith.mulf %670, %671 : vector<2x128xf32>
    %673 = arith.addf %668, %672 : vector<2x128xf32>
    %674 = arith.maximumf %628, %673 : vector<2x128xf32>
    %675 = vector.extract_strided_slice %346 {offsets = [14, 0], sizes = [2, 384], strides = [1, 1]} : vector<16x384xf32> to vector<2x384xf32>
    %676 = vector.extract_strided_slice %346 {offsets = [0, 0], sizes = [2, 384], strides = [1, 1]} : vector<16x384xf32> to vector<2x384xf32>
    %677 = arith.select %22, %675, %676 : vector<2x384xi1>, vector<2x384xf32>
    %678 = vector.extract_strided_slice %660 {offsets = [0, 0], sizes = [2, 32], strides = [1, 1]} : vector<2x128xf32> to vector<2x32xf32>
    %cst_107 = arith.constant dense<0.000000e+00> : vector<2x384xf32>
    %679 = tpu.matmul %678, %347, %cst_107 {dimension_numbers = #tpu.dot_dimension_numbers<[1], [0], [0], [1], [0, 0, 1, 1], [], []>} : vector<2x32xf32>, vector<32x384xf32>, vector<2x384xf32> -> vector<2x384xf32>
    %680 = vector.extract_strided_slice %677 {offsets = [0, 0], sizes = [2, 128], strides = [1, 1]} : vector<2x384xf32> to vector<2x128xf32>
    %681 = vector.extract_strided_slice %679 {offsets = [0, 0], sizes = [2, 128], strides = [1, 1]} : vector<2x384xf32> to vector<2x128xf32>
    %682 = arith.addf %680, %681 : vector<2x128xf32>
    %683 = arith.negf %682 : vector<2x128xf32>
    %684 = math.exp %683 : vector<2x128xf32>
    %cst_108 = arith.constant 1.000000e+00 : f32
    %685 = vector.broadcast %cst_108 : f32 to vector<2x128xf32>
    %686 = arith.addf %685, %684 : vector<2x128xf32>
    %687 = arith.divf %685, %686 : vector<2x128xf32>
    %688 = vector.extract_strided_slice %677 {offsets = [0, 128], sizes = [2, 128], strides = [1, 1]} : vector<2x384xf32> to vector<2x128xf32>
    %689 = vector.extract_strided_slice %679 {offsets = [0, 128], sizes = [2, 128], strides = [1, 1]} : vector<2x384xf32> to vector<2x128xf32>
    %690 = arith.addf %688, %689 : vector<2x128xf32>
    %691 = arith.negf %690 : vector<2x128xf32>
    %692 = math.exp %691 : vector<2x128xf32>
    %cst_109 = arith.constant 1.000000e+00 : f32
    %693 = vector.broadcast %cst_109 : f32 to vector<2x128xf32>
    %694 = arith.addf %693, %692 : vector<2x128xf32>
    %695 = arith.divf %693, %694 : vector<2x128xf32>
    %696 = vector.extract_strided_slice %677 {offsets = [0, 256], sizes = [2, 128], strides = [1, 1]} : vector<2x384xf32> to vector<2x128xf32>
    %697 = vector.extract_strided_slice %679 {offsets = [0, 256], sizes = [2, 128], strides = [1, 1]} : vector<2x384xf32> to vector<2x128xf32>
    %698 = arith.addf %697, %350 : vector<2x128xf32>
    %699 = arith.mulf %687, %698 : vector<2x128xf32>
    %700 = arith.addf %696, %699 : vector<2x128xf32>
    %701 = math.tanh %700 : vector<2x128xf32>
    %cst_110 = arith.constant 1.000000e+00 : f32
    %702 = vector.broadcast %cst_110 : f32 to vector<2x128xf32>
    %703 = arith.subf %702, %695 : vector<2x128xf32>
    %704 = arith.mulf %703, %701 : vector<2x128xf32>
    %705 = arith.mulf %695, %660 : vector<2x128xf32>
    %706 = arith.addf %704, %705 : vector<2x128xf32>
    %707 = vector.extract_strided_slice %2 {offsets = [14, 0], sizes = [2, 1], strides = [1, 1]} : vector<16x1xf32> to vector<2x1xf32>
    %708 = vector.extract_strided_slice %2 {offsets = [0, 0], sizes = [2, 1], strides = [1, 1]} : vector<16x1xf32> to vector<2x1xf32>
    %709 = vector.shape_cast %707 : vector<2x1xf32> to vector<2x1xf32>
    %710 = vector.broadcast %709 : vector<2x1xf32> to vector<2x128xf32>
    %711 = vector.shape_cast %708 : vector<2x1xf32> to vector<2x1xf32>
    %712 = vector.broadcast %711 : vector<2x1xf32> to vector<2x128xf32>
    %713 = arith.select %8, %710, %712 : vector<2x128xi1>, vector<2x128xf32>
    %714 = arith.mulf %706, %713 : vector<2x128xf32>
    %cst_111 = arith.constant 1.000000e+00 : f32
    %715 = vector.broadcast %cst_111 : f32 to vector<2x128xf32>
    %716 = arith.subf %715, %713 : vector<2x128xf32>
    %cst_112 = arith.constant -1.000000e+06 : f32
    %717 = vector.broadcast %cst_112 : f32 to vector<2x128xf32>
    %718 = arith.mulf %716, %717 : vector<2x128xf32>
    %719 = arith.addf %714, %718 : vector<2x128xf32>
    %720 = arith.maximumf %674, %719 : vector<2x128xf32>
    %721 = vector.extract_strided_slice %720 {offsets = [0, 0], sizes = [2, 32], strides = [1, 1]} : vector<2x128xf32> to vector<2x32xf32>
    %c64_113 = arith.constant 64 : index
    %c384_114 = arith.constant 384 : index
    %722 = vector.load %arg3[%c64_113, %c384_114] : memref<99x768xf32, #tpu.memory_space<vmem>>, vector<32x128xf32>
    %cst_115 = arith.constant dense<0.000000e+00> : vector<2x128xf32>
    %723 = tpu.matmul %721, %722, %cst_115 {dimension_numbers = #tpu.dot_dimension_numbers<[1], [0], [0], [1], [0, 0, 1, 1], [], []>} : vector<2x32xf32>, vector<32x128xf32>, vector<2x128xf32> -> vector<2x128xf32>
    %c97_116 = arith.constant 97 : index
    %c512 = arith.constant 512 : index
    %724 = vector.load %arg3[%c97_116, %c512] : memref<99x768xf32, #tpu.memory_space<vmem>>, vector<1x128xf32>
    %725 = vector.broadcast %724 : vector<1x128xf32> to vector<2x128xf32>
    %726 = arith.addf %723, %725 : vector<2x128xf32>
    %c16 = arith.constant 16 : index
    %c0_117 = arith.constant 0 : index
    %727 = vector.load %arg4[%c16, %c0_117] : memref<18x128xf32, #tpu.memory_space<vmem>>, vector<2x128xf32>
    tpu.vector_store %arg4[%c16, %c0_117], %726 {strides = array<i32>} : memref<18x128xf32, #tpu.memory_space<vmem>>, vector<2x128xf32>,
    return
  }
  func.func @transform_0(%arg0: i32) -> (i32, i32) {
    %c0_i32 = arith.constant 0 : i32
    %c0_i32_0 = arith.constant 0 : i32
    %c0_i32_1 = arith.constant 0 : i32
    return %c0_i32, %c0_i32_0 : i32, i32
  }
  func.func @transform_1(%arg0: i32) -> (i32, i32) {
    %c0_i32 = arith.constant 0 : i32
    %c0_i32_0 = arith.constant 0 : i32
    %c0_i32_1 = arith.constant 0 : i32
    return %c0_i32, %c0_i32_0 : i32, i32
  }
  func.func @transform_2(%arg0: i32) -> (i32, i32) {
    %c0_i32 = arith.constant 0 : i32
    %c0_i32_0 = arith.constant 0 : i32
    %c0_i32_1 = arith.constant 0 : i32
    return %c0_i32, %c0_i32_0 : i32, i32
  }
  func.func @transform_3(%arg0: i32) -> (i32, i32) {
    %c0_i32 = arith.constant 0 : i32
    %c0_i32_0 = arith.constant 0 : i32
    %c0_i32_1 = arith.constant 0 : i32
    return %c0_i32, %c0_i32_0 : i32, i32
  }
}

</mosaic_0001>

<bundles_post_ra>
// kernel: sp_norm_rnp_forward.1
= control target key start
LH: loop header
LB: loop body
LE: loop exit
PB: predicated region body
PF: predicated region fallthrough
CT: control target
= control target key end

     0   :  { %8 = vsyncpa [#allocation3], 0  ;;  %s2922_s15 = smov [#allocation2]   ;;  %s2923_s17 = smov 768   ;;  %s3744_s0 = inlined_call_operand.vmem [shape: f32[16,32], index: 0, kind: input, shape index: {}]   ;;  %s3745_s1 = inlined_call_operand.vmem [shape: f32[16,2], index: 1, kind: input, shape index: {}]   ;;  %s3746_s2 = inlined_call_operand.hbm [shape: f32[99,768], index: 2, kind: input, shape index: {}]   ;;  %s3747_s3 = inlined_call_operand.vmem [shape: f32[18,128], index: 3, kind: output, shape index: {}]  }
   0x1   :  { %s17_s14 = sshll.u32 %s3746_s2, 4  ;;  %s19_s16 = sshll.u32 %s2922_s15, 4  ;;  %s18_s14 = int_to_ptr.hbm [resolvable:$true] %s17_s14  ;;  %s20_s16 = int_to_ptr.vmem [resolvable:$true] %s19_s16 }
   0x2   :  { %s2924_s18 = smov 48  }
   0x3   :  { %25 = dma.hbm_to_vmem [thread:$0]  %s18_s14, 9984, %s20_s16, [#allocation3], %s2923_s17, %s2923_s17, %s2924_s18  }
   0x4   :  { %2920 = dma.done.wait [#allocation3], 9984  }
   0x5   :  { %2921 = vsyncadd [#allocation3], 4294957312  ;;  %v83_v0 = vld [vmem:[#allocation2 + $0x90] sm:$0xff]  ;;  %v85_v1 = vld [vmem:[#allocation2 + $0xa0] sm:$0xff]  ;;  %vm89_vm0 = vcmask 261120   ;;  %v2925_v30 = vmov 0.0   ;;  %v34_v34 = vlaneseq }
   0x6   :  { %v86_v2 = vld [vmem:[#allocation2 + $0xa8] sm:$0xff]  ;;  %108 = vmatpush.msra.mxu0 %v83_v0  ;;  %154 = vmatpush.msra.mxu2 %v85_v1  ;;  %v77_v3 = vld [vmem:[#allocation2 + $0x60] sm:$0xff]  ;;  %v79_v4 = vld [vmem:[#allocation2 + $0x70] sm:$0xff] }
   0x7   :  { %v80_v5 = vld [vmem:[#allocation2 + $0x78] sm:$0xff]  ;;  %177 = vmatpush.msra.mxu3 %v86_v2  ;;  %v71_v6 = vld [vmem:[#allocation2 + $0x30] sm:$0xff]  ;;  %v73_v7 = vld [vmem:[#allocation2 + $0x40] sm:$0xff]  ;;  %v3032_v36 = vand.u32 127, %v34_v34 }
   0x8   :  { %109 = vmatpush.msra.mxu0 %v77_v3  ;;  %155 = vmatpush.msra.mxu2 %v79_v4  ;;  %v74_v8 = vld [vmem:[#allocation2 + $0x48] sm:$0xff]  ;;  %v65_v9 = vld [vmem:[#allocation2] sm:$0xff]  ;;  %v67_v10 = vld [vmem:[#allocation2 + $0x10] sm:$0xff] }
   0x9   :  { %178 = vmatpush.msra.mxu3 %v80_v5  ;;  %v84_v11 = vld [vmem:[#allocation2 + $0x98] sm:$0xff]  ;;  %v2954_v13 = vld [vmem:[%s3744_s0] sm:$0xff]  ;;  %v2956_v14 = vld [vmem:[#allocation2 + $0x150] sm:$0xff]  ;;  %vm38_vm1 = vcmp.lt.s32.totalorder %v3032_v36, 16  ;;  %v3038_v47 = vadd.s32 256, %v3032_v36  ;;  %v3051_v52 = vadd.s32 128, %v3032_v36 }
   0xa   :  { %110 = vmatpush.msra.mxu0 %v71_v6  ;;  %156 = vmatpush.msra.mxu2 %v73_v7  ;;  %v68_v12 = vld [vmem:[#allocation2 + $0x18] sm:$0xff]  ;;  %v78_v15 = vld [vmem:[#allocation2 + $0x68] sm:$0xff]  ;;  %v2966_v17 = vld [vmem:[#allocation2 + $0x120] sm:$0xff] }
   0xb   :  { %179 = vmatpush.msra.mxu3 %v74_v8  ;;  %131 = vmatpush.msra.mxu1 %v84_v11  ;;  %v2960_v16 = vld [vmem:[#allocation2 + $0x158] sm:$0xff]  ;;  %v2969_v19 = vld [vmem:[#allocation2 + $0x128] sm:$0xff]  ;;  %v2971_v21 = vld [vmem:[#allocation2 + $0xf0] sm:$0xff]  ;;  %vm58_vm2 = vcmp.lt.s32.totalorder %v3038_v47, 272  ;;  %vm45_vm3 = vcmp.lt.s32.totalorder %v3051_v52, 144 }
   0xc   :  { %111 = vmatpush.msra.mxu0 %v65_v9  ;;  %157 = vmatpush.msra.mxu2 %v67_v10  ;;  %v72_v18 = vld [vmem:[#allocation2 + $0x38] sm:$0xff]  ;;  %v66_v20 = vld [vmem:[#allocation2 + $0x8] sm:$0xff]  ;;  %v2983_v24 = vld [vmem:[#allocation2 + $0xc0] sm:$0xff] }
   0xd   :  { %180 = vmatpush.msra.mxu3 %v68_v12  ;;  %2619 = vmatmul.msk.f32.vlgmr.msra.gmra.mxu0 %vm89_vm0, %v2954_v13  ;;  %v2975_v22 = vld [vmem:[#allocation2 + $0xf8] sm:$0xff]  ;;  %v2980_v23 = vld [vmem:[%s3744_s0 + $0x8] sm:$0xff]  ;;  %v2991_v26 = vld [vmem:[#allocation2 + $0x160] sm:$0xff] }
   0xe   :  { %2623 = vmatmul.msk.f32.vlgmr.msra.gmra.mxu2 %vm89_vm0, %v2954_v13  ;;  %2625 = vmatmul.msk.f32.vlgmr.msra.gmra.mxu3 %vm89_vm0, %v2954_v13  ;;  %v2989_v25 = vld [vmem:[#allocation2 + $0xc8] sm:$0xff]  ;;  %v3000_v27 = vld [vmem:[#allocation2 + $0x130] sm:$0xff]  ;;  %v3004_v28 = vld [vmem:[#allocation2 + $0x100] sm:$0xff] }
   0xf   :  { %289 = vmatpush.msrb.mxu2 %v2956_v14  ;;  %132 = vmatpush.msra.mxu1 %v78_v15  ;;  %v3008_v29 = vld [vmem:[#allocation2 + $0xd0] sm:$0xff]  ;;  %v88_v55 = vld [vmem:[#allocation2 + $0xb8] sm:$0xff]  ;;  %v81_v0 = vld [vmem:[#allocation2 + $0x80] sm:$0xff] }
  0x10   :  { %309 = vmatpush.msrb.mxu3 %v2960_v16  ;;  %v235_v31 = vld [vmem:[#allocation2 + $0x240] ss:$8 sm:$0x7]  ;;  %v76_v7 = vld [vmem:[#allocation2 + $0x58] sm:$0xff] }
  0x11   :  { %290 = vmatpush.msrb.mxu2 %v2966_v17  ;;  %133 = vmatpush.msra.mxu1 %v72_v18  ;;  %v237_v32 = vperm.slane %v235_v31, 0  ;;  %v239_v40 = vperm.slane %v235_v31, 2  ;;  %v238_v45 = vperm.slane %v235_v31, 1  ;;  %v87_v54 = vld [vmem:[#allocation2 + $0xb0] sm:$0xff]  ;;  %v82_v1 = vld [vmem:[#allocation2 + $0x88] sm:$0xff]  ;;  %v69_v18 = vld [vmem:[#allocation2 + $0x20] sm:$0xff] }
  0x12   :  { %310 = vmatpush.msrb.mxu3 %v2969_v19  ;;  %200 = vmatpush.msrb.mxu0 %v87_v54  ;;  %v75_v6 = vld [vmem:[#allocation2 + $0x50] sm:$0xff] }
  0x13   :  { %134 = vmatpush.msra.mxu1 %v66_v20  ;;  %291 = vmatpush.msrb.mxu2 %v2971_v21  ;;  %v70_v20 = vld [vmem:[#allocation2 + $0x28] sm:$0xff] }
  0x14   :  { %2621 = vmatmul.msk.f32.vlgmr.msra.gmra.mxu1 %vm89_vm0, %v2954_v13  ;;  %311 = vmatpush.msrb.mxu3 %v2975_v22 }
  0x15   :  { %2620 = vmatmul.msk.f32.gmra.mxu0 %vm89_vm0, %v2980_v23  ;;  %292 = vmatpush.msrb.mxu2 %v2983_v24 }
  0x16   :  { %2624 = vmatmul.msk.f32.gmra.mxu2 %vm89_vm0, %v2980_v23  ;;  %2626 = vmatmul.msk.f32.gmra.mxu3 %vm89_vm0, %v2980_v23 }
  0x17   :  { %312 = vmatpush.msrb.mxu3 %v2989_v25  ;;  %329 = vmatpush.msra.mxu2 %v2991_v26 }
  0x18   :  { %223 = vmatpush.msrb.mxu1 %v88_v55  ;;  %201 = vmatpush.msrb.mxu0 %v81_v0 }
  0x19   :  { %409 = vmatpush.msra.mxu3 %v2956_v14  ;;  %330 = vmatpush.msra.mxu2 %v3000_v27 }
  0x1a   :  { %224 = vmatpush.msrb.mxu1 %v82_v1  ;;  %202 = vmatpush.msrb.mxu0 %v75_v6 }
  0x1b   :  { %410 = vmatpush.msra.mxu3 %v2966_v17  ;;  %331 = vmatpush.msra.mxu2 %v3004_v28 }
  0x1c   :  { %2622 = vmatmul.msk.f32.gmra.mxu1 %vm89_vm0, %v2980_v23  ;;  %203 = vmatpush.msrb.mxu0 %v69_v18 }
  0x1d   :  { %411 = vmatpush.msra.mxu3 %v2971_v21  ;;  %332 = vmatpush.msra.mxu2 %v3008_v29 }
  0x1e   :  { %293 = vmatmul.f32.vlgmr.msrb.gmra.mxu2 %v2925_v30  ;;  %313 = vmatmul.f32.vlgmr.msrb.gmra.mxu3 %v2925_v30 }
  0x1f   :  { %412 = vmatpush.msra.mxu3 %v2983_v24  ;;  %532 = vmatpush.msrb.mxu2 %v2956_v14 }
  0x20   :  { %225 = vmatpush.msrb.mxu1 %v76_v7  ;;  %2627 = vmatmul.msk.f32.vlgmr.msrb.gmra.mxu0 %vm89_vm0, %v2954_v13 }
  0x21   :  { %552 = vmatpush.msrb.mxu3 %v2960_v16  ;;  %533 = vmatpush.msrb.mxu2 %v2966_v17 }
  0x22   :  { %226 = vmatpush.msrb.mxu1 %v70_v20  ;;  %429 = vmatpush.msra.mxu0 %v2960_v16 }
  0x23   :  { %553 = vmatpush.msrb.mxu3 %v2969_v19  ;;  %534 = vmatpush.msrb.mxu2 %v2971_v21 }
  0x24   :  { %2629 = vmatmul.msk.f32.vlgmr.msrb.gmra.mxu1 %vm89_vm0, %v2954_v13  ;;  %430 = vmatpush.msra.mxu0 %v2969_v19 }
  0x25   :  { %554 = vmatpush.msrb.mxu3 %v2975_v22  ;;  %535 = vmatpush.msrb.mxu2 %v2983_v24 }
  0x26   :  { %333 = vmatmul.f32.vlgmr.msra.gmra.mxu2 %v2925_v30  ;;  %449 = vmatpush.msra.mxu1 %v2991_v26 }
  0x27   :  { %555 = vmatpush.msrb.mxu3 %v2989_v25  ;;  %675 = vmatpush.msra.mxu2 %v2960_v16 }
  0x28   :  { %450 = vmatpush.msra.mxu1 %v3000_v27  ;;  %431 = vmatpush.msra.mxu0 %v2975_v22 }
  0x29   :  { %676 = vmatpush.msra.mxu2 %v2969_v19  ;;  %2628 = vmatmul.msk.f32.gmra.mxu0 %vm89_vm0, %v2980_v23 }
  0x2a   :  { %451 = vmatpush.msra.mxu1 %v3004_v28  ;;  %432 = vmatpush.msra.mxu0 %v2989_v25 }
  0x2b   :  { %677 = vmatpush.msra.mxu2 %v2975_v22 }
  0x2c   :  { %452 = vmatpush.msra.mxu1 %v3008_v29  ;;  %572 = vmatpush.msrb.mxu0 %v2991_v26 }
  0x2d   :  { %678 = vmatpush.msra.mxu2 %v2989_v25  ;;  %2630 = vmatmul.msk.f32.gmra.mxu1 %vm89_vm0, %v2980_v23 }
  0x2e   :  { %655 = vmatpush.msrb.mxu1 %v2956_v14  ;;  %573 = vmatpush.msrb.mxu0 %v3000_v27 }
  0x30   :  { %656 = vmatpush.msrb.mxu1 %v2966_v17  ;;  %574 = vmatpush.msrb.mxu0 %v3004_v28 }
  0x32   :  { %657 = vmatpush.msrb.mxu1 %v2971_v21  ;;  %575 = vmatpush.msrb.mxu0 %v3008_v29 }
  0x34   :  { %658 = vmatpush.msrb.mxu1 %v2983_v24 }
  0x8a   :  { %v113_v33 = vpop.f32.mrf.mxu0 }
  0x8b   :  { %v243_v35 = vadd.f32 %v237_v32, %v113_v33 }
  0x8d   :  { %v765_v39 = vrot.slane %v243_v35, 6  ;;  %v887_v43 = vrot.slane %v243_v35, 2 }
  0x91   :  { %v159_v37 = vpop.f32.mrf.mxu2  ;;  %v3034_v38 = vpop.f32.mrf.mxu3 }
  0x92   :  { %v116_v41 = vpop.f32.mrf.mxu0  ;;  %v136_v42 = vpop.f32.mrf.mxu1  ;;  %v3044_v50 = vadd.f32 %v239_v40, %v159_v37 }
  0x93   :  { %v246_v44 = vadd.f32 %v237_v32, %v116_v41  ;;  %v244_v46 = vadd.f32 %v238_v45, %v136_v42 }
  0x94   :  { %v767_v60 = vrot.slane %v3044_v50, 6  ;;  %v889_v61 = vrot.slane %v3044_v50, 2 }
  0x95   :  { %v385_v48 = vrot.slane %v246_v44, 2  ;;  %v3042_v49 = vsel %vm38_vm1, %v246_v44, %v765_v39  ;;  %v3048_v51 = vsel %vm38_vm1, %v246_v44, %v887_v43  ;;  %v766_v58 = vrot.slane %v244_v46, 6 }
  0x96   :  { %v888_v59 = vrot.slane %v244_v46, 2  ;;  %v265_v5 = vrot.slane %v246_v44, 6 }
  0x97   :  { %v3055_v53 = vsel %vm38_vm1, %v243_v35, %v385_v48 }
  0x98   :  { %v3103_v33 = vsel %vm38_vm1, %v243_v35, %v265_v5 }
  0x99   :  { %v162_v56 = vpop.f32.mrf.mxu2  ;;  %v3058_v57 = vpop.f32.mrf.mxu3 }
  0x9a   :  { %v3062_v62 = vadd.f32 %v239_v40, %v162_v56  ;;  %v139_v63 = vpop.f32.mrf.mxu1  ;;  %v3127_v56 = vld [vmem:[#allocation2 + $0x241] ss:$0 sm:$0xff] }
  0x9b   :  { %v247_v2 = vadd.f32 %v238_v45, %v139_v63 }
  0x9c   :  { %v387_v3 = vrot.slane %v3062_v62, 2  ;;  %v3069_v4 = vsel %vm58_vm2, %v3062_v62, %v889_v61  ;;  %v3074_v8 = vsel %vm58_vm2, %v3062_v62, %v767_v60 }
  0x9d   :  { %v266_v9 = vrot.slane %v247_v2, 6  ;;  %v386_v10 = vrot.slane %v247_v2, 2  ;;  %v3078_v11 = vsel %vm45_vm3, %v247_v2, %v766_v58  ;;  %v3082_v12 = vsel %vm45_vm3, %v247_v2, %v888_v59 }
  0x9e   :  { %v3087_v15 = vsel %vm58_vm2, %v3044_v50, %v387_v3  ;;  %v267_v2 = vrot.slane %v3062_v62, 6 }
  0x9f   :  { %v3091_v31 = vsel %vm45_vm3, %v244_v46, %v266_v9  ;;  %v3095_v32 = vsel %vm45_vm3, %v244_v46, %v386_v10 }
  0xa0   :  { %v3134_v20 = vsel %vm58_vm2, %v3044_v50, %v267_v2  ;;  %v3157_v50 = vpop.f32.mrf.mxu0 }
  0xa1   :  { %v294_v34 = vpop.f32.mrf.mxu2  ;;  %v314_v37 = vpop.f32.mrf.mxu3 }
  0xa2   :  { %v337_v39 = vadd.f32 %v294_v34, %v3103_v33  ;;  %v357_v40 = vadd.f32 %v314_v37, %v3091_v31 }
  0xa4   :  { %v2631_v41 = vmul.f32 -1.442695, %v337_v39  ;;  %v2632_v13 = vmul.f32 -1.442695, %v357_v40 }
  0xa6   :  { %2727 = vpow2.f32 %v2631_v41 }
  0xa7   :  { %2729 = vpow2.f32 %v2632_v13 }
  0xa9   :  { %v334_v58 = vpop.f32.mrf.mxu2 }
  0xaa   :  { %v377_v1 = vadd.f32 %v334_v58, %v3127_v56  ;;  %v3163_v58 = vpop.f32.mrf.mxu1 }
  0xac   :  { %v2728_v35 = vpop.eup %2727 }
  0xad   :  { %v2730_v42 = vpop.eup %2729  ;;  %v341_v43 = vadd.f32 1.0, %v2728_v35 }
  0xae   :  { %v361_v44 = vadd.f32 1.0, %v2730_v42 }
  0xaf   :  { %2731 = vrcp.f32 %v341_v43  ;;  %v353_v59 = vand.u32 2147483648, %v341_v43  ;;  %v351_v61 = vand.u32 2147483647, %v341_v43  ;;  %vm347_vm5 = vweird.f32 %v341_v43 }
  0xb0   :  { %2733 = vrcp.f32 %v361_v44  ;;  %v373_v9 = vand.u32 2147483648, %v361_v44  ;;  %vm367_vm9 = vweird.f32 %v361_v44  ;;  %v371_v18 = vand.u32 2147483647, %v361_v44 }
  0xb1   :  { %v354_v3 = vor.u32 1.1754944e-38, %v353_v59  ;;  %vm352_vm7 = vcmp.eq.f32.partialorder %v351_v61, 8.507059e+37 }
  0xb2   :  { %v374_v37 = vor.u32 1.1754944e-38, %v373_v9  ;;  %vm372_vm11 = vcmp.eq.f32.partialorder %v371_v18, 8.507059e+37 }
  0xb5   :  { %v2732_v23 = vpop.eup %2731 }
  0xb6   :  { %v2734_v45 = vpop.eup %2733  ;;  %v343_v46 = vmul.f32 %v2732_v23, %v341_v43  ;;  %vm348_vm4 = vweird.f32 %v2732_v23  ;;  %v3159_v43 = vpop.f32.mrf.mxu0 }
  0xb7   :  { %v363_v48 = vmul.f32 %v2734_v45, %v361_v44  ;;  %vm349_vm6 = vmor %vm347_vm5, %vm348_vm4  ;;  %vm368_vm8 = vweird.f32 %v2734_v45 }
  0xb8   :  { %v344_v54 = vsub.f32 1.0, %v343_v46  ;;  %vm369_vm10 = vmor %vm367_vm9, %vm368_vm8 }
  0xb9   :  { %v364_v55 = vsub.f32 1.0, %v363_v48 }
  0xba   :  { %v345_v60 = vmul.f32 %v2732_v23, %v344_v54 }
  0xbb   :  { %v365_v63 = vmul.f32 %v2734_v45, %v364_v55 }
  0xbc   :  { %v346_v0 = vadd.f32 %v2732_v23, %v345_v60 }
  0xbd   :  { %v366_v6 = vadd.f32 %v2734_v45, %v365_v63 }
  0xbe   :  { %v350_v5 = vsel %vm349_vm6, %v2732_v23, %v346_v0  ;;  %v3165_v0 = vpop.f32.mrf.mxu1 }
  0xbf   :  { %v355_v7 = vsel %vm352_vm7, %v354_v3, %v350_v5  ;;  %v370_v62 = vsel %vm369_vm10, %v2734_v45, %v366_v6 }
  0xc0   :  { %v378_v10 = vmul.f32 %v377_v1, %v355_v7  ;;  %v375_v39 = vsel %vm372_vm11, %v374_v37, %v370_v62 }
  0xc1   :  { %v381_v40 = vsub.f32 1.0, %v375_v39  ;;  %v383_v35 = vmul.f32 0.0, %v375_v39 }
  0xc2   :  { %v379_v34 = vadd.f32 %v378_v10, %v3134_v20 }
  0xc4   :  { %2735 = vtanh.f32 %v379_v34 }
  0xca   :  { %v2736_v41 = vpop.eup %2735 }
  0xcb   :  { %v382_v13 = vmul.f32 %v2736_v41, %v381_v40 }
  0xcd   :  { %v3137_v42 = vadd.f32 %v383_v35, %v382_v13 }
  0xcf   :  { %2633 = vmatmul.msk.f32.vlgmr.msra.gmra.mxu3 %vm89_vm0, %v3137_v42  ;;  %2634 = vmatmul.msk.f32.vlgmr.msra.gmra.mxu0 %vm89_vm0, %v3137_v42 }
  0xd0   :  { %2635 = vmatmul.msk.f32.vlgmr.msra.gmra.mxu1 %vm89_vm0, %v3137_v42  ;;  %695 = vmatpush.msra.mxu3 %v2991_v26 }
  0xd1   :  { %790 = vmatpush.msra.mxu0 %v2956_v14  ;;  %810 = vmatpush.msra.mxu1 %v2960_v16 }
  0xd2   :  { %696 = vmatpush.msra.mxu3 %v3000_v27 }
  0xd3   :  { %791 = vmatpush.msra.mxu0 %v2966_v17  ;;  %811 = vmatpush.msra.mxu1 %v2969_v19 }
  0xd4   :  { %697 = vmatpush.msra.mxu3 %v3004_v28 }
  0xd5   :  { %792 = vmatpush.msra.mxu0 %v2971_v21  ;;  %812 = vmatpush.msra.mxu1 %v2975_v22 }
  0xd6   :  { %698 = vmatpush.msra.mxu3 %v3008_v29 }
  0xd7   :  { %793 = vmatpush.msra.mxu0 %v2983_v24  ;;  %813 = vmatpush.msra.mxu1 %v2989_v25 }
 0x14c   :  { %v434_v44 = vpop.f32.mrf.mxu0 }
 0x14d   :  { %v481_v23 = vrot.slane %v434_v44, 6  ;;  %v454_v9 = vpop.f32.mrf.mxu1 }
 0x14e   :  { %v503_v34 = vadd.f32 %v454_v9, %v3127_v56 }
 0x14f   :  { %v483_v45 = vadd.f32 %v481_v23, %v3095_v32 }
 0x150   :  { %v505_v13 = vrot.slane %v503_v34, 6 }
 0x151   :  { %v2637_v46 = vmul.f32 -1.442695, %v483_v45 }
 0x152   :  { %v414_v48 = vpop.f32.mrf.mxu3 }
 0x153   :  { %2737 = vpow2.f32 %v2637_v46  ;;  %v458_v54 = vrot.slane %v414_v48, 6 }
 0x155   :  { %v460_v55 = vadd.f32 %v458_v54, %v3055_v53 }
 0x157   :  { %v2636_v59 = vmul.f32 -1.442695, %v460_v55 }
 0x159   :  { %v2738_v60 = vpop.eup %2737  ;;  %2739 = vpow2.f32 %v2636_v59 }
 0x15a   :  { %v487_v61 = vadd.f32 1.0, %v2738_v60 }
 0x15c   :  { %2741 = vrcp.f32 %v487_v61  ;;  %v499_v45 = vand.u32 2147483648, %v487_v61  ;;  %vm493_vm5 = vweird.f32 %v487_v61  ;;  %v497_v48 = vand.u32 2147483647, %v487_v61 }
 0x15e   :  { %v500_v59 = vor.u32 1.1754944e-38, %v499_v45  ;;  %vm498_vm7 = vcmp.eq.f32.partialorder %v497_v48, 8.507059e+37 }
 0x15f   :  { %v2740_v63 = vpop.eup %2739 }
 0x160   :  { %v464_v1 = vadd.f32 1.0, %v2740_v63 }
 0x162   :  { %2743 = vrcp.f32 %v464_v1  ;;  %v2742_v2 = vpop.eup %2741  ;;  %v476_v18 = vand.u32 2147483648, %v464_v1  ;;  %v474_v37 = vand.u32 2147483647, %v464_v1  ;;  %vm470_vm13 = vweird.f32 %v464_v1 }
 0x163   :  { %v489_v3 = vmul.f32 %v2742_v2, %v487_v61  ;;  %vm494_vm4 = vweird.f32 %v2742_v2 }
 0x164   :  { %v477_v41 = vor.u32 1.1754944e-38, %v476_v18  ;;  %vm475_vm15 = vcmp.eq.f32.partialorder %v474_v37, 8.507059e+37  ;;  %vm495_vm6 = vmor %vm493_vm5, %vm494_vm4  ;;  %vm1264_vm4 = vcmask 1041408   ;;  %vm1266_vm5 = vcmask 1043456  }
 0x165   :  { %v490_v7 = vsub.f32 1.0, %v489_v3 }
 0x167   :  { %v491_v39 = vmul.f32 %v2742_v2, %v490_v7 }
 0x168   :  { %v2744_v5 = vpop.eup %2743 }
 0x169   :  { %v466_v6 = vmul.f32 %v2744_v5, %v464_v1  ;;  %vm471_vm12 = vweird.f32 %v2744_v5  ;;  %v492_v44 = vadd.f32 %v2742_v2, %v491_v39  ;;  %v512_v1 = vrot.slane %v3137_v42, 6 }
 0x16a   :  { %vm472_vm14 = vmor %vm470_vm13, %vm471_vm12 }
 0x16b   :  { %v467_v10 = vsub.f32 1.0, %v466_v6  ;;  %v496_v55 = vsel %vm495_vm6, %v2742_v2, %v492_v44 }
 0x16c   :  { %v501_v60 = vsel %vm498_vm7, %v500_v59, %v496_v55 }
 0x16d   :  { %v468_v62 = vmul.f32 %v2744_v5, %v467_v10  ;;  %v510_v63 = vsub.f32 1.0, %v501_v60  ;;  %v514_v6 = vmul.f32 %v512_v1, %v501_v60 }
 0x16f   :  { %v469_v40 = vadd.f32 %v2744_v5, %v468_v62 }
 0x171   :  { %v473_v35 = vsel %vm472_vm14, %v2744_v5, %v469_v40 }
 0x172   :  { %v478_v23 = vsel %vm475_vm15, %v477_v41, %v473_v35 }
 0x173   :  { %v507_v46 = vmul.f32 %v505_v13, %v478_v23 }
 0x175   :  { %v508_v54 = vadd.f32 %v507_v46, %v3087_v15 }
 0x177   :  { %2745 = vtanh.f32 %v508_v54 }
 0x17d   :  { %v2746_v3 = vpop.eup %2745 }
 0x17e   :  { %v511_v5 = vmul.f32 %v2746_v3, %v510_v63 }
 0x180   :  { %v3170_v7 = vadd.f32 %v514_v6, %v511_v5 }
 0x182   :  { %v517_v9 = vrot.slane %v3170_v7, 2 }
 0x184   :  { %2638 = vmatmul.msk.f32.vlgmr.msrb.gmra.mxu2 %vm89_vm0, %v517_v9  ;;  %2639 = vmatmul.msk.f32.vlgmr.msrb.gmra.mxu3 %vm89_vm0, %v517_v9 }
 0x185   :  { %2640 = vmatmul.msk.f32.vlgmr.msrb.gmra.mxu0 %vm89_vm0, %v517_v9  ;;  %830 = vmatpush.msrb.mxu2 %v2991_v26 }
 0x186   :  { %911 = vmatpush.msrb.mxu3 %v2956_v14  ;;  %931 = vmatpush.msrb.mxu0 %v2960_v16 }
 0x187   :  { %831 = vmatpush.msrb.mxu2 %v3000_v27 }
 0x188   :  { %912 = vmatpush.msrb.mxu3 %v2966_v17  ;;  %932 = vmatpush.msrb.mxu0 %v2969_v19 }
 0x189   :  { %832 = vmatpush.msrb.mxu2 %v3004_v28 }
 0x18a   :  { %913 = vmatpush.msrb.mxu3 %v2971_v21  ;;  %933 = vmatpush.msrb.mxu0 %v2975_v22 }
 0x18b   :  { %833 = vmatpush.msrb.mxu2 %v3008_v29 }
 0x18c   :  { %914 = vmatpush.msrb.mxu3 %v2983_v24  ;;  %934 = vmatpush.msrb.mxu0 %v2989_v25 }
 0x202   :  { %v577_v46 = vpop.f32.mrf.mxu0 }
 0x207   :  { %v537_v61 = vpop.f32.mrf.mxu2  ;;  %v557_v2 = vpop.f32.mrf.mxu3 }
 0x208   :  { %v581_v10 = vrot.slane %v537_v61, 4  ;;  %v604_v18 = vrot.slane %v557_v2, 4 }
 0x20a   :  { %v583_v34 = vadd.f32 %v581_v10, %v3103_v33  ;;  %v606_v62 = vadd.f32 %v604_v18, %v3091_v31  ;;  %v626_v31 = vadd.f32 %v577_v46, %v3127_v56 }
 0x20c   :  { %v2641_v37 = vmul.f32 -1.442695, %v583_v34  ;;  %v2642_v39 = vmul.f32 -1.442695, %v606_v62  ;;  %v628_v5 = vrot.slane %v626_v31, 4 }
 0x20e   :  { %2747 = vpow2.f32 %v2641_v37 }
 0x20f   :  { %2749 = vpow2.f32 %v2642_v39 }
 0x214   :  { %v2748_v40 = vpop.eup %2747 }
 0x215   :  { %v2750_v41 = vpop.eup %2749  ;;  %v587_v13 = vadd.f32 1.0, %v2748_v40  ;;  %v635_v40 = vrot.slane %v3170_v7, 6 }
 0x216   :  { %v610_v35 = vadd.f32 1.0, %v2750_v41 }
 0x217   :  { %2751 = vrcp.f32 %v587_v13  ;;  %v599_v55 = vand.u32 2147483648, %v587_v13  ;;  %v597_v60 = vand.u32 2147483647, %v587_v13  ;;  %vm593_vm9 = vweird.f32 %v587_v13 }
 0x218   :  { %2753 = vrcp.f32 %v610_v35  ;;  %v622_v10 = vand.u32 2147483648, %v610_v35  ;;  %vm616_vm13 = vweird.f32 %v610_v35  ;;  %v620_v18 = vand.u32 2147483647, %v610_v35 }
 0x219   :  { %v600_v3 = vor.u32 1.1754944e-38, %v599_v55  ;;  %vm598_vm11 = vcmp.eq.f32.partialorder %v597_v60, 8.507059e+37 }
 0x21a   :  { %v623_v37 = vor.u32 1.1754944e-38, %v622_v10  ;;  %vm621_vm15 = vcmp.eq.f32.partialorder %v620_v18, 8.507059e+37 }
 0x21d   :  { %v2752_v44 = vpop.eup %2751 }
 0x21e   :  { %v2754_v23 = vpop.eup %2753  ;;  %v589_v45 = vmul.f32 %v2752_v44, %v587_v13  ;;  %vm594_vm8 = vweird.f32 %v2752_v44 }
 0x21f   :  { %v612_v48 = vmul.f32 %v2754_v23, %v610_v35  ;;  %vm595_vm10 = vmor %vm593_vm9, %vm594_vm8  ;;  %vm617_vm12 = vweird.f32 %v2754_v23 }
 0x220   :  { %v590_v54 = vsub.f32 1.0, %v589_v45  ;;  %vm618_vm14 = vmor %vm616_vm13, %vm617_vm12 }
 0x221   :  { %v613_v33 = vsub.f32 1.0, %v612_v48 }
 0x222   :  { %v591_v59 = vmul.f32 %v2752_v44, %v590_v54 }
 0x223   :  { %v614_v63 = vmul.f32 %v2754_v23, %v613_v33 }
 0x224   :  { %v592_v1 = vadd.f32 %v2752_v44, %v591_v59 }
 0x225   :  { %v615_v61 = vadd.f32 %v2754_v23, %v614_v63 }
 0x226   :  { %v596_v6 = vsel %vm595_vm10, %v2752_v44, %v592_v1 }
 0x227   :  { %v601_v9 = vsel %vm598_vm11, %v600_v3, %v596_v6  ;;  %v619_v62 = vsel %vm618_vm14, %v2754_v23, %v615_v61  ;;  %vm1268_vm14 = vcmask 1045504  }
 0x228   :  { %v630_v2 = vmul.f32 %v628_v5, %v601_v9  ;;  %v624_v39 = vsel %vm621_vm15, %v623_v37, %v619_v62 }
 0x229   :  { %v633_v41 = vsub.f32 1.0, %v624_v39  ;;  %v637_v44 = vmul.f32 %v635_v40, %v624_v39 }
 0x22a   :  { %v631_v34 = vadd.f32 %v630_v2, %v3134_v20  ;;  %v1265_v20 = vsel %vm1264_vm4, %v3137_v42, %v3170_v7 }
 0x22c   :  { %2755 = vtanh.f32 %v631_v34 }
 0x232   :  { %v2756_v13 = vpop.eup %2755 }
 0x233   :  { %v634_v45 = vmul.f32 %v2756_v13, %v633_v41 }
 0x235   :  { %v3195_v46 = vadd.f32 %v637_v44, %v634_v45 }
 0x237   :  { %v640_v35 = vrot.slane %v3195_v46, 4  ;;  %v3203_v23 = vsel %vm1266_vm5, %v1265_v20, %v3195_v46 }
 0x239   :  { %2643 = vmatmul.msk.f32.vlgmr.msrb.gmra.mxu1 %vm89_vm0, %v640_v35  ;;  %2644 = vmatmul.msk.f32.vlgmr.msra.gmra.mxu2 %vm89_vm0, %v640_v35 }
 0x23a   :  { %2645 = vmatmul.msk.f32.vlgmr.msra.gmra.mxu3 %vm89_vm0, %v640_v35  ;;  %951 = vmatpush.msrb.mxu1 %v2991_v26 }
 0x23b   :  { %1034 = vmatpush.msra.mxu2 %v2956_v14  ;;  %1054 = vmatpush.msra.mxu3 %v2960_v16 }
 0x23c   :  { %952 = vmatpush.msrb.mxu1 %v3000_v27 }
 0x23d   :  { %1035 = vmatpush.msra.mxu2 %v2966_v17  ;;  %1055 = vmatpush.msra.mxu3 %v2969_v19 }
 0x23e   :  { %953 = vmatpush.msrb.mxu1 %v3004_v28 }
 0x23f   :  { %1036 = vmatpush.msra.mxu2 %v2971_v21  ;;  %1056 = vmatpush.msra.mxu3 %v2975_v22 }
 0x240   :  { %954 = vmatpush.msrb.mxu1 %v3008_v29 }
 0x241   :  { %1037 = vmatpush.msra.mxu2 %v2983_v24  ;;  %1057 = vmatpush.msra.mxu3 %v2989_v25 }
 0x2b6   :  { %v660_v48 = vpop.f32.mrf.mxu1 }
 0x2b7   :  { %v704_v54 = vrot.slane %v660_v48, 2 }
 0x2b9   :  { %v706_v55 = vadd.f32 %v704_v54, %v3055_v53 }
 0x2bb   :  { %v2646_v33 = vmul.f32 -1.442695, %v706_v55 }
 0x2bc   :  { %v680_v31 = vpop.f32.mrf.mxu2 }
 0x2bd   :  { %2757 = vpow2.f32 %v2646_v33  ;;  %v727_v59 = vrot.slane %v680_v31, 2  ;;  %v700_v2 = vpop.f32.mrf.mxu3 }
 0x2be   :  { %v749_v62 = vadd.f32 %v700_v2, %v3127_v56 }
 0x2bf   :  { %v729_v60 = vadd.f32 %v727_v59, %v3095_v32 }
 0x2c0   :  { %v751_v45 = vrot.slane %v749_v62, 2 }
 0x2c1   :  { %v2647_v63 = vmul.f32 -1.442695, %v729_v60 }
 0x2c3   :  { %v2758_v1 = vpop.eup %2757  ;;  %2759 = vpow2.f32 %v2647_v63 }
 0x2c4   :  { %v710_v3 = vadd.f32 1.0, %v2758_v1 }
 0x2c6   :  { %2761 = vrcp.f32 %v710_v3  ;;  %v722_v18 = vand.u32 2147483648, %v710_v3  ;;  %v720_v34 = vand.u32 2147483647, %v710_v3  ;;  %vm716_vm7 = vweird.f32 %v710_v3 }
 0x2c8   :  { %v723_v41 = vor.u32 1.1754944e-38, %v722_v18  ;;  %vm721_vm9 = vcmp.eq.f32.partialorder %v720_v34, 8.507059e+37 }
 0x2c9   :  { %v2760_v5 = vpop.eup %2759 }
 0x2ca   :  { %v733_v6 = vadd.f32 1.0, %v2760_v5 }
 0x2cc   :  { %v2762_v9 = vpop.eup %2761  ;;  %2763 = vrcp.f32 %v733_v6  ;;  %v745_v48 = vand.u32 2147483648, %v733_v6  ;;  %v743_v55 = vand.u32 2147483647, %v733_v6  ;;  %vm739_vm11 = vweird.f32 %v733_v6 }
 0x2cd   :  { %v712_v61 = vmul.f32 %v2762_v9, %v710_v3  ;;  %vm717_vm6 = vweird.f32 %v2762_v9  ;;  %v758_v3 = vrot.slane %v3195_v46, 6 }
 0x2ce   :  { %vm718_vm8 = vmor %vm716_vm7, %vm717_vm6  ;;  %v746_v59 = vor.u32 1.1754944e-38, %v745_v48  ;;  %vm744_vm13 = vcmp.eq.f32.partialorder %v743_v55, 8.507059e+37 }
 0x2cf   :  { %v713_v10 = vsub.f32 1.0, %v712_v61 }
 0x2d1   :  { %v714_v53 = vmul.f32 %v2762_v9, %v713_v10 }
 0x2d2   :  { %v2764_v37 = vpop.eup %2763 }
 0x2d3   :  { %v735_v32 = vmul.f32 %v2764_v37, %v733_v6  ;;  %v715_v39 = vadd.f32 %v2762_v9, %v714_v53  ;;  %vm740_vm10 = vweird.f32 %v2764_v37 }
 0x2d4   :  { %vm741_vm12 = vmor %vm739_vm11, %vm740_vm10 }
 0x2d5   :  { %v736_v13 = vsub.f32 1.0, %v735_v32  ;;  %v719_v44 = vsel %vm718_vm8, %v2762_v9, %v715_v39 }
 0x2d6   :  { %v724_v20 = vsel %vm721_vm9, %v723_v41, %v719_v44 }
 0x2d7   :  { %v737_v35 = vmul.f32 %v2764_v37, %v736_v13  ;;  %v753_v54 = vmul.f32 %v751_v45, %v724_v20 }
 0x2d9   :  { %v738_v33 = vadd.f32 %v2764_v37, %v737_v35  ;;  %v754_v31 = vadd.f32 %v753_v54, %v3087_v15 }
 0x2db   :  { %v742_v60 = vsel %vm741_vm12, %v2764_v37, %v738_v33  ;;  %2765 = vtanh.f32 %v754_v31 }
 0x2dc   :  { %v747_v63 = vsel %vm744_vm13, %v746_v59, %v742_v60 }
 0x2dd   :  { %v756_v1 = vsub.f32 1.0, %v747_v63  ;;  %v760_v61 = vmul.f32 %v758_v3, %v747_v63 }
 0x2e1   :  { %v2766_v5 = vpop.eup %2765 }
 0x2e2   :  { %v757_v9 = vmul.f32 %v2766_v5, %v756_v1 }
 0x2e4   :  { %v761_v2 = vadd.f32 %v760_v61, %v757_v9 }
 0x2e6   :  { %v3225_v10 = vrot.slane %v761_v2, 6  ;;  %v3229_v6 = vsel %vm1268_vm14, %v3203_v23, %v761_v2 }
 0x2e8   :  { %2648 = vmatmul.msk.f32.vlgmr.msra.gmra.mxu0 %vm89_vm0, %v3225_v10  ;;  %2649 = vmatmul.msk.f32.vlgmr.msra.gmra.mxu1 %vm89_vm0, %v3225_v10 }
 0x2e9   :  { %2650 = vmatmul.msk.f32.vlgmr.msrb.gmra.mxu2 %vm89_vm0, %v3225_v10  ;;  %1074 = vmatpush.msra.mxu0 %v2991_v26 }
 0x2ea   :  { %1157 = vmatpush.msra.mxu1 %v2956_v14  ;;  %1177 = vmatpush.msrb.mxu2 %v2960_v16 }
 0x2eb   :  { %1075 = vmatpush.msra.mxu0 %v3000_v27 }
 0x2ec   :  { %1158 = vmatpush.msra.mxu1 %v2966_v17  ;;  %1178 = vmatpush.msrb.mxu2 %v2969_v19 }
 0x2ed   :  { %1076 = vmatpush.msra.mxu0 %v3004_v28 }
 0x2ee   :  { %1159 = vmatpush.msra.mxu1 %v2971_v21  ;;  %1179 = vmatpush.msrb.mxu2 %v2975_v22 }
 0x2ef   :  { %1077 = vmatpush.msra.mxu0 %v3008_v29 }
 0x2f0   :  { %1160 = vmatpush.msra.mxu1 %v2983_v24  ;;  %1180 = vmatpush.msrb.mxu2 %v2989_v25 }
 0x365   :  { %v795_v14 = vpop.f32.mrf.mxu0  ;;  %v815_v16 = vpop.f32.mrf.mxu1 }
 0x366   :  { %v838_v15 = vadd.f32 %v795_v14, %v3042_v49  ;;  %v858_v17 = vadd.f32 %v815_v16, %v3078_v11 }
 0x368   :  { %v2651_v23 = vmul.f32 -1.442695, %v838_v15  ;;  %v2652_v19 = vmul.f32 -1.442695, %v858_v17 }
 0x36a   :  { %2767 = vpow2.f32 %v2651_v23 }
 0x36b   :  { %2769 = vpow2.f32 %v2652_v19 }
 0x36c   :  { %v835_v45 = vpop.f32.mrf.mxu2 }
 0x36d   :  { %v878_v54 = vadd.f32 %v835_v45, %v3127_v56 }
 0x370   :  { %v2768_v18 = vpop.eup %2767 }
 0x371   :  { %v2770_v21 = vpop.eup %2769  ;;  %v842_v53 = vadd.f32 1.0, %v2768_v18 }
 0x372   :  { %v862_v22 = vadd.f32 1.0, %v2770_v21 }
 0x373   :  { %2771 = vrcp.f32 %v842_v53  ;;  %v854_v39 = vand.u32 2147483648, %v842_v53  ;;  %v852_v13 = vand.u32 2147483647, %v842_v53  ;;  %vm848_vm6 = vweird.f32 %v842_v53 }
 0x374   :  { %2773 = vrcp.f32 %v862_v22  ;;  %v874_v31 = vand.u32 2147483648, %v862_v22  ;;  %vm868_vm10 = vweird.f32 %v862_v22  ;;  %v872_v60 = vand.u32 2147483647, %v862_v22 }
 0x375   :  { %v855_v35 = vor.u32 1.1754944e-38, %v854_v39  ;;  %vm853_vm8 = vcmp.eq.f32.partialorder %v852_v13, 8.507059e+37 }
 0x376   :  { %v875_v3 = vor.u32 1.1754944e-38, %v874_v31  ;;  %vm873_vm12 = vcmp.eq.f32.partialorder %v872_v60, 8.507059e+37 }
 0x379   :  { %v2772_v34 = vpop.eup %2771 }
 0x37a   :  { %v2774_v24 = vpop.eup %2773  ;;  %v844_v62 = vmul.f32 %v2772_v34, %v842_v53  ;;  %vm849_vm15 = vweird.f32 %v2772_v34 }
 0x37b   :  { %v864_v25 = vmul.f32 %v2774_v24, %v862_v22  ;;  %vm850_vm7 = vmor %vm848_vm6, %vm849_vm15  ;;  %vm869_vm9 = vweird.f32 %v2774_v24 }
 0x37c   :  { %v845_v37 = vsub.f32 1.0, %v844_v62  ;;  %vm870_vm11 = vmor %vm868_vm10, %vm869_vm9 }
 0x37d   :  { %v865_v32 = vsub.f32 1.0, %v864_v25 }
 0x37e   :  { %v846_v41 = vmul.f32 %v2772_v34, %v845_v37 }
 0x37f   :  { %v866_v44 = vmul.f32 %v2774_v24, %v865_v32 }
 0x380   :  { %v847_v20 = vadd.f32 %v2772_v34, %v846_v41 }
 0x381   :  { %v867_v55 = vadd.f32 %v2774_v24, %v866_v44 }
 0x382   :  { %v851_v48 = vsel %vm850_vm7, %v2772_v34, %v847_v20 }
 0x383   :  { %v856_v33 = vsel %vm853_vm8, %v855_v35, %v851_v48  ;;  %v871_v1 = vsel %vm870_vm11, %v2774_v24, %v867_v55 }
 0x384   :  { %v879_v59 = vmul.f32 %v878_v54, %v856_v33  ;;  %v876_v5 = vsel %vm873_vm12, %v875_v3, %v871_v1 }
 0x385   :  { %v882_v9 = vsub.f32 1.0, %v876_v5  ;;  %v885_v14 = vmul.f32 %v876_v5, %v3225_v10 }
 0x386   :  { %v880_v63 = vadd.f32 %v879_v59, %v3074_v8 }
 0x388   :  { %2775 = vtanh.f32 %v880_v63 }
 0x38e   :  { %v2776_v61 = vpop.eup %2775 }
 0x38f   :  { %v883_v2 = vmul.f32 %v2776_v61, %v882_v9 }
 0x391   :  { %v3254_v16 = vadd.f32 %v885_v14, %v883_v2 }
 0x393   :  { %2653 = vmatmul.msk.f32.vlgmr.msrb.gmra.mxu3 %vm89_vm0, %v3254_v16  ;;  %2654 = vmatmul.msk.f32.vlgmr.msrb.gmra.mxu0 %vm89_vm0, %v3254_v16  ;;  %v1014_v2 = vrot.slane %v3254_v16, 6  ;;  %v1278_v7 = vrot.slane %v3254_v16, 2 }
 0x394   :  { %2655 = vmatmul.msk.f32.vlgmr.msrb.gmra.mxu1 %vm89_vm0, %v3254_v16  ;;  %1197 = vmatpush.msrb.mxu3 %v2991_v26 }
 0x396   :  { %1198 = vmatpush.msrb.mxu3 %v3000_v27 }
 0x398   :  { %1199 = vmatpush.msrb.mxu3 %v3004_v28 }
 0x39a   :  { %1200 = vmatpush.msrb.mxu3 %v3008_v29 }
 0x410   :  { %v936_v15 = vpop.f32.mrf.mxu0 }
 0x411   :  { %v983_v17 = vrot.slane %v936_v15, 6  ;;  %v956_v32 = vpop.f32.mrf.mxu1 }
 0x412   :  { %v1005_v13 = vadd.f32 %v956_v32, %v3127_v56 }
 0x413   :  { %v985_v23 = vadd.f32 %v983_v17, %v3082_v12 }
 0x414   :  { %v1007_v54 = vrot.slane %v1005_v13, 6 }
 0x415   :  { %v2657_v19 = vmul.f32 -1.442695, %v985_v23 }
 0x416   :  { %v916_v18 = vpop.f32.mrf.mxu3 }
 0x417   :  { %2777 = vpow2.f32 %v2657_v19  ;;  %v960_v21 = vrot.slane %v916_v18, 6 }
 0x419   :  { %v962_v53 = vadd.f32 %v960_v21, %v3048_v51 }
 0x41b   :  { %v2656_v22 = vmul.f32 -1.442695, %v962_v53 }
 0x41d   :  { %v2778_v34 = vpop.eup %2777  ;;  %2779 = vpow2.f32 %v2656_v22 }
 0x41e   :  { %v989_v26 = vadd.f32 1.0, %v2778_v34 }
 0x420   :  { %2781 = vrcp.f32 %v989_v26  ;;  %v1001_v59 = vand.u32 2147483648, %v989_v26  ;;  %vm995_vm9 = vweird.f32 %v989_v26  ;;  %v999_v63 = vand.u32 2147483647, %v989_v26 }
 0x422   :  { %v1002_v5 = vor.u32 1.1754944e-38, %v1001_v59  ;;  %vm1000_vm11 = vcmp.eq.f32.partialorder %v999_v63, 8.507059e+37 }
 0x423   :  { %v2780_v27 = vpop.eup %2779 }
 0x424   :  { %v966_v24 = vadd.f32 1.0, %v2780_v27 }
 0x426   :  { %2783 = vrcp.f32 %v966_v24  ;;  %v2782_v28 = vpop.eup %2781  ;;  %v978_v41 = vand.u32 2147483648, %v966_v24  ;;  %v976_v45 = vand.u32 2147483647, %v966_v24  ;;  %vm972_vm15 = vweird.f32 %v966_v24 }
 0x427   :  { %v991_v29 = vmul.f32 %v2782_v28, %v989_v26  ;;  %vm996_vm8 = vweird.f32 %v2782_v28 }
 0x428   :  { %v979_v48 = vor.u32 1.1754944e-38, %v978_v41  ;;  %vm977_vm7 = vcmp.eq.f32.partialorder %v976_v45, 8.507059e+37  ;;  %vm997_vm10 = vmor %vm995_vm9, %vm996_vm8 }
 0x429   :  { %v992_v37 = vsub.f32 1.0, %v991_v29 }
 0x42b   :  { %v993_v20 = vmul.f32 %v2782_v28, %v992_v37 }
 0x42c   :  { %v2784_v62 = vpop.eup %2783 }
 0x42d   :  { %v968_v25 = vmul.f32 %v2784_v62, %v966_v24  ;;  %vm973_vm13 = vweird.f32 %v2784_v62  ;;  %v994_v33 = vadd.f32 %v2782_v28, %v993_v20 }
 0x42e   :  { %vm974_vm6 = vmor %vm972_vm15, %vm973_vm13 }
 0x42f   :  { %v969_v39 = vsub.f32 1.0, %v968_v25  ;;  %v998_v3 = vsel %vm997_vm10, %v2782_v28, %v994_v33 }
 0x430   :  { %v1003_v9 = vsel %vm1000_vm11, %v1002_v5, %v998_v3 }
 0x431   :  { %v970_v44 = vmul.f32 %v2784_v62, %v969_v39  ;;  %v1012_v61 = vsub.f32 1.0, %v1003_v9  ;;  %v1016_v17 = vmul.f32 %v1014_v2, %v1003_v9 }
 0x433   :  { %v971_v35 = vadd.f32 %v2784_v62, %v970_v44 }
 0x435   :  { %v975_v55 = vsel %vm974_vm6, %v2784_v62, %v971_v35 }
 0x436   :  { %v980_v31 = vsel %vm977_vm7, %v979_v48, %v975_v55 }
 0x437   :  { %v1009_v60 = vmul.f32 %v1007_v54, %v980_v31 }
 0x439   :  { %v1010_v1 = vadd.f32 %v1009_v60, %v3069_v4 }
 0x43b   :  { %2785 = vtanh.f32 %v1010_v1 }
 0x441   :  { %v2786_v14 = vpop.eup %2785 }
 0x442   :  { %v1013_v15 = vmul.f32 %v2786_v14, %v1012_v61 }
 0x444   :  { %v3271_v23 = vadd.f32 %v1016_v17, %v1013_v15 }
 0x446   :  { %v1019_v19 = vrot.slane %v3271_v23, 2  ;;  %v1137_v14 = vrot.slane %v3271_v23, 6 }
 0x448   :  { %2658 = vmatmul.msk.f32.vlgmr.msra.gmra.mxu2 %vm89_vm0, %v1019_v19  ;;  %2659 = vmatmul.msk.f32.vlgmr.msra.gmra.mxu3 %vm89_vm0, %v1019_v19 }
 0x449   :  { %2660 = vmatmul.msk.f32.vlgmr.msra.gmra.mxu0 %vm89_vm0, %v1019_v19 }
 0x4c6   :  { %v1079_v41 = vpop.f32.mrf.mxu0 }
 0x4cb   :  { %v1039_v18 = vpop.f32.mrf.mxu2  ;;  %v1059_v21 = vpop.f32.mrf.mxu3 }
 0x4cc   :  { %v1083_v53 = vrot.slane %v1039_v18, 4  ;;  %v1106_v22 = vrot.slane %v1059_v21, 4 }
 0x4ce   :  { %v1085_v34 = vadd.f32 %v1083_v53, %v3042_v49  ;;  %v1108_v26 = vadd.f32 %v1106_v22, %v3078_v11  ;;  %v1128_v11 = vadd.f32 %v1079_v41, %v3127_v56 }
 0x4d0   :  { %v2661_v27 = vmul.f32 -1.442695, %v1085_v34  ;;  %v2662_v24 = vmul.f32 -1.442695, %v1108_v26  ;;  %v1130_v33 = vrot.slane %v1128_v11, 4 }
 0x4d2   :  { %2787 = vpow2.f32 %v2661_v27 }
 0x4d3   :  { %2789 = vpow2.f32 %v2662_v24 }
 0x4d8   :  { %v2788_v28 = vpop.eup %2787 }
 0x4d9   :  { %v2790_v29 = vpop.eup %2789  ;;  %v1089_v62 = vadd.f32 1.0, %v2788_v28 }
 0x4da   :  { %v1112_v25 = vadd.f32 1.0, %v2790_v29 }
 0x4db   :  { %2791 = vrcp.f32 %v1089_v62  ;;  %v1101_v45 = vand.u32 2147483648, %v1089_v62  ;;  %v1099_v35 = vand.u32 2147483647, %v1089_v62  ;;  %vm1095_vm13 = vweird.f32 %v1089_v62 }
 0x4dc   :  { %2793 = vrcp.f32 %v1112_v25  ;;  %v1124_v1 = vand.u32 2147483648, %v1112_v25  ;;  %vm1118_vm8 = vweird.f32 %v1112_v25  ;;  %v1122_v3 = vand.u32 2147483647, %v1112_v25 }
 0x4dd   :  { %v1102_v55 = vor.u32 1.1754944e-38, %v1101_v45  ;;  %vm1100_vm6 = vcmp.eq.f32.partialorder %v1099_v35, 8.507059e+37 }
 0x4de   :  { %v1125_v61 = vor.u32 1.1754944e-38, %v1124_v1  ;;  %vm1123_vm10 = vcmp.eq.f32.partialorder %v1122_v3, 8.507059e+37 }
 0x4e1   :  { %v2792_v37 = vpop.eup %2791 }
 0x4e2   :  { %v2794_v32 = vpop.eup %2793  ;;  %v1091_v39 = vmul.f32 %v2792_v37, %v1089_v62  ;;  %vm1096_vm12 = vweird.f32 %v2792_v37 }
 0x4e3   :  { %v1114_v13 = vmul.f32 %v2794_v32, %v1112_v25  ;;  %vm1097_vm15 = vmor %vm1095_vm13, %vm1096_vm12  ;;  %vm1119_vm7 = vweird.f32 %v2794_v32 }
 0x4e4   :  { %v1092_v44 = vsub.f32 1.0, %v1091_v39  ;;  %vm1120_vm9 = vmor %vm1118_vm8, %vm1119_vm7 }
 0x4e5   :  { %v1115_v49 = vsub.f32 1.0, %v1114_v13 }
 0x4e6   :  { %v1093_v20 = vmul.f32 %v2792_v37, %v1092_v44 }
 0x4e7   :  { %v1116_v48 = vmul.f32 %v2794_v32, %v1115_v49 }
 0x4e8   :  { %v1094_v54 = vadd.f32 %v2792_v37, %v1093_v20 }
 0x4e9   :  { %v1117_v60 = vadd.f32 %v2794_v32, %v1116_v48 }
 0x4ea   :  { %v1098_v31 = vsel %vm1097_vm15, %v2792_v37, %v1094_v54 }
 0x4eb   :  { %v1103_v59 = vsel %vm1100_vm6, %v1102_v55, %v1098_v31  ;;  %v1121_v9 = vsel %vm1120_vm9, %v2794_v32, %v1117_v60 }
 0x4ec   :  { %v1132_v63 = vmul.f32 %v1130_v33, %v1103_v59  ;;  %v1126_v2 = vsel %vm1123_vm10, %v1125_v61, %v1121_v9 }
 0x4ed   :  { %v1135_v15 = vsub.f32 1.0, %v1126_v2  ;;  %v1139_v19 = vmul.f32 %v1137_v14, %v1126_v2 }
 0x4ee   :  { %v1133_v5 = vadd.f32 %v1132_v63, %v3074_v8  ;;  %v1270_v8 = vsel %vm1264_vm4, %v3254_v16, %v3271_v23 }
 0x4f0   :  { %2795 = vtanh.f32 %v1133_v5 }
 0x4f6   :  { %v2796_v17 = vpop.eup %2795 }
 0x4f7   :  { %v1136_v18 = vmul.f32 %v2796_v17, %v1135_v15  ;;  %v1280_v17 = vrot.slane %v3195_v46, 2 }
 0x4f9   :  { %v3284_v21 = vadd.f32 %v1139_v19, %v1136_v18 }
 0x4fb   :  { %v1142_v53 = vrot.slane %v3284_v21, 4  ;;  %v3292_v22 = vsel %vm1266_vm5, %v1270_v8, %v3284_v21  ;;  %v1260_v18 = vrot.slane %v3284_v21, 6  ;;  %v1287_v8 = vsel %vm1264_vm4, %v3225_v10, %v1280_v17 }
 0x4fd   :  { %2663 = vmatmul.msk.f32.vlgmr.msra.gmra.mxu1 %vm89_vm0, %v1142_v53  ;;  %2664 = vmatmul.msk.f32.vlgmr.msrb.gmra.mxu2 %vm89_vm0, %v1142_v53 }
 0x4fe   :  { %2665 = vmatmul.msk.f32.vlgmr.msrb.gmra.mxu3 %vm89_vm0, %v1142_v53 }
 0x57a   :  { %v1162_v34 = vpop.f32.mrf.mxu1 }
 0x57b   :  { %v1206_v26 = vrot.slane %v1162_v34, 2 }
 0x57d   :  { %v1208_v27 = vadd.f32 %v1206_v26, %v3048_v51 }
 0x57f   :  { %v2666_v24 = vmul.f32 -1.442695, %v1208_v27 }
 0x580   :  { %v1182_v28 = vpop.f32.mrf.mxu2 }
 0x581   :  { %2797 = vpow2.f32 %v2666_v24  ;;  %v1229_v29 = vrot.slane %v1182_v28, 2  ;;  %v1202_v45 = vpop.f32.mrf.mxu3  ;;  %v1282_v24 = vrot.slane %v3137_v42, 2 }
 0x582   :  { %v1251_v35 = vadd.f32 %v1202_v45, %v3127_v56  ;;  %v1345_v45 = vld [vmem:[#allocation2 + $0x1b0] sm:$0xff] }
 0x583   :  { %v1231_v62 = vadd.f32 %v1229_v29, %v3082_v12 }
 0x584   :  { %v1253_v59 = vrot.slane %v1251_v35, 2  ;;  %v1343_v35 = vld [vmem:[#allocation2 + $0x188] sm:$0xff] }
 0x585   :  { %v2667_v25 = vmul.f32 -1.442695, %v1231_v62  ;;  %v1276_v62 = vrot.slane %v3284_v21, 2 }
 0x587   :  { %v2798_v37 = vpop.eup %2797  ;;  %2799 = vpow2.f32 %v2667_v25 }
 0x588   :  { %v1212_v32 = vadd.f32 1.0, %v2798_v37 }
 0x58a   :  { %2801 = vrcp.f32 %v1212_v32  ;;  %v1224_v11 = vand.u32 2147483648, %v1212_v32  ;;  %v1222_v20 = vand.u32 2147483647, %v1212_v32  ;;  %vm1218_vm12 = vweird.f32 %v1212_v32 }
 0x58c   :  { %v1225_v55 = vor.u32 1.1754944e-38, %v1224_v11  ;;  %vm1223_vm15 = vcmp.eq.f32.partialorder %v1222_v20, 8.507059e+37  ;;  %v1347_v11 = vld [vmem:[#allocation2 + $0x1c0] sm:$0xff] }
 0x58d   :  { %v2800_v39 = vpop.eup %2799  ;;  %v1342_v20 = vld [vmem:[#allocation2 + $0x180] sm:$0xff] }
 0x58e   :  { %v1235_v41 = vadd.f32 1.0, %v2800_v39  ;;  %v1353_v39 = vld [vmem:[#allocation2 + $0x220] sm:$0xff] }
 0x58f   :  { %1427 = vmatpush.msra.mxu2 %v1353_v39 }
 0x590   :  { %v2802_v13 = vpop.eup %2801  ;;  %2803 = vrcp.f32 %v1235_v41  ;;  %v1247_v3 = vand.u32 2147483648, %v1235_v41  ;;  %v1245_v5 = vand.u32 2147483647, %v1235_v41  ;;  %vm1241_vm7 = vweird.f32 %v1235_v41 }
 0x591   :  { %v1214_v44 = vmul.f32 %v2802_v13, %v1212_v32  ;;  %vm1219_vm11 = vweird.f32 %v2802_v13  ;;  %v1352_v32 = vld [vmem:[#allocation2 + $0x218] sm:$0xff] }
 0x592   :  { %vm1220_vm13 = vmor %vm1218_vm12, %vm1219_vm11  ;;  %v1248_v2 = vor.u32 1.1754944e-38, %v1247_v3  ;;  %vm1246_vm9 = vcmp.eq.f32.partialorder %v1245_v5, 8.507059e+37  ;;  %1404 = vmatpush.msrb.mxu1 %v1352_v32  ;;  %v3349_v5 = vld [vmem:[#allocation2 + $0x108] sm:$0xff] }
 0x593   :  { %v1215_v49 = vsub.f32 1.0, %v1214_v44  ;;  %v1350_v44 = vld [vmem:[#allocation2 + $0x1f0] sm:$0xff] }
 0x594   :  { %1428 = vmatpush.msra.mxu2 %v1350_v44 }
 0x595   :  { %v1216_v51 = vmul.f32 %v2802_v13, %v1215_v49  ;;  %v1346_v49 = vld [vmem:[#allocation2 + $0x1b8] sm:$0xff] }
 0x596   :  { %v2804_v48 = vpop.eup %2803  ;;  %1429 = vmatpush.msra.mxu2 %v1347_v11 }
 0x597   :  { %v1237_v12 = vmul.f32 %v2804_v48, %v1235_v41  ;;  %v1217_v54 = vadd.f32 %v2802_v13, %v1216_v51  ;;  %vm1242_vm6 = vweird.f32 %v2804_v48 }
 0x598   :  { %vm1243_vm8 = vmor %vm1241_vm7, %vm1242_vm6  ;;  %vm1472_vm7 = vcmp.eq.s32.totalorder %v3032_v36, 0 }
 0x599   :  { %v1238_v33 = vsub.f32 1.0, %v1237_v12  ;;  %v1221_v31 = vsel %vm1220_vm13, %v2802_v13, %v1217_v54  ;;  %v1349_v13 = vld [vmem:[#allocation2 + $0x1e8] sm:$0xff]  ;;  %vm1475_vm13 = vcmp.eq.s32.totalorder %v3032_v36, 1 }
 0x59a   :  { %v1226_v60 = vsel %vm1223_vm15, %v1225_v55, %v1221_v31  ;;  %1405 = vmatpush.msrb.mxu1 %v1349_v13  ;;  %v1344_v55 = vld [vmem:[#allocation2 + $0x190] sm:$0xff]  ;;  %v3340_v31 = vld [vmem:[#allocation2 + $0x168] sm:$0xff] }
 0x59b   :  { %v1255_v63 = vmul.f32 %v1253_v59, %v1226_v60  ;;  %v1239_v1 = vmul.f32 %v2804_v48, %v1238_v33  ;;  %1430 = vmatpush.msra.mxu2 %v1344_v55  ;;  %1540 = vmatpush.msra.mxu3 %v3340_v31  ;;  %v3343_v60 = vld [vmem:[#allocation2 + $0x138] sm:$0xff] }
 0x59c   :  { %1406 = vmatpush.msrb.mxu1 %v1346_v49  ;;  %v1339_v49 = vld [vmem:[#allocation2 + $0x259] ss:$0 sm:$0xff] }
 0x59d   :  { %v1256_v9 = vadd.f32 %v1255_v63, %v3069_v4  ;;  %v1240_v61 = vadd.f32 %v2804_v48, %v1239_v1  ;;  %v1288_v4 = vsel %vm1266_vm5, %v1287_v8, %v635_v40  ;;  %1541 = vmatpush.msra.mxu3 %v3343_v60  ;;  %v33_v8 = vld [vmem:[%s3745_s1 + $0x8] sm:$0xff] }
 0x59e   :  { %v1289_v29 = vsel %vm1268_vm14, %v1288_v4, %v1282_v24  ;;  %1407 = vmatpush.msrb.mxu1 %v1343_v35  ;;  %v3379_v4 = vld [vmem:[#allocation2 + $0xe0] sm:$0xff]  ;;  %v3384_v24 = vld [vmem:[#allocation2 + $0x118] sm:$0xff] }
 0x59f   :  { %2805 = vtanh.f32 %v1256_v9  ;;  %v1244_v56 = vsel %vm1243_vm8, %v2804_v48, %v1240_v61  ;;  %v3354_v61 = vld [vmem:[#allocation2 + $0xd8] sm:$0xff]  ;;  %1542 = vmatpush.msra.mxu3 %v3349_v5 }
 0x5a0   :  { %v1249_v15 = vsel %vm1246_vm9, %v1248_v2, %v1244_v56  ;;  %1676 = vmatpush.msra.mxu1 %v3340_v31  ;;  %v3361_v2 = vld [vmem:[#allocation2 + $0x170] sm:$0xff] }
 0x5a1   :  { %v1258_v19 = vsub.f32 1.0, %v1249_v15  ;;  %v1262_v26 = vmul.f32 %v1260_v18, %v1249_v15  ;;  %1543 = vmatpush.msra.mxu3 %v3354_v61  ;;  %v3365_v15 = vld [vmem:[#allocation2 + $0x140] sm:$0xff]  ;;  %1696 = vmatpush.msrb.mxu2 %v3361_v2  ;;  %v2926_v18 = vmov 1  }
 0x5a2   :  { %1677 = vmatpush.msra.mxu1 %v3343_v60  ;;  %1544 = vmatmul.f32.vlgmr.msra.gmra.mxu3 %v2925_v30 }
 0x5a3   :  { %1560 = vmatpush.msrb.mxu3 %v3361_v2  ;;  %2724 = vset.pattern.permute.xlu2 %v2926_v18 }
 0x5a4   :  { %1678 = vmatpush.msra.mxu1 %v3349_v5  ;;  %1445 = vperm.xlu2 %2724, %v33_v8  }
 0x5a5   :  { %v2806_v53 = vpop.eup %2805  ;;  %1561 = vmatpush.msrb.mxu3 %v3365_v15  ;;  %1697 = vmatpush.msrb.mxu2 %v3365_v15 }
 0x5a6   :  { %v1259_v34 = vmul.f32 %v2806_v53, %v1258_v19  ;;  %1679 = vmatpush.msra.mxu1 %v3354_v61  ;;  %v3368_v19 = vld [vmem:[#allocation2 + $0x110] sm:$0xff]  ;;  %v3373_v53 = vld [vmem:[#allocation2 + $0x178] sm:$0xff] }
 0x5a7   :  { %1562 = vmatpush.msrb.mxu3 %v3368_v19  ;;  %1698 = vmatpush.msrb.mxu2 %v3368_v19 }
 0x5a8   :  { %v1263_v27 = vadd.f32 %v1262_v26, %v1259_v34  ;;  %v3377_v26 = vld [vmem:[#allocation2 + $0x148] sm:$0xff] }
 0x5a9   :  { %1563 = vmatpush.msrb.mxu3 %v3379_v4  ;;  %1699 = vmatpush.msrb.mxu2 %v3379_v4 }
 0x5aa   :  { %v1272_v28 = vsel %vm1268_vm14, %v3292_v22, %v1263_v27  ;;  %v1274_v46 = vrot.slane %v1263_v27, 6  ;;  %1564 = vmatmul.f32.vlgmr.msrb.gmra.mxu3 %v2925_v30 }
 0x5ab   :  { %v3315_v10 = vsel %vm38_vm1, %v1272_v28, %v1289_v29  ;;  %1716 = vmatpush.msra.mxu3 %v3373_v53 }
 0x5ac   :  { %1294 = vadd.xlane.f32.xlu1 %v3315_v10  ;;  %v1284_v40 = vsel %vm1264_vm4, %v1274_v46, %v1276_v62  ;;  %v1299_v25 = vmul.f32 %v3315_v10, %v3315_v10  ;;  %v3389_v62 = vld [vmem:[#allocation2 + $0xe8] sm:$0xff] }
 0x5ad   :  { %v1285_v42 = vsel %vm1266_vm5, %v1284_v40, %v1137_v14  ;;  %v1351_v14 = vld [vmem:[#allocation2 + $0x210] sm:$0xff]  ;;  %1717 = vmatpush.msra.mxu3 %v3377_v26 }
 0x5ae   :  { %v1286_v22 = vsel %vm1268_vm14, %v1285_v42, %v1278_v7  ;;  %1381 = vmatpush.msrb.mxu0 %v1351_v14  ;;  %v32_v7 = vld [vmem:[%s3745_s1] sm:$0xff]  ;;  %v2927_v42 = vmov 0  }
 0x5af   :  { %v3327_v21 = vsel %vm38_vm1, %v3229_v6, %v1286_v22  ;;  %v1348_v6 = vld [vmem:[#allocation2 + $0x1e0] sm:$0xff]  ;;  %2725 = vset.pattern.permute.xlu0 %v2927_v42  ;;  %2726 = vset.pattern.permute.xlu1 %v2927_v42 }
 0x5b0   :  { %1292 = vadd.xlane.f32.xlu0 %v3327_v21  ;;  %v1298_v16 = vmul.f32 %v3327_v21, %v3327_v21  ;;  %1382 = vmatpush.msrb.mxu0 %v1348_v6  ;;  %v1336_v6 = vld [vmem:[#allocation2 + $0x251] ss:$0 sm:$0xff] }
 0x5b1   :  { %1440 = vperm.xlu2 %2724, %v32_v7   ;;  %1718 = vmatpush.msra.mxu3 %v3384_v24 }
 0x5b2   :  { %1383 = vmatpush.msrb.mxu0 %v1345_v45 }
 0x5b3   :  { %1719 = vmatpush.msra.mxu3 %v3389_v62 }
 0x5b4   :  { %1302 = vadd.xlane.f32.xlu1 %v1299_v25  ;;  %1384 = vmatpush.msrb.mxu0 %v1342_v20  ;;  %v1355_v20 = vld [vmem:[#allocation2 + $0x242] ss:$8 sm:$0x7] }
 0x5b5   :  { %1939 = vmatpush.msrb.mxu3 %v3340_v31  ;;  %v1357_v35 = vperm.slane %v1355_v20, 0 }
 0x5b6   :  { %1580 = vmatpush.msra.mxu0 %v3373_v53 }
 0x5b7   :  { %1940 = vmatpush.msrb.mxu3 %v3343_v60 }
 0x5b8   :  { %1300 = vadd.xlane.f32.xlu0 %v1298_v16  ;;  %1581 = vmatpush.msra.mxu0 %v3377_v26 }
 0x5b9   :  { %1941 = vmatpush.msrb.mxu3 %v3349_v5 }
 0x5ba   :  { %1582 = vmatpush.msra.mxu0 %v3384_v24 }
 0x5bb   :  { %1942 = vmatpush.msrb.mxu3 %v3354_v61 }
 0x5bc   :  { %1583 = vmatpush.msra.mxu0 %v3389_v62 }
 0x5cc   :  { %1641 = vperm.xlu0 %2725, %v33_v8  }
 0x5cd   :  { %1637 = vperm.xlu1 %2726, %v32_v7  }
 0x61f   :  { %v1295_v23 = vpop.xlane.xlu1 %1294 }
 0x620   :  { %v3334_v41 = vmul.f32 0.03125, %v1295_v23 }
 0x622   :  { %v1307_v48 = vmul.f32 %v3334_v41, %v3334_v41  ;;  %v1311_v44 = vsub.f32 %v3315_v10, %v3334_v41  ;;  %v1446_v41 = vpop.permute.xlu2 %1445 }
 0x623   :  { %v1293_v37 = vpop.xlane.xlu0 %1292 }
 0x624   :  { %v3338_v12 = vmul.f32 0.03125, %v1293_v37 }
 0x626   :  { %v1306_v63 = vmul.f32 %v3338_v12, %v3338_v12  ;;  %v1310_v14 = vsub.f32 %v3327_v21, %v3338_v12 }
 0x627   :  { %v1303_v51 = vpop.xlane.xlu1 %1302 }
 0x628   :  { %v1305_v54 = vmul.f32 0.03125, %v1303_v51 }
 0x62a   :  { %v1309_v33 = vsub.f32 %v1305_v54, %v1307_v48  ;;  %v1358_v48 = vperm.slane %v1355_v20, 1  ;;  %v1441_v12 = vpop.permute.xlu2 %1440 }
 0x62b   :  { %v1301_v59 = vpop.xlane.xlu0 %1300 }
 0x62c   :  { %v3347_v1 = vadd.f32 1e-05, %v1309_v33  ;;  %v1304_v3 = vmul.f32 0.03125, %v1301_v59 }
 0x62e   :  { %2807 = vrsqrt.f32 %v3347_v1  ;;  %v1308_v9 = vsub.f32 %v1304_v3, %v1306_v63  ;;  %vm1330_vm11 = vweird.f32 %v3347_v1  ;;  %v1359_v3 = vperm.slane %v1355_v20, 2 }
 0x630   :  { %v1312_v56 = vadd.f32 1e-05, %v1308_v9  ;;  %v3435_v9 = vld [vmem:[#allocation2 + $0x258] ss:$8 sm:$0x7] }
 0x632   :  { %2809 = vrsqrt.f32 %v1312_v56  ;;  %vm1320_vm14 = vweird.f32 %v1312_v56 }
 0x634   :  { %v2808_v17 = vpop.eup %2807 }
 0x635   :  { %v1325_v34 = vmul.f32 %v2808_v17, %v3347_v1  ;;  %vm1331_vm5 = vweird.f32 %v2808_v17 }
 0x636   :  { %vm1332_vm12 = vmor %vm1330_vm11, %vm1331_vm5 }
 0x637   :  { %v1326_v27 = vmul.f32 %v2808_v17, %v1325_v34 }
 0x638   :  { %v2810_v28 = vpop.eup %2809 }
 0x639   :  { %v1327_v46 = vmul.f32 0.5, %v1326_v27  ;;  %v1315_v29 = vmul.f32 %v2810_v28, %v1312_v56  ;;  %vm1321_vm4 = vweird.f32 %v2810_v28  ;;  %v1491_v27 = vperm.slane %v3435_v9, 0 }
 0x63a   :  { %vm1322_vm10 = vmor %vm1320_vm14, %vm1321_vm4 }
 0x63b   :  { %v1316_v40 = vmul.f32 %v2810_v28, %v1315_v29  ;;  %v1328_v22 = vsub.f32 1.5, %v1327_v46 }
 0x63d   :  { %v1317_v25 = vmul.f32 0.5, %v1316_v40  ;;  %v1329_v23 = vmul.f32 %v2808_v17, %v1328_v22 }
 0x63f   :  { %v1318_v16 = vsub.f32 1.5, %v1317_v25  ;;  %v1333_v13 = vsel %vm1332_vm12, %v2808_v17, %v1329_v23 }
 0x640   :  { %v1335_v11 = vmul.f32 %v1333_v13, %v1311_v44 }
 0x641   :  { %v1319_v37 = vmul.f32 %v2810_v28, %v1318_v16 }
 0x642   :  { %v1338_v51 = vmul.f32 %v1336_v6, %v1335_v11 }
 0x643   :  { %v1323_v32 = vsel %vm1322_vm10, %v2810_v28, %v1319_v37  ;;  %v1492_v28 = vperm.slane %v3435_v9, 1  ;;  %v1545_v37 = vpop.f32.mrf.mxu3 }
 0x644   :  { %v1334_v39 = vmul.f32 %v1323_v32, %v1310_v14  ;;  %v1341_v10 = vadd.f32 %v1339_v49, %v1338_v51 }
 0x646   :  { %v1337_v45 = vmul.f32 %v1336_v6, %v1334_v39 }
 0x648   :  { %v1340_v21 = vadd.f32 %v1339_v49, %v1337_v45 }
 0x64a   :  { %2668 = vmatmul.msk.f32.vlgmr.msrb.gmra.mxu0 %vm89_vm0, %v1340_v21  ;;  %2670 = vmatmul.msk.f32.vlgmr.msrb.gmra.mxu1 %vm89_vm0, %v1340_v21 }
 0x64b   :  { %2672 = vmatmul.msk.f32.vlgmr.msra.gmra.mxu2 %vm89_vm0, %v1340_v21  ;;  %1810 = vmatpush.msrb.mxu0 %v3340_v31 }
 0x64c   :  { %1830 = vmatpush.msrb.mxu1 %v3361_v2  ;;  %1850 = vmatpush.msra.mxu2 %v3373_v53 }
 0x64d   :  { %1811 = vmatpush.msrb.mxu0 %v3343_v60 }
 0x64e   :  { %1831 = vmatpush.msrb.mxu1 %v3365_v15  ;;  %1851 = vmatpush.msra.mxu2 %v3377_v26 }
 0x64f   :  { %1812 = vmatpush.msrb.mxu0 %v3349_v5 }
 0x650   :  { %1832 = vmatpush.msrb.mxu1 %v3368_v19  ;;  %1852 = vmatpush.msra.mxu2 %v3384_v24 }
 0x651   :  { %1813 = vmatpush.msrb.mxu0 %v3354_v61 }
 0x652   :  { %2669 = vmatmul.msk.f32.gmra.mxu0 %vm89_vm0, %v1341_v10  ;;  %2671 = vmatmul.msk.f32.gmra.mxu1 %vm89_vm0, %v1341_v10 }
 0x653   :  { %2673 = vmatmul.msk.f32.gmra.mxu2 %vm89_vm0, %v1341_v10  ;;  %1833 = vmatpush.msrb.mxu1 %v3379_v4 }
 0x654   :  { %1853 = vmatpush.msra.mxu2 %v3389_v62 }
 0x65a   :  { %1584 = vmatmul.f32.vlgmr.msra.gmra.mxu0 %v2925_v30 }
 0x65b   :  { %1959 = vmatpush.msra.mxu0 %v3361_v2 }
 0x65d   :  { %1960 = vmatpush.msra.mxu0 %v3365_v15 }
 0x65f   :  { %1961 = vmatpush.msra.mxu0 %v3368_v19 }
 0x661   :  { %1962 = vmatpush.msra.mxu0 %v3379_v4 }
 0x6c7   :  { %v1386_v54 = vpop.f32.mrf.mxu0  ;;  %v1409_v55 = vpop.f32.mrf.mxu1 }
 0x6c8   :  { %v1387_v33 = vadd.f32 %v1386_v54, %v1357_v35  ;;  %v1410_v59 = vadd.f32 %v1409_v55, %v1358_v48 }
 0x6ca   :  { %v1448_v63 = vadd.f32 %v1441_v12, %v1387_v33  ;;  %v1449_v1 = vadd.f32 %v1441_v12, %v1410_v59 }
 0x6cc   :  { %vm1454_vm15 = vcmp.gt.f32.partialorder %v1448_v63, 0.0  ;;  %vm1455_vm6 = vcmp.gt.f32.partialorder %v1449_v1, 0.0 }
 0x6cd   :  { %v2674_v56 = vsel %vm1454_vm15, 1.0, %v2925_v30  ;;  %v2675_v17 = vsel %vm1455_vm6, 1.0, %v2925_v30 }
 0x6ce   :  { %v1473_v18 = vsub.f32 1.0, %v2674_v56  ;;  %v1476_v8 = vsel %vm1475_vm13, %v2674_v56, 0.0  ;;  %v1432_v34 = vpop.f32.mrf.mxu2  ;;  %v1482_v42 = vmul.f32 %v2674_v56, %v3034_v38  ;;  %v1483_v22 = vmul.f32 %v2675_v17, %v3157_v50 }
 0x6cf   :  { %v1433_v46 = vadd.f32 %v1432_v34, %v1359_v3  ;;  %v1389_v29 = vpop.f32.mrf.mxu0  ;;  %v1412_v7 = vpop.f32.mrf.mxu1  ;;  %v1493_v50 = vperm.slane %v3435_v9, 2 }
 0x6d0   :  { %v1478_v40 = vsel %vm1472_vm7, %v1473_v18, %v1476_v8  ;;  %v1390_v25 = vadd.f32 %v1389_v29, %v1357_v35  ;;  %v1413_v23 = vadd.f32 %v1412_v7, %v1358_v48  ;;  %v1497_v39 = vadd.f32 %v1491_v27, %v1482_v42  ;;  %v1565_v9 = vpop.f32.mrf.mxu3 }
 0x6d1   :  { %1480 = vst [vmem:[%s3747_s3] sm:$0xff] %v1478_v40  ;;  %v1450_v16 = vadd.f32 %v1441_v12, %v1433_v46  ;;  %v1498_v6 = vadd.f32 %v1492_v28, %v1483_v22 }
 0x6d2   :  { %v1451_v14 = vadd.f32 %v1446_v41, %v1390_v25  ;;  %v1452_v32 = vadd.f32 %v1446_v41, %v1413_v23  ;;  %v2055_v48 = vrot.slane %v1497_v39, 6  ;;  %v2185_v33 = vrot.slane %v1497_v39, 2 }
 0x6d3   :  { %vm1456_vm8 = vcmp.gt.f32.partialorder %v1450_v16, 0.0  ;;  %v2056_v12 = vrot.slane %v1498_v6, 6 }
 0x6d4   :  { %v2676_v13 = vsel %vm1456_vm8, 1.0, %v2925_v30  ;;  %vm1457_vm9 = vcmp.gt.f32.partialorder %v1451_v14, 0.0  ;;  %vm1458_vm4 = vcmp.gt.f32.partialorder %v1452_v32, 0.0 }
 0x6d5   :  { %v1484_v38 = vmul.f32 %v2676_v13, %v3163_v58  ;;  %v2677_v44 = vsel %vm1457_vm9, 1.0, %v2925_v30  ;;  %v2678_v11 = vsel %vm1458_vm4, 1.0, %v2925_v30 }
 0x6d6   :  { %v1474_v45 = vsub.f32 1.0, %v2677_v44  ;;  %v1477_v49 = vsel %vm1475_vm13, %v2677_v44, 0.0  ;;  %v1485_v21 = vmul.f32 %v2677_v44, %v3058_v57  ;;  %v1435_v51 = vpop.f32.mrf.mxu2  ;;  %v1486_v10 = vmul.f32 %v2678_v11, %v3159_v43 }
 0x6d7   :  { %v1436_v20 = vadd.f32 %v1435_v51, %v1359_v3  ;;  %v2186_v57 = vrot.slane %v1498_v6, 2  ;;  %v3465_v59 = vadd.f32 %v1493_v50, %v1484_v38  ;;  %v1585_v11 = vpop.f32.mrf.mxu0 }
 0x6d8   :  { %v1479_v58 = vsel %vm1472_vm7, %v1474_v45, %v1477_v49  ;;  %v1500_v35 = vadd.f32 %v1491_v27, %v1485_v21  ;;  %v1501_v54 = vadd.f32 %v1492_v28, %v1486_v10  ;;  %v3518_v21 = vld [vmem:[#allocation2 + $0x249] ss:$0 sm:$0xff] }
 0x6d9   :  { %1481 = vst [vmem:[%s3747_s3 + $0x8] sm:$0xff] %v1479_v58  ;;  %v1453_v55 = vadd.f32 %v1446_v41, %v1436_v20  ;;  %v2057_v40 = vrot.slane %v3465_v59, 6 }
 0x6da   :  { %v1519_v63 = vrot.slane %v1500_v35, 6  ;;  %v1652_v1 = vrot.slane %v1500_v35, 2  ;;  %v3469_v43 = vsel %vm38_vm1, %v1500_v35, %v2055_v48  ;;  %v1520_v3 = vrot.slane %v1501_v54, 6 }
 0x6db   :  { %vm1459_vm5 = vcmp.gt.f32.partialorder %v1453_v55, 0.0  ;;  %v1653_v56 = vrot.slane %v1501_v54, 2  ;;  %v3473_v17 = vsel %vm45_vm3, %v1501_v54, %v2056_v12  ;;  %v3486_v34 = vsel %vm38_vm1, %v1500_v35, %v2185_v33 }
 0x6dc   :  { %v3477_v41 = vsel %vm38_vm1, %v1497_v39, %v1519_v63  ;;  %v2679_v18 = vsel %vm1459_vm5, 1.0, %v2925_v30  ;;  %v3482_v8 = vsel %vm38_vm1, %v1497_v39, %v1652_v1  ;;  %v3492_v46 = vsel %vm45_vm3, %v1498_v6, %v1520_v3 }
 0x6dd   :  { %v1588_v27 = vadd.f32 %v1545_v37, %v3477_v41  ;;  %v1487_v28 = vmul.f32 %v2679_v18, %v3165_v0  ;;  %v3496_v29 = vsel %vm45_vm3, %v1498_v6, %v1653_v56  ;;  %v1608_v30 = vadd.f32 %v1565_v9, %v3492_v46 }
 0x6de   :  { %v3501_v7 = vsel %vm45_vm3, %v1501_v54, %v2186_v57  ;;  %v2187_v0 = vrot.slane %v3465_v59, 2  ;;  %v1628_v48 = vadd.f32 %v1585_v11, %v3518_v21 }
 0x6df   :  { %v2680_v42 = vmul.f32 -1.442695, %v1588_v27  ;;  %v1502_v22 = vadd.f32 %v1493_v50, %v1487_v28  ;;  %v2681_v25 = vmul.f32 -1.442695, %v1608_v30 }
 0x6e1   :  { %2811 = vpow2.f32 %v2680_v42  ;;  %v3507_v16 = vsel %vm58_vm2, %v1502_v22, %v2057_v40  ;;  %v1654_v23 = vrot.slane %v1502_v22, 2  ;;  %v3511_v37 = vsel %vm58_vm2, %v1502_v22, %v2187_v0 }
 0x6e2   :  { %2813 = vpow2.f32 %v2681_v25  ;;  %v1521_v12 = vrot.slane %v1502_v22, 6 }
 0x6e3   :  { %v3516_v52 = vsel %vm58_vm2, %v3465_v59, %v1654_v23 }
 0x6e4   :  { %v3524_v9 = vsel %vm58_vm2, %v3465_v59, %v1521_v12  ;;  %v3550_v12 = vpop.permute.xlu0 %1641 }
 0x6e7   :  { %v2812_v14 = vpop.eup %2811 }
 0x6e8   :  { %v2814_v32 = vpop.eup %2813  ;;  %v1592_v39 = vadd.f32 1.0, %v2812_v14 }
 0x6e9   :  { %v1612_v6 = vadd.f32 1.0, %v2814_v32 }
 0x6ea   :  { %2815 = vrcp.f32 %v1592_v39  ;;  %v1604_v51 = vand.u32 2147483648, %v1592_v39  ;;  %v1602_v20 = vand.u32 2147483647, %v1592_v39  ;;  %vm1598_vm14 = vweird.f32 %v1592_v39 }
 0x6eb   :  { %2817 = vrcp.f32 %v1612_v6  ;;  %v1624_v63 = vand.u32 2147483648, %v1612_v6  ;;  %vm1618_vm13 = vweird.f32 %v1612_v6  ;;  %v1622_v3 = vand.u32 2147483647, %v1612_v6 }
 0x6ec   :  { %v1605_v54 = vor.u32 1.1754944e-38, %v1604_v51  ;;  %vm1603_vm11 = vcmp.eq.f32.partialorder %v1602_v20, 8.507059e+37 }
 0x6ed   :  { %v1625_v27 = vor.u32 1.1754944e-38, %v1624_v63  ;;  %vm1623_vm6 = vcmp.eq.f32.partialorder %v1622_v3, 8.507059e+37  ;;  %v1644_v3 = vrot.slane %v3550_v12, 6 }
 0x6f0   :  { %v2816_v13 = vpop.eup %2815 }
 0x6f1   :  { %v2818_v38 = vpop.eup %2817  ;;  %v1594_v50 = vmul.f32 %v2816_v13, %v1592_v39  ;;  %vm1599_vm3 = vweird.f32 %v2816_v13 }
 0x6f2   :  { %v1614_v44 = vmul.f32 %v2818_v38, %v1612_v6  ;;  %vm1600_vm10 = vmor %vm1598_vm14, %vm1599_vm3  ;;  %vm1619_vm12 = vweird.f32 %v2818_v38 }
 0x6f3   :  { %v1595_v45 = vsub.f32 1.0, %v1594_v50  ;;  %vm1620_vm15 = vmor %vm1618_vm13, %vm1619_vm12 }
 0x6f4   :  { %v1615_v49 = vsub.f32 1.0, %v1614_v44 }
 0x6f5   :  { %v1596_v10 = vmul.f32 %v2816_v13, %v1595_v45 }
 0x6f6   :  { %v1616_v58 = vmul.f32 %v2818_v38, %v1615_v49 }
 0x6f7   :  { %v1597_v35 = vadd.f32 %v2816_v13, %v1596_v10 }
 0x6f8   :  { %v1617_v33 = vadd.f32 %v2818_v38, %v1616_v58 }
 0x6f9   :  { %v1601_v55 = vsel %vm1600_vm10, %v2816_v13, %v1597_v35 }
 0x6fa   :  { %v1606_v57 = vsel %vm1603_vm11, %v1605_v54, %v1601_v55  ;;  %v1621_v18 = vsel %vm1620_vm15, %v2818_v38, %v1617_v33 }
 0x6fb   :  { %v1629_v1 = vmul.f32 %v1628_v48, %v1606_v57  ;;  %v1626_v28 = vsel %vm1623_vm6, %v1625_v27, %v1621_v18 }
 0x6fc   :  { %v1632_v30 = vsub.f32 1.0, %v1626_v28  ;;  %v1634_v22 = vmul.f32 0.0, %v1626_v28 }
 0x6fd   :  { %v1630_v56 = vadd.f32 %v1629_v1, %v3524_v9 }
 0x6ff   :  { %2819 = vtanh.f32 %v1630_v56 }
 0x705   :  { %v2820_v40 = vpop.eup %2819 }
 0x706   :  { %v1633_v42 = vmul.f32 %v2820_v40, %v1632_v30  ;;  %v3553_v30 = vpop.permute.xlu1 %1637 }
 0x708   :  { %v3527_v25 = vadd.f32 %v1634_v22, %v1633_v42  ;;  %v1783_v42 = vrot.slane %v3550_v12, 2 }
 0x70a   :  { %2682 = vmatmul.msk.f32.vlgmr.msra.gmra.mxu1 %vm89_vm0, %v3527_v25  ;;  %2683 = vmatmul.msk.f32.vlgmr.msrb.gmra.mxu2 %vm89_vm0, %v3527_v25 }
 0x70b   :  { %2684 = vmatmul.msk.f32.vlgmr.msra.gmra.mxu3 %vm89_vm0, %v3527_v25  ;;  %1979 = vmatpush.msra.mxu1 %v3373_v53 }
 0x70c   :  { %2080 = vmatpush.msrb.mxu2 %v3340_v31  ;;  %2100 = vmatpush.msra.mxu3 %v3361_v2 }
 0x70d   :  { %1980 = vmatpush.msra.mxu1 %v3377_v26 }
 0x70e   :  { %2081 = vmatpush.msrb.mxu2 %v3343_v60  ;;  %2101 = vmatpush.msra.mxu3 %v3365_v15 }
 0x70f   :  { %1981 = vmatpush.msra.mxu1 %v3384_v24 }
 0x710   :  { %2082 = vmatpush.msrb.mxu2 %v3349_v5  ;;  %2102 = vmatpush.msra.mxu3 %v3368_v19 }
 0x711   :  { %1982 = vmatpush.msra.mxu1 %v3389_v62 }
 0x712   :  { %2083 = vmatpush.msrb.mxu2 %v3354_v61  ;;  %2103 = vmatpush.msra.mxu3 %v3379_v4 }
 0x787   :  { %v1681_v47 = vpop.f32.mrf.mxu1 }
 0x788   :  { %v1725_v59 = vrot.slane %v1681_v47, 6 }
 0x78a   :  { %v1727_v0 = vadd.f32 %v1725_v59, %v3482_v8  ;;  %v3560_v59 = vsel %vm38_vm1, %v3553_v30, %v1644_v3 }
 0x78c   :  { %v2685_v23 = vmul.f32 -1.442695, %v1727_v0 }
 0x78d   :  { %v1701_v14 = vpop.f32.mrf.mxu2 }
 0x78e   :  { %2821 = vpow2.f32 %v2685_v23  ;;  %v1748_v32 = vrot.slane %v1701_v14, 6  ;;  %v1721_v11 = vpop.f32.mrf.mxu3  ;;  %v3565_v14 = vsel %vm38_vm1, %v3553_v30, %v1783_v42 }
 0x78f   :  { %v1770_v35 = vadd.f32 %v1721_v11, %v3518_v21 }
 0x790   :  { %v1750_v39 = vadd.f32 %v1748_v32, %v3496_v29 }
 0x791   :  { %v1772_v1 = vrot.slane %v1770_v35, 6 }
 0x792   :  { %v2686_v6 = vmul.f32 -1.442695, %v1750_v39  ;;  %v1648_v39 = vsub.f32 1.0, %v3560_v59 }
 0x794   :  { %v2822_v13 = vpop.eup %2821  ;;  %2823 = vpow2.f32 %v2686_v6  ;;  %v1787_v6 = vsub.f32 1.0, %v3565_v14 }
 0x795   :  { %v1731_v38 = vadd.f32 1.0, %v2822_v13 }
 0x797   :  { %2825 = vrcp.f32 %v1731_v38  ;;  %v1743_v10 = vand.u32 2147483648, %v1731_v38  ;;  %v1741_v58 = vand.u32 2147483647, %v1731_v38  ;;  %vm1737_vm7 = vweird.f32 %v1731_v38 }
 0x799   :  { %v1744_v33 = vor.u32 1.1754944e-38, %v1743_v10  ;;  %vm1742_vm9 = vcmp.eq.f32.partialorder %v1741_v58, 8.507059e+37 }
 0x79a   :  { %v2824_v50 = vpop.eup %2823 }
 0x79b   :  { %v1754_v44 = vadd.f32 1.0, %v2824_v50 }
 0x79d   :  { %v2826_v45 = vpop.eup %2825  ;;  %2827 = vrcp.f32 %v1754_v44  ;;  %v1766_v27 = vand.u32 2147483648, %v1754_v44  ;;  %v1764_v40 = vand.u32 2147483647, %v1754_v44  ;;  %vm1760_vm5 = vweird.f32 %v1754_v44 }
 0x79e   :  { %v1733_v49 = vmul.f32 %v2826_v45, %v1731_v38  ;;  %vm1738_vm2 = vweird.f32 %v2826_v45  ;;  %v1779_v38 = vrot.slane %v3527_v25, 6 }
 0x79f   :  { %vm1739_vm8 = vmor %vm1737_vm7, %vm1738_vm2  ;;  %v1767_v0 = vor.u32 1.1754944e-38, %v1766_v27  ;;  %vm1765_vm14 = vcmp.eq.f32.partialorder %v1764_v40, 8.507059e+37 }
 0x7a0   :  { %v1734_v51 = vsub.f32 1.0, %v1733_v49 }
 0x7a2   :  { %v1735_v20 = vmul.f32 %v2826_v45, %v1734_v51  ;;  %v3574_v51 = vmul.f32 -1000000.0, %v1787_v6 }
 0x7a3   :  { %v2828_v48 = vpop.eup %2827 }
 0x7a4   :  { %v1756_v54 = vmul.f32 %v2828_v48, %v1754_v44  ;;  %v1736_v55 = vadd.f32 %v2826_v45, %v1735_v20  ;;  %vm1761_vm4 = vweird.f32 %v2828_v48  ;;  %v1647_v44 = vmul.f32 %v3560_v59, %v3527_v25 }
 0x7a5   :  { %vm1762_vm3 = vmor %vm1760_vm5, %vm1761_vm4 }
 0x7a6   :  { %v1757_v57 = vsub.f32 1.0, %v1756_v54  ;;  %v1740_v63 = vsel %vm1739_vm8, %v2826_v45, %v1736_v55  ;;  %v3572_v45 = vmul.f32 -1000000.0, %v1648_v39 }
 0x7a7   :  { %v1745_v56 = vsel %vm1742_vm9, %v1744_v33, %v1740_v63 }
 0x7a8   :  { %v1758_v18 = vmul.f32 %v2828_v48, %v1757_v57  ;;  %v1774_v28 = vmul.f32 %v1772_v1, %v1745_v56  ;;  %v1650_v20 = vadd.f32 %v3572_v45, %v1647_v44 }
 0x7aa   :  { %v1759_v22 = vadd.f32 %v2828_v48, %v1758_v18  ;;  %v1775_v47 = vadd.f32 %v1774_v28, %v3516_v52  ;;  %v1651_v25 = vmax.f32 %v1650_v20, -1000000.0 }
 0x7ac   :  { %v1763_v23 = vsel %vm1762_vm3, %v2828_v48, %v1759_v22  ;;  %2829 = vtanh.f32 %v1775_v47 }
 0x7ad   :  { %v1768_v32 = vsel %vm1765_vm14, %v1767_v0, %v1763_v23 }
 0x7ae   :  { %v1777_v13 = vsub.f32 1.0, %v1768_v32  ;;  %v1781_v11 = vmul.f32 %v1779_v38, %v1768_v32 }
 0x7b2   :  { %v2830_v50 = vpop.eup %2829 }
 0x7b3   :  { %v1778_v49 = vmul.f32 %v2830_v50, %v1777_v13 }
 0x7b5   :  { %v3576_v10 = vadd.f32 %v1781_v11, %v1778_v49 }
 0x7b7   :  { %v1786_v58 = vmul.f32 %v3565_v14, %v3576_v10  ;;  %v1795_v35 = vrot.slane %v3576_v10, 2 }
 0x7b9   :  { %v1789_v48 = vadd.f32 %v3574_v51, %v1786_v58  ;;  %2687 = vmatmul.msk.f32.vlgmr.msrb.gmra.mxu0 %vm89_vm0, %v1795_v35  ;;  %2688 = vmatmul.msk.f32.vlgmr.msrb.gmra.mxu1 %vm89_vm0, %v1795_v35 }
 0x7ba   :  { %2689 = vmatmul.msk.f32.vlgmr.msra.gmra.mxu2 %vm89_vm0, %v1795_v35  ;;  %2120 = vmatpush.msrb.mxu0 %v3373_v53 }
 0x7bb   :  { %v1791_v54 = vrot.slane %v1789_v48, 2  ;;  %2209 = vmatpush.msrb.mxu1 %v3340_v31  ;;  %2229 = vmatpush.msra.mxu2 %v3361_v2 }
 0x7bc   :  { %2121 = vmatpush.msrb.mxu0 %v3377_v26 }
 0x7bd   :  { %v3590_v55 = vmax.f32 %v1651_v25, %v1791_v54  ;;  %2210 = vmatpush.msrb.mxu1 %v3343_v60  ;;  %2230 = vmatpush.msra.mxu2 %v3365_v15 }
 0x7be   :  { %2122 = vmatpush.msrb.mxu0 %v3384_v24 }
 0x7bf   :  { %2211 = vmatpush.msrb.mxu1 %v3349_v5  ;;  %2231 = vmatpush.msra.mxu2 %v3368_v19 }
 0x7c0   :  { %2123 = vmatpush.msrb.mxu0 %v3389_v62 }
 0x7c1   :  { %2212 = vmatpush.msrb.mxu1 %v3354_v61  ;;  %2232 = vmatpush.msra.mxu2 %v3379_v4 }
 0x836   :  { %v1815_v33 = vpop.f32.mrf.mxu0  ;;  %v1835_v57 = vpop.f32.mrf.mxu1 }
 0x837   :  { %v1859_v63 = vrot.slane %v1815_v33, 4  ;;  %v1882_v1 = vrot.slane %v1835_v57, 4 }
 0x839   :  { %v1861_v3 = vadd.f32 %v1859_v63, %v3477_v41  ;;  %v1884_v56 = vadd.f32 %v1882_v1, %v3492_v46 }
 0x83b   :  { %v2690_v18 = vmul.f32 -1.442695, %v1861_v3  ;;  %v2691_v27 = vmul.f32 -1.442695, %v1884_v56 }
 0x83d   :  { %2831 = vpow2.f32 %v2690_v18  ;;  %v1855_v39 = vpop.f32.mrf.mxu2  ;;  %v1913_v18 = vrot.slane %v3576_v10, 6 }
 0x83e   :  { %2833 = vpow2.f32 %v2691_v27  ;;  %v1904_v50 = vadd.f32 %v1855_v39, %v3518_v21 }
 0x840   :  { %v1906_v58 = vrot.slane %v1904_v50, 4 }
 0x843   :  { %v2832_v28 = vpop.eup %2831 }
 0x844   :  { %v2834_v40 = vpop.eup %2833  ;;  %v1865_v42 = vadd.f32 1.0, %v2832_v28 }
 0x845   :  { %v1888_v22 = vadd.f32 1.0, %v2834_v40 }
 0x846   :  { %2835 = vrcp.f32 %v1865_v42  ;;  %v1877_v41 = vand.u32 2147483648, %v1865_v42  ;;  %v1875_v46 = vand.u32 2147483647, %v1865_v42  ;;  %vm1871_vm11 = vweird.f32 %v1865_v42 }
 0x847   :  { %2837 = vrcp.f32 %v1888_v22  ;;  %v1900_v25 = vand.u32 2147483648, %v1888_v22  ;;  %vm1894_vm6 = vweird.f32 %v1888_v22  ;;  %v1898_v33 = vand.u32 2147483647, %v1888_v22 }
 0x848   :  { %v1878_v11 = vor.u32 1.1754944e-38, %v1877_v41  ;;  %vm1876_vm13 = vcmp.eq.f32.partialorder %v1875_v46, 8.507059e+37 }
 0x849   :  { %v1901_v1 = vor.u32 1.1754944e-38, %v1900_v25  ;;  %vm1899_vm7 = vcmp.eq.f32.partialorder %v1898_v33, 8.507059e+37 }
 0x84c   :  { %v2836_v47 = vpop.eup %2835 }
 0x84d   :  { %v2838_v0 = vpop.eup %2837  ;;  %v1867_v23 = vmul.f32 %v2836_v47, %v1865_v42  ;;  %vm1872_vm10 = vweird.f32 %v2836_v47 }
 0x84e   :  { %v1890_v32 = vmul.f32 %v2838_v0, %v1888_v22  ;;  %vm1873_vm12 = vmor %vm1871_vm11, %vm1872_vm10  ;;  %vm1895_vm15 = vweird.f32 %v2838_v0 }
 0x84f   :  { %v1868_v6 = vsub.f32 1.0, %v1867_v23  ;;  %vm1896_vm2 = vmor %vm1894_vm6, %vm1895_vm15 }
 0x850   :  { %v1891_v13 = vsub.f32 1.0, %v1890_v32 }
 0x851   :  { %v1869_v38 = vmul.f32 %v2836_v47, %v1868_v6 }
 0x852   :  { %v1892_v44 = vmul.f32 %v2838_v0, %v1891_v13 }
 0x853   :  { %v1870_v49 = vadd.f32 %v2836_v47, %v1869_v38 }
 0x854   :  { %v1893_v48 = vadd.f32 %v2838_v0, %v1892_v44 }
 0x855   :  { %v1874_v20 = vsel %vm1873_vm12, %v2836_v47, %v1870_v49 }
 0x856   :  { %v1879_v35 = vsel %vm1876_vm13, %v1878_v11, %v1874_v20  ;;  %v1897_v63 = vsel %vm1896_vm2, %v2838_v0, %v1893_v48 }
 0x857   :  { %v1908_v54 = vmul.f32 %v1906_v58, %v1879_v35  ;;  %v1902_v3 = vsel %vm1899_vm7, %v1901_v1, %v1897_v63 }
 0x858   :  { %v1911_v56 = vsub.f32 1.0, %v1902_v3  ;;  %v1915_v40 = vmul.f32 %v1913_v18, %v1902_v3 }
 0x859   :  { %v1909_v57 = vadd.f32 %v1908_v54, %v3524_v9 }
 0x85b   :  { %2839 = vtanh.f32 %v1909_v57 }
 0x861   :  { %v2840_v27 = vpop.eup %2839 }
 0x862   :  { %v1912_v28 = vmul.f32 %v2840_v27, %v1911_v56 }
 0x864   :  { %v3605_v42 = vadd.f32 %v1915_v40, %v1912_v28 }
 0x866   :  { %v1917_v47 = vmul.f32 %v3605_v42, %v3560_v59  ;;  %v1924_v22 = vrot.slane %v3605_v42, 4 }
 0x868   :  { %v1918_v9 = vadd.f32 %v1917_v47, %v3572_v45  ;;  %2692 = vmatmul.msk.f32.vlgmr.msrb.gmra.mxu3 %vm89_vm0, %v1924_v22  ;;  %2693 = vmatmul.msk.f32.vlgmr.msra.gmra.mxu0 %vm89_vm0, %v1924_v22 }
 0x869   :  { %2694 = vmatmul.msk.f32.vlgmr.msra.gmra.mxu1 %vm89_vm0, %v1924_v22  ;;  %2249 = vmatpush.msrb.mxu3 %v3373_v53 }
 0x86a   :  { %v1920_v10 = vrot.slane %v1918_v9, 4  ;;  %2343 = vmatpush.msra.mxu0 %v3340_v31  ;;  %2363 = vmatpush.msra.mxu1 %v3361_v2 }
 0x86b   :  { %2250 = vmatpush.msrb.mxu3 %v3377_v26 }
 0x86c   :  { %2344 = vmatpush.msra.mxu0 %v3343_v60  ;;  %2364 = vmatpush.msra.mxu1 %v3365_v15  ;;  %v3621_v59 = vmax.f32 %v3590_v55, %v1920_v10 }
 0x86d   :  { %2251 = vmatpush.msrb.mxu3 %v3384_v24 }
 0x86e   :  { %2345 = vmatpush.msra.mxu0 %v3349_v5  ;;  %2365 = vmatpush.msra.mxu1 %v3368_v19 }
 0x86f   :  { %2252 = vmatpush.msrb.mxu3 %v3389_v62 }
 0x870   :  { %2346 = vmatpush.msra.mxu0 %v3354_v61  ;;  %2366 = vmatpush.msra.mxu1 %v3379_v4 }
 0x8e5   :  { %v1964_v45 = vpop.f32.mrf.mxu0 }
 0x8e6   :  { %v2011_v0 = vrot.slane %v1964_v45, 2 }
 0x8e8   :  { %v2013_v23 = vadd.f32 %v2011_v0, %v3496_v29  ;;  %v1984_v29 = vpop.f32.mrf.mxu1  ;;  %v2042_v0 = vrot.slane %v3605_v42, 6 }
 0x8e9   :  { %v2033_v25 = vadd.f32 %v1984_v29, %v3518_v21 }
 0x8ea   :  { %v2696_v32 = vmul.f32 -1.442695, %v2013_v23 }
 0x8eb   :  { %v1944_v39 = vpop.f32.mrf.mxu3  ;;  %v2035_v1 = vrot.slane %v2033_v25, 2 }
 0x8ec   :  { %2841 = vpow2.f32 %v2696_v32  ;;  %v1988_v55 = vrot.slane %v1944_v39, 2 }
 0x8ee   :  { %v1990_v6 = vadd.f32 %v1988_v55, %v3482_v8 }
 0x8f0   :  { %v2695_v13 = vmul.f32 -1.442695, %v1990_v6 }
 0x8f2   :  { %v2842_v41 = vpop.eup %2841  ;;  %2843 = vpow2.f32 %v2695_v13 }
 0x8f3   :  { %v2017_v38 = vadd.f32 1.0, %v2842_v41 }
 0x8f5   :  { %2845 = vrcp.f32 %v2017_v38  ;;  %v2029_v27 = vand.u32 2147483648, %v2017_v38  ;;  %vm2023_vm14 = vweird.f32 %v2017_v38  ;;  %v2027_v40 = vand.u32 2147483647, %v2017_v38 }
 0x8f7   :  { %v2030_v9 = vor.u32 1.1754944e-38, %v2029_v27  ;;  %vm2028_vm11 = vcmp.eq.f32.partialorder %v2027_v40, 8.507059e+37 }
 0x8f8   :  { %v2844_v46 = vpop.eup %2843 }
 0x8f9   :  { %v1994_v50 = vadd.f32 1.0, %v2844_v46 }
 0x8fb   :  { %2847 = vrcp.f32 %v1994_v50  ;;  %v2846_v44 = vpop.eup %2845  ;;  %v2006_v48 = vand.u32 2147483648, %v1994_v50  ;;  %v2004_v8 = vand.u32 2147483647, %v1994_v50  ;;  %vm2000_vm9 = vweird.f32 %v1994_v50 }
 0x8fc   :  { %v2019_v49 = vmul.f32 %v2846_v44, %v2017_v38  ;;  %vm2024_vm3 = vweird.f32 %v2846_v44 }
 0x8fd   :  { %v2007_v63 = vor.u32 1.1754944e-38, %v2006_v48  ;;  %vm2005_vm5 = vcmp.eq.f32.partialorder %v2004_v8, 8.507059e+37  ;;  %vm2025_vm10 = vmor %vm2023_vm14, %vm2024_vm3 }
 0x8fe   :  { %v2020_v58 = vsub.f32 1.0, %v2019_v49 }
 0x900   :  { %v2021_v33 = vmul.f32 %v2846_v44, %v2020_v58 }
 0x901   :  { %v2848_v11 = vpop.eup %2847 }
 0x902   :  { %v1996_v20 = vmul.f32 %v2848_v11, %v1994_v50  ;;  %vm2001_vm8 = vweird.f32 %v2848_v11  ;;  %v2022_v56 = vadd.f32 %v2846_v44, %v2021_v33 }
 0x903   :  { %vm2002_vm4 = vmor %vm2000_vm9, %vm2001_vm8 }
 0x904   :  { %v1997_v35 = vsub.f32 1.0, %v1996_v20  ;;  %v2026_v22 = vsel %vm2025_vm10, %v2846_v44, %v2022_v56 }
 0x905   :  { %v2031_v10 = vsel %vm2028_vm11, %v2030_v9, %v2026_v22 }
 0x906   :  { %v1998_v54 = vmul.f32 %v2848_v11, %v1997_v35  ;;  %v2040_v45 = vsub.f32 1.0, %v2031_v10  ;;  %v2044_v39 = vmul.f32 %v2042_v0, %v2031_v10  ;;  %v2891_v0 = vld [vmem:[#allocation2 + $0x178] sm:$0xff] }
 0x908   :  { %v1999_v57 = vadd.f32 %v2848_v11, %v1998_v54 }
 0x90a   :  { %v2003_v3 = vsel %vm2002_vm4, %v2848_v11, %v1999_v57  ;;  %v2177_v57 = vrot.slane %v3553_v30, 6 }
 0x90b   :  { %v2008_v18 = vsel %vm2005_vm5, %v2007_v63, %v2003_v3 }
 0x90c   :  { %v2037_v28 = vmul.f32 %v2035_v1, %v2008_v18  ;;  %v3667_v56 = vsel %vm38_vm1, %v3550_v12, %v2177_v57 }
 0x90d   :  { %v2181_v27 = vsub.f32 1.0, %v3667_v56 }
 0x90e   :  { %v2038_v47 = vadd.f32 %v2037_v28, %v3516_v52 }
 0x90f   :  { %v3671_v9 = vmul.f32 -1000000.0, %v2181_v27 }
 0x910   :  { %2849 = vtanh.f32 %v2038_v47 }
 0x916   :  { %v2850_v23 = vpop.eup %2849 }
 0x917   :  { %v2041_v32 = vmul.f32 %v2850_v23, %v2040_v45 }
 0x919   :  { %v2045_v55 = vadd.f32 %v2044_v39, %v2041_v32  ;;  %v2892_v32 = vld [vmem:[#allocation2 + $0x148] sm:$0xff] }
 0x91b   :  { %v2046_v6 = vmul.f32 %v2045_v55, %v3565_v14  ;;  %v3635_v13 = vrot.slane %v2045_v55, 6  ;;  %v2893_v55 = vld [vmem:[#allocation2 + $0x118] sm:$0xff] }
 0x91d   :  { %v2047_v41 = vadd.f32 %v2046_v6, %v3574_v51  ;;  %2697 = vmatmul.msk.f32.vlgmr.msrb.gmra.mxu2 %vm89_vm0, %v3635_v13  ;;  %2698 = vmatmul.msk.f32.vlgmr.msra.gmra.mxu3 %vm89_vm0, %v3635_v13  ;;  %v2894_v6 = vld [vmem:[#allocation2 + $0xe8] sm:$0xff] }
 0x91e   :  { %2699 = vmatmul.msk.f32.vlgmr.msrb.gmra.mxu0 %vm89_vm0, %v3635_v13  ;;  %2383 = vmatpush.msrb.mxu2 %v3373_v53 }
 0x91f   :  { %v2049_v52 = vrot.slane %v2047_v41, 6  ;;  %2472 = vmatpush.msra.mxu3 %v3340_v31  ;;  %2492 = vmatpush.msrb.mxu0 %v3361_v2 }
 0x920   :  { %2384 = vmatpush.msrb.mxu2 %v3377_v26 }
 0x921   :  { %2473 = vmatpush.msra.mxu3 %v3343_v60  ;;  %2493 = vmatpush.msrb.mxu0 %v3365_v15  ;;  %v3651_v14 = vmax.f32 %v3621_v59, %v2049_v52 }
 0x922   :  { %2385 = vmatpush.msrb.mxu2 %v3384_v24 }
 0x923   :  { %2474 = vmatpush.msra.mxu3 %v3349_v5  ;;  %2494 = vmatpush.msrb.mxu0 %v3368_v19 }
 0x924   :  { %2386 = vmatpush.msrb.mxu2 %v3389_v62 }
 0x925   :  { %2475 = vmatpush.msra.mxu3 %v3354_v61  ;;  %2495 = vmatpush.msrb.mxu0 %v3379_v4 }
 0x99b   :  { %v2125_v49 = vpop.f32.mrf.mxu0 }
 0x99c   :  { %v2168_v29 = vadd.f32 %v2125_v49, %v3518_v21 }
 0x9a0   :  { %v2085_v31 = vpop.f32.mrf.mxu2  ;;  %v2105_v2 = vpop.f32.mrf.mxu3 }
 0x9a1   :  { %v2128_v60 = vadd.f32 %v2085_v31, %v3469_v43  ;;  %v2148_v15 = vadd.f32 %v2105_v2, %v3473_v17 }
 0x9a3   :  { %v2700_v53 = vmul.f32 -1.442695, %v2128_v60  ;;  %v2701_v26 = vmul.f32 -1.442695, %v2148_v15 }
 0x9a5   :  { %2851 = vpow2.f32 %v2700_v53 }
 0x9a6   :  { %2853 = vpow2.f32 %v2701_v26 }
 0x9ab   :  { %v2852_v24 = vpop.eup %2851 }
 0x9ac   :  { %v2854_v5 = vpop.eup %2853  ;;  %v2132_v51 = vadd.f32 1.0, %v2852_v24 }
 0x9ad   :  { %v2152_v19 = vadd.f32 1.0, %v2854_v5 }
 0x9ae   :  { %2855 = vrcp.f32 %v2132_v51  ;;  %v2144_v38 = vand.u32 2147483648, %v2132_v51  ;;  %v2142_v44 = vand.u32 2147483647, %v2132_v51  ;;  %vm2138_vm13 = vweird.f32 %v2132_v51 }
 0x9af   :  { %2857 = vrcp.f32 %v2152_v19  ;;  %v2164_v8 = vand.u32 2147483648, %v2152_v19  ;;  %vm2158_vm7 = vweird.f32 %v2152_v19  ;;  %v2162_v33 = vand.u32 2147483647, %v2152_v19 }
 0x9b0   :  { %v2145_v58 = vor.u32 1.1754944e-38, %v2144_v38  ;;  %vm2143_vm6 = vcmp.eq.f32.partialorder %v2142_v44, 8.507059e+37 }
 0x9b1   :  { %v2165_v3 = vor.u32 1.1754944e-38, %v2164_v8  ;;  %vm2163_vm9 = vcmp.eq.f32.partialorder %v2162_v33, 8.507059e+37  ;;  %v2316_v33 = vrot.slane %v3553_v30, 2 }
 0x9b4   :  { %v2856_v62 = vpop.eup %2855 }
 0x9b5   :  { %v2858_v61 = vpop.eup %2857  ;;  %v2134_v42 = vmul.f32 %v2856_v62, %v2132_v51  ;;  %vm2139_vm12 = vweird.f32 %v2856_v62 }
 0x9b6   :  { %v2154_v4 = vmul.f32 %v2858_v61, %v2152_v19  ;;  %vm2140_vm15 = vmor %vm2138_vm13, %vm2139_vm12  ;;  %vm2159_vm2 = vweird.f32 %v2858_v61 }
 0x9b7   :  { %v2135_v59 = vsub.f32 1.0, %v2134_v42  ;;  %vm2160_vm8 = vmor %vm2158_vm7, %vm2159_vm2 }
 0x9b8   :  { %v2155_v46 = vsub.f32 1.0, %v2154_v4 }
 0x9b9   :  { %v2136_v50 = vmul.f32 %v2856_v62, %v2135_v59 }
 0x9ba   :  { %v2156_v11 = vmul.f32 %v2858_v61, %v2155_v46 }
 0x9bb   :  { %v2137_v20 = vadd.f32 %v2856_v62, %v2136_v50 }
 0x9bc   :  { %v2157_v25 = vadd.f32 %v2858_v61, %v2156_v11 }
 0x9bd   :  { %v2141_v35 = vsel %vm2140_vm15, %v2856_v62, %v2137_v20 }
 0x9be   :  { %v2146_v48 = vsel %vm2143_vm6, %v2145_v58, %v2141_v35  ;;  %v2161_v1 = vsel %vm2160_vm8, %v2858_v61, %v2157_v25 }
 0x9bf   :  { %v2169_v54 = vmul.f32 %v2168_v29, %v2146_v48  ;;  %v2166_v18 = vsel %vm2163_vm9, %v2165_v3, %v2161_v1 }
 0x9c0   :  { %v2172_v28 = vsub.f32 1.0, %v2166_v18  ;;  %v2175_v22 = vmul.f32 %v2166_v18, %v3635_v13  ;;  %v3696_v18 = vsel %vm38_vm1, %v3550_v12, %v2316_v33 }
 0x9c1   :  { %v2170_v63 = vadd.f32 %v2169_v54, %v3507_v16 }
 0x9c3   :  { %2859 = vtanh.f32 %v2170_v63 }
 0x9c9   :  { %v2860_v40 = vpop.eup %2859 }
 0x9ca   :  { %v2173_v47 = vmul.f32 %v2860_v40, %v2172_v28  ;;  %v2320_v28 = vsub.f32 1.0, %v3696_v18 }
 0x9cc   :  { %v3673_v10 = vadd.f32 %v2175_v22, %v2173_v47 }
 0x9ce   :  { %2702 = vmatmul.msk.f32.vlgmr.msrb.gmra.mxu1 %vm89_vm0, %v3673_v10  ;;  %2703 = vmatmul.msk.f32.vlgmr.msra.gmra.mxu2 %vm89_vm0, %v3673_v10  ;;  %v2180_v45 = vmul.f32 %v3667_v56, %v3673_v10  ;;  %v2312_v30 = vrot.slane %v3673_v10, 6 }
 0x9cf   :  { %2704 = vmatmul.msk.f32.vlgmr.msrb.gmra.mxu3 %vm89_vm0, %v3673_v10  ;;  %2512 = vmatpush.msrb.mxu1 %v2891_v0  ;;  %v3700_v0 = vmul.f32 -1000000.0, %v2320_v28 }
 0x9d0   :  { %v3684_v23 = vadd.f32 %v3671_v9, %v2180_v45 }
 0x9d1   :  { %2513 = vmatpush.msrb.mxu1 %v2892_v32 }
 0x9d2   :  { %v2184_v39 = vmax.f32 %v3651_v14, %v3684_v23 }
 0x9d3   :  { %2514 = vmatpush.msrb.mxu1 %v2893_v55 }
 0x9d5   :  { %2515 = vmatpush.msrb.mxu1 %v2894_v6 }
 0xa4b   :  { %v2214_v13 = vpop.f32.mrf.mxu1 }
 0xa4c   :  { %v2258_v41 = vrot.slane %v2214_v13, 6 }
 0xa4e   :  { %v2260_v52 = vadd.f32 %v2258_v41, %v3486_v34 }
 0xa50   :  { %v2705_v31 = vmul.f32 -1.442695, %v2260_v52 }
 0xa51   :  { %v2234_v2 = vpop.f32.mrf.mxu2 }
 0xa52   :  { %2861 = vpow2.f32 %v2705_v31  ;;  %v2281_v60 = vrot.slane %v2234_v2, 6  ;;  %v2254_v61 = vpop.f32.mrf.mxu3 }
 0xa53   :  { %v2303_v46 = vadd.f32 %v2254_v61, %v3518_v21 }
 0xa54   :  { %v2283_v15 = vadd.f32 %v2281_v60, %v3501_v7 }
 0xa55   :  { %v2305_v29 = vrot.slane %v2303_v46, 6 }
 0xa56   :  { %v2706_v53 = vmul.f32 -1.442695, %v2283_v15 }
 0xa58   :  { %v2862_v26 = vpop.eup %2861  ;;  %2863 = vpow2.f32 %v2706_v53 }
 0xa59   :  { %v2264_v24 = vadd.f32 1.0, %v2862_v26 }
 0xa5b   :  { %2865 = vrcp.f32 %v2264_v24  ;;  %v2276_v4 = vand.u32 2147483648, %v2264_v24  ;;  %v2274_v38 = vand.u32 2147483647, %v2264_v24  ;;  %vm2270_vm5 = vweird.f32 %v2264_v24 }
 0xa5d   :  { %v2277_v11 = vor.u32 1.1754944e-38, %v2276_v4  ;;  %vm2275_vm14 = vcmp.eq.f32.partialorder %v2274_v38, 8.507059e+37 }
 0xa5e   :  { %v2864_v5 = vpop.eup %2863 }
 0xa5f   :  { %v2287_v51 = vadd.f32 1.0, %v2864_v5 }
 0xa61   :  { %v2866_v19 = vpop.eup %2865  ;;  %2867 = vrcp.f32 %v2287_v51  ;;  %v2299_v25 = vand.u32 2147483648, %v2287_v51  ;;  %v2297_v8 = vand.u32 2147483647, %v2287_v51  ;;  %vm2293_vm11 = vweird.f32 %v2287_v51 }
 0xa62   :  { %v2266_v62 = vmul.f32 %v2866_v19, %v2264_v24  ;;  %vm2271_vm4 = vweird.f32 %v2866_v19 }
 0xa63   :  { %vm2272_vm3 = vmor %vm2270_vm5, %vm2271_vm4  ;;  %v2300_v1 = vor.u32 1.1754944e-38, %v2299_v25  ;;  %vm2298_vm13 = vcmp.eq.f32.partialorder %v2297_v8, 8.507059e+37 }
 0xa64   :  { %v2267_v42 = vsub.f32 1.0, %v2266_v62 }
 0xa66   :  { %v2268_v59 = vmul.f32 %v2866_v19, %v2267_v42 }
 0xa67   :  { %v2868_v50 = vpop.eup %2867 }
 0xa68   :  { %v2289_v44 = vmul.f32 %v2868_v50, %v2287_v51  ;;  %v2269_v49 = vadd.f32 %v2866_v19, %v2268_v59  ;;  %vm2294_vm10 = vweird.f32 %v2868_v50 }
 0xa69   :  { %vm2295_vm12 = vmor %vm2293_vm11, %vm2294_vm10 }
 0xa6a   :  { %v2290_v20 = vsub.f32 1.0, %v2289_v44  ;;  %v2273_v58 = vsel %vm2272_vm3, %v2866_v19, %v2269_v49 }
 0xa6b   :  { %v2278_v35 = vsel %vm2275_vm14, %v2277_v11, %v2273_v58 }
 0xa6c   :  { %v2291_v48 = vmul.f32 %v2868_v50, %v2290_v20  ;;  %v2307_v54 = vmul.f32 %v2305_v29, %v2278_v35 }
 0xa6e   :  { %v2292_v57 = vadd.f32 %v2868_v50, %v2291_v48  ;;  %v2308_v63 = vadd.f32 %v2307_v54, %v3511_v37 }
 0xa70   :  { %v2296_v3 = vsel %vm2295_vm12, %v2868_v50, %v2292_v57  ;;  %2869 = vtanh.f32 %v2308_v63 }
 0xa71   :  { %v2301_v27 = vsel %vm2298_vm13, %v2300_v1, %v2296_v3 }
 0xa72   :  { %v2310_v40 = vsub.f32 1.0, %v2301_v27  ;;  %v2314_v45 = vmul.f32 %v2312_v30, %v2301_v27 }
 0xa76   :  { %v2870_v47 = vpop.eup %2869 }
 0xa77   :  { %v2311_v22 = vmul.f32 %v2870_v47, %v2310_v40 }
 0xa79   :  { %v3702_v32 = vadd.f32 %v2314_v45, %v2311_v22 }
 0xa7b   :  { %v2319_v55 = vmul.f32 %v3696_v18, %v3702_v32  ;;  %v2328_v36 = vrot.slane %v3702_v32, 2  ;;  %v2446_v33 = vrot.slane %v3702_v32, 6 }
 0xa7d   :  { %2707 = vmatmul.msk.f32.vlgmr.msra.gmra.mxu0 %vm89_vm0, %v2328_v36  ;;  %2708 = vmatmul.msk.f32.vlgmr.msra.gmra.mxu1 %vm89_vm0, %v2328_v36  ;;  %v2322_v12 = vadd.f32 %v3700_v0, %v2319_v55 }
 0xa7e   :  { %2709 = vmatmul.msk.f32.vlgmr.msrb.gmra.mxu2 %vm89_vm0, %v2328_v36 }
 0xa7f   :  { %v2324_v10 = vrot.slane %v2322_v12, 2 }
 0xa81   :  { %v3714_v6 = vmax.f32 %v2184_v39, %v2324_v10  ;;  %v2588_v10 = vld [vmem:[#allocation2 + $0x228] sm:$0xff] }
 0xa82   :  { %2605 = vmatpush.msra.mxu2 %v2588_v10 }
 0xafa   :  { %v2348_v13 = vpop.f32.mrf.mxu0  ;;  %v2368_v41 = vpop.f32.mrf.mxu1 }
 0xafb   :  { %v2392_v52 = vrot.slane %v2348_v13, 4  ;;  %v2415_v31 = vrot.slane %v2368_v41, 4  ;;  %v2587_v13 = vld [vmem:[#allocation2 + $0x1f8] sm:$0xff]  ;;  %v2586_v41 = vld [vmem:[#allocation2 + $0x1c8] sm:$0xff] }
 0xafc   :  { %2606 = vmatpush.msra.mxu2 %v2587_v13 }
 0xafd   :  { %v2394_v2 = vadd.f32 %v2392_v52, %v3469_v43  ;;  %v2417_v60 = vadd.f32 %v2415_v31, %v3473_v17 }
 0xafe   :  { %2607 = vmatpush.msra.mxu2 %v2586_v41 }
 0xaff   :  { %v2710_v15 = vmul.f32 -1.442695, %v2394_v2  ;;  %v2711_v53 = vmul.f32 -1.442695, %v2417_v60 }
 0xb01   :  { %2871 = vpow2.f32 %v2710_v15  ;;  %v2388_v62 = vpop.f32.mrf.mxu2 }
 0xb02   :  { %2873 = vpow2.f32 %v2711_v53  ;;  %v2437_v59 = vadd.f32 %v2388_v62, %v3518_v21 }
 0xb04   :  { %v2439_v49 = vrot.slane %v2437_v59, 4 }
 0xb07   :  { %v2872_v26 = vpop.eup %2871 }
 0xb08   :  { %v2874_v24 = vpop.eup %2873  ;;  %v2398_v5 = vadd.f32 1.0, %v2872_v26 }
 0xb09   :  { %v2421_v51 = vadd.f32 1.0, %v2874_v24 }
 0xb0a   :  { %2875 = vrcp.f32 %v2398_v5  ;;  %v2410_v43 = vand.u32 2147483648, %v2398_v5  ;;  %v2408_v17 = vand.u32 2147483647, %v2398_v5  ;;  %vm2404_vm15 = vweird.f32 %v2398_v5 }
 0xb0b   :  { %2877 = vrcp.f32 %v2421_v51  ;;  %v2433_v58 = vand.u32 2147483648, %v2421_v51  ;;  %vm2427_vm8 = vweird.f32 %v2421_v51  ;;  %v2431_v35 = vand.u32 2147483647, %v2421_v51 }
 0xb0c   :  { %v2411_v50 = vor.u32 1.1754944e-38, %v2410_v43  ;;  %vm2409_vm2 = vcmp.eq.f32.partialorder %v2408_v17, 8.507059e+37 }
 0xb0d   :  { %v2434_v21 = vor.u32 1.1754944e-38, %v2433_v58  ;;  %vm2432_vm4 = vcmp.eq.f32.partialorder %v2431_v35, 8.507059e+37 }
 0xb10   :  { %v2876_v14 = vpop.eup %2875 }
 0xb11   :  { %v2878_v23 = vpop.eup %2877  ;;  %v2400_v39 = vmul.f32 %v2876_v14, %v2398_v5  ;;  %vm2405_vm1 = vweird.f32 %v2876_v14 }
 0xb12   :  { %v2423_v19 = vmul.f32 %v2878_v23, %v2421_v51  ;;  %vm2406_vm6 = vmor %vm2404_vm15, %vm2405_vm1  ;;  %vm2428_vm7 = vweird.f32 %v2878_v23  ;;  %v2895_v51 = vld [vmem:[#allocation2 + $0x249] ss:$0 sm:$0xff] }
 0xb13   :  { %v2401_v61 = vsub.f32 1.0, %v2400_v39  ;;  %vm2429_vm9 = vmor %vm2427_vm8, %vm2428_vm7 }
 0xb14   :  { %v2424_v42 = vsub.f32 1.0, %v2423_v19 }
 0xb15   :  { %v2402_v4 = vmul.f32 %v2876_v14, %v2401_v61 }
 0xb16   :  { %v2425_v38 = vmul.f32 %v2878_v23, %v2424_v42 }
 0xb17   :  { %v2403_v46 = vadd.f32 %v2876_v14, %v2402_v4 }
 0xb18   :  { %v2426_v20 = vadd.f32 %v2878_v23, %v2425_v38 }
 0xb19   :  { %v2407_v44 = vsel %vm2406_vm6, %v2876_v14, %v2403_v46 }
 0xb1a   :  { %v2412_v11 = vsel %vm2409_vm2, %v2411_v50, %v2407_v44  ;;  %v2430_v25 = vsel %vm2429_vm9, %v2878_v23, %v2426_v20 }
 0xb1b   :  { %v2441_v29 = vmul.f32 %v2439_v49, %v2412_v11  ;;  %v2435_v54 = vsel %vm2432_vm4, %v2434_v21, %v2430_v25 }
 0xb1c   :  { %v2444_v8 = vsub.f32 1.0, %v2435_v54  ;;  %v2448_v1 = vmul.f32 %v2446_v33, %v2435_v54 }
 0xb1d   :  { %v2442_v48 = vadd.f32 %v2441_v29, %v3507_v16 }
 0xb1f   :  { %2879 = vtanh.f32 %v2442_v48 }
 0xb25   :  { %v2880_v57 = vpop.eup %2879 }
 0xb26   :  { %v2445_v63 = vmul.f32 %v2880_v57, %v2444_v8 }
 0xb28   :  { %v3721_v3 = vadd.f32 %v2448_v1, %v2445_v63 }
 0xb2a   :  { %v2457_v27 = vrot.slane %v3721_v3, 4  ;;  %v2450_v28 = vmul.f32 %v3721_v3, %v3667_v56  ;;  %v2575_v20 = vrot.slane %v3721_v3, 6 }
 0xb2c   :  { %2712 = vmatmul.msk.f32.vlgmr.msra.gmra.mxu3 %vm89_vm0, %v2457_v27  ;;  %2713 = vmatmul.msk.f32.vlgmr.msrb.gmra.mxu0 %vm89_vm0, %v2457_v27  ;;  %v2451_v16 = vadd.f32 %v2450_v28, %v3671_v9 }
 0xb2d   :  { %2714 = vmatmul.msk.f32.vlgmr.msrb.gmra.mxu1 %vm89_vm0, %v2457_v27 }
 0xb2e   :  { %v2453_v40 = vrot.slane %v2451_v16, 4 }
 0xb30   :  { %v3731_v30 = vmax.f32 %v3714_v6, %v2453_v40  ;;  %v2585_v6 = vld [vmem:[#allocation2 + $0x198] sm:$0xff] }
 0xb31   :  { %2608 = vmatpush.msra.mxu2 %v2585_v6 }
 0xba9   :  { %v2497_v47 = vpop.f32.mrf.mxu0 }
 0xbaa   :  { %v2544_v22 = vrot.slane %v2497_v47, 2  ;;  %v2517_v26 = vpop.f32.mrf.mxu1 }
 0xbab   :  { %v2566_v14 = vadd.f32 %v2895_v51, %v2517_v26 }
 0xbac   :  { %v2546_v45 = vadd.f32 %v2544_v22, %v3501_v7 }
 0xbad   :  { %v2568_v42 = vrot.slane %v2566_v14, 2 }
 0xbae   :  { %v2716_v32 = vmul.f32 -1.442695, %v2546_v45 }
 0xbaf   :  { %v2477_v55 = vpop.f32.mrf.mxu3 }
 0xbb0   :  { %2881 = vpow2.f32 %v2716_v32  ;;  %v2521_v56 = vrot.slane %v2477_v55, 2 }
 0xbb2   :  { %v2523_v36 = vadd.f32 %v2521_v56, %v3486_v34 }
 0xbb4   :  { %v2715_v12 = vmul.f32 -1.442695, %v2523_v36 }
 0xbb6   :  { %v2882_v9 = vpop.eup %2881  ;;  %2883 = vpow2.f32 %v2715_v12 }
 0xbb7   :  { %v2550_v52 = vadd.f32 1.0, %v2882_v9 }
 0xbb9   :  { %2885 = vrcp.f32 %v2550_v52  ;;  %v2562_v59 = vand.u32 2147483648, %v2550_v52  ;;  %vm2556_vm12 = vweird.f32 %v2550_v52  ;;  %v2560_v46 = vand.u32 2147483647, %v2550_v52 }
 0xbbb   :  { %v2563_v49 = vor.u32 1.1754944e-38, %v2562_v59  ;;  %vm2561_vm1 = vcmp.eq.f32.partialorder %v2560_v46, 8.507059e+37 }
 0xbbc   :  { %v2884_v7 = vpop.eup %2883 }
 0xbbd   :  { %v2527_v31 = vadd.f32 1.0, %v2884_v7 }
 0xbbf   :  { %2887 = vrcp.f32 %v2527_v31  ;;  %v2886_v2 = vpop.eup %2885  ;;  %v2539_v5 = vand.u32 2147483648, %v2527_v31  ;;  %v2537_v39 = vand.u32 2147483647, %v2527_v31  ;;  %vm2533_vm3 = vweird.f32 %v2527_v31 }
 0xbc0   :  { %v2552_v60 = vmul.f32 %v2886_v2, %v2550_v52  ;;  %vm2557_vm11 = vweird.f32 %v2886_v2 }
 0xbc1   :  { %v2540_v61 = vor.u32 1.1754944e-38, %v2539_v5  ;;  %vm2538_vm10 = vcmp.eq.f32.partialorder %v2537_v39, 8.507059e+37  ;;  %vm2558_vm13 = vmor %vm2556_vm12, %vm2557_vm11 }
 0xbc2   :  { %v2553_v53 = vsub.f32 1.0, %v2552_v60 }
 0xbc4   :  { %v2554_v19 = vmul.f32 %v2886_v2, %v2553_v53 }
 0xbc5   :  { %v2888_v15 = vpop.eup %2887 }
 0xbc6   :  { %v2529_v34 = vmul.f32 %v2888_v15, %v2527_v31  ;;  %vm2534_vm5 = vweird.f32 %v2888_v15  ;;  %v2555_v4 = vadd.f32 %v2886_v2, %v2554_v19 }
 0xbc7   :  { %vm2535_vm14 = vmor %vm2533_vm3, %vm2534_vm5 }
 0xbc8   :  { %v2530_v24 = vsub.f32 1.0, %v2529_v34  ;;  %v2559_v44 = vsel %vm2558_vm13, %v2886_v2, %v2555_v4 }
 0xbc9   :  { %v2564_v11 = vsel %vm2561_vm1, %v2563_v49, %v2559_v44 }
 0xbca   :  { %v2531_v23 = vmul.f32 %v2888_v15, %v2530_v24  ;;  %v2573_v58 = vsub.f32 1.0, %v2564_v11  ;;  %v2577_v48 = vmul.f32 %v2575_v20, %v2564_v11 }
 0xbcc   :  { %v2532_v62 = vadd.f32 %v2888_v15, %v2531_v23 }
 0xbce   :  { %v2536_v43 = vsel %vm2535_vm14, %v2888_v15, %v2532_v62 }
 0xbcf   :  { %v2541_v17 = vsel %vm2538_vm10, %v2540_v61, %v2536_v43 }
 0xbd0   :  { %v2570_v38 = vmul.f32 %v2568_v42, %v2541_v17 }
 0xbd2   :  { %v2571_v50 = vadd.f32 %v2570_v38, %v3511_v37  ;;  %v2589_v37 = vld [vmem:[#allocation2 + $0x261] ss:$0 sm:$0xff] }
 0xbd4   :  { %2889 = vtanh.f32 %v2571_v50 }
 0xbda   :  { %v2890_v29 = vpop.eup %2889 }
 0xbdb   :  { %v2574_v35 = vmul.f32 %v2890_v29, %v2573_v58 }
 0xbdd   :  { %v2578_v25 = vadd.f32 %v2577_v48, %v2574_v35 }
 0xbdf   :  { %v2579_v21 = vmul.f32 %v2578_v25, %v3696_v18 }
 0xbe1   :  { %v2580_v54 = vadd.f32 %v2579_v21, %v3700_v0 }
 0xbe3   :  { %v2582_v8 = vrot.slane %v2580_v54, 6 }
 0xbe5   :  { %v2584_v33 = vmax.f32 %v3731_v30, %v2582_v8 }
 0xbe7   :  { %2717 = vmatmul.msk.f32.vlgmr.msra.gmra.mxu2 %vm89_vm0, %v2584_v33 }
 0xc6a   :  { %v2610_v57 = vpop.f32.mrf.mxu2 }
 0xc6b   :  { %v2611_v63 = vadd.f32 %v2610_v57, %v2589_v37 }
 0xc6d   :  { %2613 = vst [vmem:[%s3747_s3 + $0x10] sm:$0x3] %v2611_v63 }
 0xc6e   :  { %2618 = vsyncpa [#allocation3], 1 }

</bundles_post_ra>
